<compile_context>
chip_gen: v7x
topology: tpu7x:2x2x1
jax: 0.10.0
libtpu: 0.0.40
codegen_flags: <defaults>
</compile_context>

<pallas_src>
import jax
import jax.numpy as jnp
from jax.experimental import pallas as pl
from jax.experimental.pallas import tpu as pltpu

LANE = 128


def _round_up(x, m):
    return (x + m - 1) // m * m


def _vmem_capacity_bytes():
    """Physical VMEM of the attached TPU; conservative 64 MiB (v7x) fallback."""
    try:
        info = pltpu.get_tpu_info()
        cap = int(getattr(info, "vmem_capacity_bytes"))
        if cap > 0:
            return cap
    except Exception:
        pass
    return 64 * 1024 * 1024


def _vmem_estimate(N, Cp, C8p, tq):
    """Conservative (double-buffered) VMEM budget for one grid step, bytes."""
    est = 0
    est += 2 * N * Cp * 4                          # resident full-image x (f32)
    est += 2 * (2 * Cp * C8p + Cp * Cp) * 2        # Wq, Wk, Wv (bf16)
    est += 2 * (2 * C8p + Cp) * 4                  # biases (f32)
    est += C8p * N * 2 + N * Cp * 2                # K^T / V scratch (bf16)
    est += 2 * tq * Cp * 4                         # output tile (f32, dbl buf)
    est += 3 * tq * N * 4                          # energy + p + slack (f32)
    est += tq * (C8p + Cp) * 4                     # q / out temporaries (f32)
    return est


def _pick_tq(N, Cp, C8p, vmem_limit, vmem_cap):
    candidates = [1024, 512, 256, 128, 64, 32, 16, 8]
    if N >= 4096 and vmem_cap <= 64 * 1024 * 1024:
        # v7x-class chips (64 MiB VMEM): cap the query tile so the (TQ, N)
        # softmax working set stays well inside the budget.
        candidates = [c for c in candidates if c <= 256]
    for cand in candidates:
        if cand <= N and N % cand == 0 and _vmem_estimate(N, Cp, C8p, cand) <= vmem_limit:
            return cand
    return N   # tiny feature map: one query tile covers the whole image


def self_attention_pallas(x_nchw, wq, bq, wk, bk, wv, bv, gamma, *, tq=None):
    """x_nchw: (B, C, W, H) f32.  wq/wk: (C, C//8), bq/bk: (1, C//8),
    wv: (C, C), bv: (1, C), gamma: (1,)."""
    B, C, W, H = x_nchw.shape
    N = W * H
    C8 = wq.shape[1]

    Cp = _round_up(C, LANE)
    C8p = _round_up(C8, LANE)

    vmem_cap = _vmem_capacity_bytes()
    # ~48 MiB budget on v7x (64 MiB physical), ~96 MiB on v5e/v6e (128 MiB).
    vmem_limit = min(vmem_cap * 3 // 4, vmem_cap - 8 * 1024 * 1024)

    if tq is None:
        tq = _pick_tq(N, Cp, C8p, vmem_limit, vmem_cap)
    assert N % tq == 0, "tq must divide N = W*H"
    est = _vmem_estimate(N, Cp, C8p, tq)
    assert est <= vmem_limit, (
        f"VMEM budget exceeded: need ~{est >> 20} MiB > limit {vmem_limit >> 20} MiB; "
        "reduce tq or implement the flash-style key-axis tiling (see TODO).")
    nq = N // tq

    # NCHW -> (B, N, C), N flattened in (w, h) order (matches torch .view),
    # then zero-pad channels to the lane width.  Under a surrounding jit these
    # layout ops fuse with the producer; keep x channels-last across adjacent
    # ops where possible so they don't cost a dedicated HBM pass.
    x_flat = jnp.transpose(x_nchw, (0, 2, 3, 1)).reshape(B, N, C)
    x_p = jnp.pad(x_flat, ((0, 0), (0, 0), (0, Cp - C)))

    # Zero-padded weights: padded x channels hit zero weight rows and padded
    # output lanes come out zero -> results are unchanged.
    wq_p = jnp.pad(wq, ((0, Cp - C), (0, C8p - C8))).astype(jnp.bfloat16)
    wk_p = jnp.pad(wk, ((0, Cp - C), (0, C8p - C8))).astype(jnp.bfloat16)
    wv_p = jnp.pad(wv, ((0, Cp - C), (0, Cp - C))).astype(jnp.bfloat16)
    bq_p = jnp.pad(bq, ((0, 0), (0, C8p - C8)))
    bk_p = jnp.pad(bk, ((0, 0), (0, C8p - C8)))
    bv_p = jnp.pad(bv, ((0, 0), (0, Cp - C)))

    def kernel(x_ref, wq_ref, bq_ref, wk_ref, bk_ref, wv_ref, bv_ref,
               gamma_ref, o_ref, kT_scratch, v_scratch):
        q_idx = pl.program_id(1)

        # --- K^T and V for the whole image, once per batch, cached in VMEM.
        @pl.when(q_idx == 0)
        def _():
            x_all = x_ref[0].astype(jnp.bfloat16)                        # (N, Cp)
            k = jnp.dot(x_all, wk_ref[...],
                        preferred_element_type=jnp.float32) + bk_ref[...]   # (N, C8p)
            v = jnp.dot(x_all, wv_ref[...],
                        preferred_element_type=jnp.float32) + bv_ref[...]   # (N, Cp)
            # One XLU transpose per batch so every query tile's energy matmul
            # is a standard (TQ, C8p) @ (C8p, N) contraction (no per-tile
            # relayout of K in the hot loop).
            kT_scratch[...] = jnp.transpose(k, (1, 0)).astype(jnp.bfloat16)
            v_scratch[...] = v.astype(jnp.bfloat16)

        # --- Query tile sliced out of the resident full-image block
        #     (pure VMEM->vreg load; x only crosses HBM once per batch).
        q_start = pl.multiple_of(q_idx * tq, tq)
        x_tile = x_ref[0, pl.ds(q_start, tq), :]                          # (TQ, Cp) f32

        q = jnp.dot(x_tile.astype(jnp.bfloat16), wq_ref[...],
                    preferred_element_type=jnp.float32) + bq_ref[...]     # (TQ, C8p)

        energy = jnp.dot(q.astype(jnp.bfloat16), kT_scratch[...],
                         preferred_element_type=jnp.float32)              # (TQ, N)

        # --- exact softmax over all N keys; normalization deferred until
        #     after the PV matmul (scale the (TQ, Cp) result, not (TQ, N)).
        m = jnp.max(energy, axis=-1, keepdims=True)
        p = jnp.exp(energy - m)                                           # (TQ, N)
        denom = jnp.sum(p, axis=-1, keepdims=True)                        # (TQ, 1)
        # TODO(synk): on v6e/v7x a bf16 exp roughly doubles EUP throughput.
        out = jnp.dot(p.astype(jnp.bfloat16), v_scratch[...],
                      preferred_element_type=jnp.float32)                 # (TQ, Cp)
        out = out * pl.reciprocal(denom, approx=True)

        gamma = gamma_ref[0]
        o_ref[0] = (gamma * out + x_tile).astype(o_ref.dtype)

    def build(single_buffer_constants):
        const_kw = (dict(pipeline_mode=pl.Buffered(1))
                    if single_buffer_constants else {})
        in_specs = [
            pl.BlockSpec((1, N, Cp), lambda b, q: (b, 0, 0), **const_kw),   # x (full)
            pl.BlockSpec((Cp, C8p), lambda b, q: (0, 0), **const_kw),       # Wq
            pl.BlockSpec((1, C8p), lambda b, q: (0, 0), **const_kw),        # bq
            pl.BlockSpec((Cp, C8p), lambda b, q: (0, 0), **const_kw),       # Wk
            pl.BlockSpec((1, C8p), lambda b, q: (0, 0), **const_kw),        # bk
            pl.BlockSpec((Cp, Cp), lambda b, q: (0, 0), **const_kw),        # Wv
            pl.BlockSpec((1, Cp), lambda b, q: (0, 0), **const_kw),         # bv
            pl.BlockSpec(memory_space=pltpu.MemorySpace.SMEM),              # gamma
        ]
        return pl.pallas_call(
            kernel,
            out_shape=jax.ShapeDtypeStruct((B, N, Cp), x_flat.dtype),
            grid_spec=pltpu.PrefetchScalarGridSpec(
                num_scalar_prefetch=0,
                grid=(B, nq),
                in_specs=in_specs,
                out_specs=pl.BlockSpec((1, tq, Cp), lambda b, q: (b, q, 0)),
                scratch_shapes=[
                    pltpu.VMEM((C8p, N), jnp.bfloat16),   # K^T cache (per batch)
                    pltpu.VMEM((N, Cp), jnp.bfloat16),    # V cache (per batch)
                ],
            ),
            compiler_params=pltpu.CompilerParams(
                # Batch shards across TensorCores; the query axis must stay
                # sequential ("arbitrary") so the per-batch K^T/V scratch
                # written at q == 0 is visible to later tiles of the batch.
                dimension_semantics=("parallel", "arbitrary"),
                vmem_limit_bytes=vmem_limit,
            ),
        )

    args = (x_p, wq_p, bq_p, wk_p, bk_p, wv_p, bv_p, gamma)
    try:
        # Grid-constant blocks only need one DMA per batch; single-buffering
        # them halves their VMEM footprint (biggest win: the full-image x).
        out_p = jax.block_until_ready(build(True)(*args))
    except Exception:
        # pipeline_mode is a pure footprint optimization -- default double
        # buffering is semantically identical, so fall back if unsupported.
        out_p = build(False)(*args)

    # Drop channel padding, (B, N, C) -> NCHW.
    out_flat = out_p[..., :C]
    return jnp.transpose(out_flat.reshape(B, W, H, C), (0, 3, 1, 2))


def self_attention_ref(x_nchw, wq, bq, wk, bk, wv, bv, gamma):
    """Pure-JAX f32 reference mirroring the PyTorch forward exactly."""
    B, C, W, H = x_nchw.shape
    N = W * H
    x_flat = x_nchw.reshape(B, C, N)                               # (B, C, N)
    q = jnp.einsum('bcn,cd->bnd', x_flat, wq) + bq                 # (B, N, C8)
    k = jnp.einsum('bcn,cd->bdn', x_flat, wk) + bk.T[None, :, :]   # (B, C8, N)
    energy = jnp.einsum('bnd,bdm->bnm', q, k)                      # (B, N, N)
    attn = jax.nn.softmax(energy, axis=-1)
    v = jnp.einsum('bcn,ce->ben', x_flat, wv) + bv.T[None, :, :]   # (B, C, N)
    out = jnp.einsum('bcn,bmn->bcm', v, attn)                      # (B, C, N)
    out = out.reshape(B, C, W, H)
    return gamma[0] * out + x_nchw


if __name__ == "__main__":
    key = jax.random.PRNGKey(0)
    B, C, W, H = 2, 32, 16, 16          # C must be divisible by 8 (C//8 = 4)
    C8 = C // 8

    k_x, k_wq, k_bq, k_wk, k_bk, k_wv, k_bv = jax.random.split(key, 7)
    x = jax.random.normal(k_x, (B, C, W, H), dtype=jnp.float32)

    # Deterministic synthetic parameters (1x1 conv weights as channel matmuls).
    wq = jax.random.normal(k_wq, (C, C8), dtype=jnp.float32) * 0.1
    bq = jax.random.normal(k_bq, (1, C8), dtype=jnp.float32) * 0.1
    wk = jax.random.normal(k_wk, (C, C8), dtype=jnp.float32) * 0.1
    bk = jax.random.normal(k_bk, (1, C8), dtype=jnp.float32) * 0.1
    wv = jax.random.normal(k_wv, (C, C), dtype=jnp.float32) * 0.1
    bv = jax.random.normal(k_bv, (1, C), dtype=jnp.float32) * 0.1
    # PyTorch initializes gamma to zero; use a nonzero value so the attention
    # path actually contributes and gets numerically checked.
    gamma = jnp.array([0.5], dtype=jnp.float32)

    # tq=128 -> N//tq = 2 query tiles per batch, exercising the tiled path,
    # the in-kernel query slicing and the per-batch K^T/V scratch caching.
    out = self_attention_pallas(x, wq, bq, wk, bk, wv, bv, gamma, tq=128)
    out = jax.block_until_ready(out)

    ref = self_attention_ref(x, wq, bq, wk, bk, wv, bv, gamma)
    assert out.shape == (B, C, W, H)
    # bf16 matmul operands (f32 accumulation) + approx reciprocal -> loosened
    # tolerance vs the pure-f32 reference.
    assert jnp.allclose(out, ref, atol=2e-2, rtol=2e-2), (
        f"max abs diff = {jnp.max(jnp.abs(out - ref))}")

    print("KERNEL_OK")
</pallas_src>

<mosaic_0001>
module attributes {stable_mosaic.version = 11 : i64} {
  func.func @kernel(%arg0: i32, %arg1: i32, %arg2: memref<1x256x128xf32, #tpu.memory_space<vmem>>, %arg3: memref<128x128xbf16, #tpu.memory_space<vmem>>, %arg4: memref<1x128xf32, #tpu.memory_space<vmem>>, %arg5: memref<128x128xbf16, #tpu.memory_space<vmem>>, %arg6: memref<1x128xf32, #tpu.memory_space<vmem>>, %arg7: memref<128x128xbf16, #tpu.memory_space<vmem>>, %arg8: memref<1x128xf32, #tpu.memory_space<vmem>>, %arg9: memref<1xf32, #tpu.memory_space<smem>>, %arg10: memref<1x128x128xf32, #tpu.memory_space<vmem>>, %arg11: memref<128x256xbf16, #tpu.memory_space<vmem>>, %arg12: memref<256x128xbf16, #tpu.memory_space<vmem>>) attributes {dimension_semantics = [#tpu.dimension_semantics<parallel>, #tpu.dimension_semantics<arbitrary>], iteration_bounds = array<i64: 2, 2>, scalar_prefetch = 0 : i64, scratch_operands = 2 : i64, tpu.core_type = #tpu.core_type<tc>, window_params = [{pipeline_mode = #tpu.pipeline_mode<synchronous>, transform_indices = @transform_0, window_bounds = array<i64: 1, 256, 128>}, {pipeline_mode = #tpu.pipeline_mode<synchronous>, transform_indices = @transform_1, window_bounds = array<i64: 128, 128>}, {pipeline_mode = #tpu.pipeline_mode<synchronous>, transform_indices = @transform_2, window_bounds = array<i64: 1, 128>}, {pipeline_mode = #tpu.pipeline_mode<synchronous>, transform_indices = @transform_3, window_bounds = array<i64: 128, 128>}, {pipeline_mode = #tpu.pipeline_mode<synchronous>, transform_indices = @transform_4, window_bounds = array<i64: 1, 128>}, {pipeline_mode = #tpu.pipeline_mode<synchronous>, transform_indices = @transform_5, window_bounds = array<i64: 128, 128>}, {pipeline_mode = #tpu.pipeline_mode<synchronous>, transform_indices = @transform_6, window_bounds = array<i64: 1, 128>}, {transform_indices = @transform_7, window_bounds = array<i64: 1>}, {transform_indices = @transform_8, window_bounds = array<i64: 1, 128, 128>}]} {
    %c0_i32 = arith.constant 0 : i32
    %0 = arith.cmpi eq, %arg1, %c0_i32 : i32
    %1 = arith.extui %0 : i1 to i32
    %c0_i32_0 = arith.constant 0 : i32
    %2 = arith.cmpi ne, %1, %c0_i32_0 : i32
    scf.if %2 {
      %c0_18 = arith.constant 0 : index
      %c0_19 = arith.constant 0 : index
      %c0_20 = arith.constant 0 : index
      %37 = vector.load %arg2[%c0_18, %c0_19, %c0_20] : memref<1x256x128xf32, #tpu.memory_space<vmem>>, vector<1x256x128xf32>
      %38 = vector.shape_cast %37 : vector<1x256x128xf32> to vector<256x128xf32>
      %39 = arith.truncf %38 : vector<256x128xf32> to vector<256x128xbf16>
      %c0_21 = arith.constant 0 : index
      %c0_22 = arith.constant 0 : index
      %40 = vector.load %arg5[%c0_21, %c0_22] : memref<128x128xbf16, #tpu.memory_space<vmem>>, vector<128x128xbf16>
      %cst_23 = arith.constant dense<0.000000e+00> : vector<256x128xf32>
      %41 = tpu.matmul %39, %40, %cst_23 {dimension_numbers = #tpu.dot_dimension_numbers<[1], [0], [0], [1], [0, 0, 1, 1], [], []>} : vector<256x128xbf16>, vector<128x128xbf16>, vector<256x128xf32> -> vector<256x128xf32>
      %c0_24 = arith.constant 0 : index
      %c0_25 = arith.constant 0 : index
      %42 = vector.load %arg6[%c0_24, %c0_25] : memref<1x128xf32, #tpu.memory_space<vmem>>, vector<1x128xf32>
      %43 = vector.broadcast %42 : vector<1x128xf32> to vector<256x128xf32>
      %44 = arith.addf %41, %43 : vector<256x128xf32>
      %c0_26 = arith.constant 0 : index
      %c0_27 = arith.constant 0 : index
      %45 = vector.load %arg7[%c0_26, %c0_27] : memref<128x128xbf16, #tpu.memory_space<vmem>>, vector<128x128xbf16>
      %cst_28 = arith.constant dense<0.000000e+00> : vector<256x128xf32>
      %46 = tpu.matmul %39, %45, %cst_28 {dimension_numbers = #tpu.dot_dimension_numbers<[1], [0], [0], [1], [0, 0, 1, 1], [], []>} : vector<256x128xbf16>, vector<128x128xbf16>, vector<256x128xf32> -> vector<256x128xf32>
      %c0_29 = arith.constant 0 : index
      %c0_30 = arith.constant 0 : index
      %47 = vector.load %arg8[%c0_29, %c0_30] : memref<1x128xf32, #tpu.memory_space<vmem>>, vector<1x128xf32>
      %48 = vector.broadcast %47 : vector<1x128xf32> to vector<256x128xf32>
      %49 = arith.addf %46, %48 : vector<256x128xf32>
      %50 = tpu.transpose %44, [1, 0] : vector<256x128xf32> -> vector<128x256xf32>
      %51 = arith.truncf %50 : vector<128x256xf32> to vector<128x256xbf16>
      %c0_31 = arith.constant 0 : index
      %c0_32 = arith.constant 0 : index
      %52 = vector.load %arg11[%c0_31, %c0_32] : memref<128x256xbf16, #tpu.memory_space<vmem>>, vector<128x256xbf16>
      tpu.vector_store %arg11[%c0_31, %c0_32], %51 {strides = array<i32>} : memref<128x256xbf16, #tpu.memory_space<vmem>>, vector<128x256xbf16>,
      %53 = arith.truncf %49 : vector<256x128xf32> to vector<256x128xbf16>
      %c0_33 = arith.constant 0 : index
      %c0_34 = arith.constant 0 : index
      %54 = vector.load %arg12[%c0_33, %c0_34] : memref<256x128xbf16, #tpu.memory_space<vmem>>, vector<256x128xbf16>
      tpu.vector_store %arg12[%c0_33, %c0_34], %53 {strides = array<i32>} : memref<256x128xbf16, #tpu.memory_space<vmem>>, vector<256x128xbf16>,
    } else {
    }
    %c128_i32 = arith.constant 128 : i32
    %3 = arith.muli %arg1, %c128_i32 : i32
    %4 = tpu.assume_multiple %3, 128 : i32
    %c0 = arith.constant 0 : index
    %5 = arith.index_cast %4 : i32 to index
    %c0_1 = arith.constant 0 : index
    %6 = vector.load %arg2[%c0, %5, %c0_1] : memref<1x256x128xf32, #tpu.memory_space<vmem>>, vector<1x128x128xf32>
    %7 = vector.shape_cast %6 : vector<1x128x128xf32> to vector<128x128xf32>
    %8 = arith.truncf %7 : vector<128x128xf32> to vector<128x128xbf16>
    %c0_2 = arith.constant 0 : index
    %c0_3 = arith.constant 0 : index
    %9 = vector.load %arg3[%c0_2, %c0_3] : memref<128x128xbf16, #tpu.memory_space<vmem>>, vector<128x128xbf16>
    %cst = arith.constant dense<0.000000e+00> : vector<128x128xf32>
    %10 = tpu.matmul %8, %9, %cst {dimension_numbers = #tpu.dot_dimension_numbers<[1], [0], [0], [1], [0, 0, 1, 1], [], []>} : vector<128x128xbf16>, vector<128x128xbf16>, vector<128x128xf32> -> vector<128x128xf32>
    %c0_4 = arith.constant 0 : index
    %c0_5 = arith.constant 0 : index
    %11 = vector.load %arg4[%c0_4, %c0_5] : memref<1x128xf32, #tpu.memory_space<vmem>>, vector<1x128xf32>
    %12 = vector.broadcast %11 : vector<1x128xf32> to vector<128x128xf32>
    %13 = arith.addf %10, %12 : vector<128x128xf32>
    %14 = arith.truncf %13 : vector<128x128xf32> to vector<128x128xbf16>
    %c0_6 = arith.constant 0 : index
    %c0_7 = arith.constant 0 : index
    %15 = vector.load %arg11[%c0_6, %c0_7] : memref<128x256xbf16, #tpu.memory_space<vmem>>, vector<128x256xbf16>
    %cst_8 = arith.constant dense<0.000000e+00> : vector<128x256xf32>
    %16 = tpu.matmul %14, %15, %cst_8 {dimension_numbers = #tpu.dot_dimension_numbers<[1], [0], [0], [1], [0, 0, 1, 1], [], []>} : vector<128x128xbf16>, vector<128x256xbf16>, vector<128x256xf32> -> vector<128x256xf32>
    %cst_9 = arith.constant dense<0xFF800000> : vector<128xf32>
    %17 = vector.multi_reduction <maximumf>, %16, %cst_9 [1] : vector<128x256xf32> to vector<128xf32>
    %18 = vector.shape_cast %17 : vector<128xf32> to vector<128x1xf32>
    %19 = vector.broadcast %18 : vector<128x1xf32> to vector<128x256xf32>
    %20 = arith.subf %16, %19 : vector<128x256xf32>
    %21 = math.exp %20 : vector<128x256xf32>
    %cst_10 = arith.constant dense<0.000000e+00> : vector<128xf32>
    %22 = vector.multi_reduction <add>, %21, %cst_10 [1] : vector<128x256xf32> to vector<128xf32>
    %23 = vector.shape_cast %22 : vector<128xf32> to vector<128x1xf32>
    %24 = arith.truncf %21 : vector<128x256xf32> to vector<128x256xbf16>
    %c0_11 = arith.constant 0 : index
    %c0_12 = arith.constant 0 : index
    %25 = vector.load %arg12[%c0_11, %c0_12] : memref<256x128xbf16, #tpu.memory_space<vmem>>, vector<256x128xbf16>
    %cst_13 = arith.constant dense<0.000000e+00> : vector<128x128xf32>
    %26 = tpu.matmul %24, %25, %cst_13 {dimension_numbers = #tpu.dot_dimension_numbers<[1], [0], [0], [1], [0, 0, 1, 1], [], []>} : vector<128x256xbf16>, vector<256x128xbf16>, vector<128x128xf32> -> vector<128x128xf32>
    %27 = tpu.reciprocal %23 {approx = true} : vector<128x1xf32> -> vector<128x1xf32>
    %28 = vector.broadcast %27 : vector<128x1xf32> to vector<128x128xf32>
    %29 = arith.mulf %26, %28 : vector<128x128xf32>
    %c0_14 = arith.constant 0 : index
    %30 = memref.load %arg9[%c0_14] : memref<1xf32, #tpu.memory_space<smem>>
    %31 = vector.broadcast %30 : f32 to vector<128x128xf32>
    %32 = arith.mulf %31, %29 : vector<128x128xf32>
    %33 = arith.addf %32, %7 : vector<128x128xf32>
    %c0_15 = arith.constant 0 : index
    %c0_16 = arith.constant 0 : index
    %c0_17 = arith.constant 0 : index
    %34 = vector.load %arg10[%c0_15, %c0_16, %c0_17] : memref<1x128x128xf32, #tpu.memory_space<vmem>>, vector<1x128x128xf32>
    %35 = vector.shape_cast %34 : vector<1x128x128xf32> to vector<128x128xf32>
    %36 = vector.shape_cast %33 : vector<128x128xf32> to vector<1x128x128xf32>
    tpu.vector_store %arg10[%c0_15, %c0_16, %c0_17], %36 {strides = array<i32>} : memref<1x128x128xf32, #tpu.memory_space<vmem>>, vector<1x128x128xf32>,
    return
  }
  func.func @transform_0(%arg0: i32, %arg1: i32) -> (i32, i32, i32) {
    %c0_i32 = arith.constant 0 : i32
    %c0_i32_0 = arith.constant 0 : i32
    %c0_i32_1 = arith.constant 0 : i32
    return %arg0, %c0_i32, %c0_i32_0 : i32, i32, i32
  }
  func.func @transform_1(%arg0: i32, %arg1: i32) -> (i32, i32) {
    %c0_i32 = arith.constant 0 : i32
    %c0_i32_0 = arith.constant 0 : i32
    %c0_i32_1 = arith.constant 0 : i32
    return %c0_i32, %c0_i32_0 : i32, i32
  }
  func.func @transform_2(%arg0: i32, %arg1: i32) -> (i32, i32) {
    %c0_i32 = arith.constant 0 : i32
    %c0_i32_0 = arith.constant 0 : i32
    %c0_i32_1 = arith.constant 0 : i32
    return %c0_i32, %c0_i32_0 : i32, i32
  }
  func.func @transform_3(%arg0: i32, %arg1: i32) -> (i32, i32) {
    %c0_i32 = arith.constant 0 : i32
    %c0_i32_0 = arith.constant 0 : i32
    %c0_i32_1 = arith.constant 0 : i32
    return %c0_i32, %c0_i32_0 : i32, i32
  }
  func.func @transform_4(%arg0: i32, %arg1: i32) -> (i32, i32) {
    %c0_i32 = arith.constant 0 : i32
    %c0_i32_0 = arith.constant 0 : i32
    %c0_i32_1 = arith.constant 0 : i32
    return %c0_i32, %c0_i32_0 : i32, i32
  }
  func.func @transform_5(%arg0: i32, %arg1: i32) -> (i32, i32) {
    %c0_i32 = arith.constant 0 : i32
    %c0_i32_0 = arith.constant 0 : i32
    %c0_i32_1 = arith.constant 0 : i32
    return %c0_i32, %c0_i32_0 : i32, i32
  }
  func.func @transform_6(%arg0: i32, %arg1: i32) -> (i32, i32) {
    %c0_i32 = arith.constant 0 : i32
    %c0_i32_0 = arith.constant 0 : i32
    %c0_i32_1 = arith.constant 0 : i32
    return %c0_i32, %c0_i32_0 : i32, i32
  }
  func.func @transform_7(%arg0: i32, %arg1: i32) -> i32 {
    %c0_i32 = arith.constant 0 : i32
    %c0_i32_0 = arith.constant 0 : i32
    return %c0_i32 : i32
  }
  func.func @transform_8(%arg0: i32, %arg1: i32) -> (i32, i32, i32) {
    %c0_i32 = arith.constant 0 : i32
    %c0_i32_0 = arith.constant 0 : i32
    return %arg0, %arg1, %c0_i32 : i32, i32, i32
  }
}

module attributes {stable_mosaic.version = 11 : i64} {
  func.func @kernel(%arg0: i32, %arg1: i32, %arg2: memref<1x256x128xf32, #tpu.memory_space<vmem>>, %arg3: memref<128x128xbf16, #tpu.memory_space<vmem>>, %arg4: memref<1x128xf32, #tpu.memory_space<vmem>>, %arg5: memref<128x128xbf16, #tpu.memory_space<vmem>>, %arg6: memref<1x128xf32, #tpu.memory_space<vmem>>, %arg7: memref<128x128xbf16, #tpu.memory_space<vmem>>, %arg8: memref<1x128xf32, #tpu.memory_space<vmem>>, %arg9: memref<1xf32, #tpu.memory_space<smem>>, %arg10: memref<1x128x128xf32, #tpu.memory_space<vmem>>, %arg11: memref<128x256xbf16, #tpu.memory_space<vmem>>, %arg12: memref<256x128xbf16, #tpu.memory_space<vmem>>) attributes {dimension_semantics = [#tpu.dimension_semantics<parallel>, #tpu.dimension_semantics<arbitrary>], iteration_bounds = array<i64: 2, 2>, scalar_prefetch = 0 : i64, scratch_operands = 2 : i64, tpu.core_type = #tpu.core_type<tc>, window_params = [{transform_indices = @transform_0, window_bounds = array<i64: 1, 256, 128>}, {pipeline_mode = #tpu.pipeline_mode<synchronous>, transform_indices = @transform_1, window_bounds = array<i64: 128, 128>}, {pipeline_mode = #tpu.pipeline_mode<synchronous>, transform_indices = @transform_2, window_bounds = array<i64: 1, 128>}, {pipeline_mode = #tpu.pipeline_mode<synchronous>, transform_indices = @transform_3, window_bounds = array<i64: 128, 128>}, {pipeline_mode = #tpu.pipeline_mode<synchronous>, transform_indices = @transform_4, window_bounds = array<i64: 1, 128>}, {pipeline_mode = #tpu.pipeline_mode<synchronous>, transform_indices = @transform_5, window_bounds = array<i64: 128, 128>}, {pipeline_mode = #tpu.pipeline_mode<synchronous>, transform_indices = @transform_6, window_bounds = array<i64: 1, 128>}, {transform_indices = @transform_7, window_bounds = array<i64: 1>}, {transform_indices = @transform_8, window_bounds = array<i64: 1, 128, 128>}]} {
    %c0_i32 = arith.constant 0 : i32
    %0 = arith.cmpi eq, %arg1, %c0_i32 : i32
    %1 = arith.extui %0 : i1 to i32
    %c0_i32_0 = arith.constant 0 : i32
    %2 = arith.cmpi ne, %1, %c0_i32_0 : i32
    scf.if %2 {
      %c0_18 = arith.constant 0 : index
      %c0_19 = arith.constant 0 : index
      %c0_20 = arith.constant 0 : index
      %37 = vector.load %arg2[%c0_18, %c0_19, %c0_20] : memref<1x256x128xf32, #tpu.memory_space<vmem>>, vector<1x256x128xf32>
      %38 = vector.shape_cast %37 : vector<1x256x128xf32> to vector<256x128xf32>
      %39 = arith.truncf %38 : vector<256x128xf32> to vector<256x128xbf16>
      %c0_21 = arith.constant 0 : index
      %c0_22 = arith.constant 0 : index
      %40 = vector.load %arg5[%c0_21, %c0_22] : memref<128x128xbf16, #tpu.memory_space<vmem>>, vector<128x128xbf16>
      %cst_23 = arith.constant dense<0.000000e+00> : vector<256x128xf32>
      %41 = tpu.matmul %39, %40, %cst_23 {dimension_numbers = #tpu.dot_dimension_numbers<[1], [0], [0], [1], [0, 0, 1, 1], [], []>} : vector<256x128xbf16>, vector<128x128xbf16>, vector<256x128xf32> -> vector<256x128xf32>
      %c0_24 = arith.constant 0 : index
      %c0_25 = arith.constant 0 : index
      %42 = vector.load %arg6[%c0_24, %c0_25] : memref<1x128xf32, #tpu.memory_space<vmem>>, vector<1x128xf32>
      %43 = vector.broadcast %42 : vector<1x128xf32> to vector<256x128xf32>
      %44 = arith.addf %41, %43 : vector<256x128xf32>
      %c0_26 = arith.constant 0 : index
      %c0_27 = arith.constant 0 : index
      %45 = vector.load %arg7[%c0_26, %c0_27] : memref<128x128xbf16, #tpu.memory_space<vmem>>, vector<128x128xbf16>
      %cst_28 = arith.constant dense<0.000000e+00> : vector<256x128xf32>
      %46 = tpu.matmul %39, %45, %cst_28 {dimension_numbers = #tpu.dot_dimension_numbers<[1], [0], [0], [1], [0, 0, 1, 1], [], []>} : vector<256x128xbf16>, vector<128x128xbf16>, vector<256x128xf32> -> vector<256x128xf32>
      %c0_29 = arith.constant 0 : index
      %c0_30 = arith.constant 0 : index
      %47 = vector.load %arg8[%c0_29, %c0_30] : memref<1x128xf32, #tpu.memory_space<vmem>>, vector<1x128xf32>
      %48 = vector.broadcast %47 : vector<1x128xf32> to vector<256x128xf32>
      %49 = arith.addf %46, %48 : vector<256x128xf32>
      %50 = tpu.transpose %44, [1, 0] : vector<256x128xf32> -> vector<128x256xf32>
      %51 = arith.truncf %50 : vector<128x256xf32> to vector<128x256xbf16>
      %c0_31 = arith.constant 0 : index
      %c0_32 = arith.constant 0 : index
      %52 = vector.load %arg11[%c0_31, %c0_32] : memref<128x256xbf16, #tpu.memory_space<vmem>>, vector<128x256xbf16>
      tpu.vector_store %arg11[%c0_31, %c0_32], %51 {strides = array<i32>} : memref<128x256xbf16, #tpu.memory_space<vmem>>, vector<128x256xbf16>,
      %53 = arith.truncf %49 : vector<256x128xf32> to vector<256x128xbf16>
      %c0_33 = arith.constant 0 : index
      %c0_34 = arith.constant 0 : index
      %54 = vector.load %arg12[%c0_33, %c0_34] : memref<256x128xbf16, #tpu.memory_space<vmem>>, vector<256x128xbf16>
      tpu.vector_store %arg12[%c0_33, %c0_34], %53 {strides = array<i32>} : memref<256x128xbf16, #tpu.memory_space<vmem>>, vector<256x128xbf16>,
    } else {
    }
    %c128_i32 = arith.constant 128 : i32
    %3 = arith.muli %arg1, %c128_i32 : i32
    %4 = tpu.assume_multiple %3, 128 : i32
    %c0 = arith.constant 0 : index
    %5 = arith.index_cast %4 : i32 to index
    %c0_1 = arith.constant 0 : index
    %6 = vector.load %arg2[%c0, %5, %c0_1] : memref<1x256x128xf32, #tpu.memory_space<vmem>>, vector<1x128x128xf32>
    %7 = vector.shape_cast %6 : vector<1x128x128xf32> to vector<128x128xf32>
    %8 = arith.truncf %7 : vector<128x128xf32> to vector<128x128xbf16>
    %c0_2 = arith.constant 0 : index
    %c0_3 = arith.constant 0 : index
    %9 = vector.load %arg3[%c0_2, %c0_3] : memref<128x128xbf16, #tpu.memory_space<vmem>>, vector<128x128xbf16>
    %cst = arith.constant dense<0.000000e+00> : vector<128x128xf32>
    %10 = tpu.matmul %8, %9, %cst {dimension_numbers = #tpu.dot_dimension_numbers<[1], [0], [0], [1], [0, 0, 1, 1], [], []>} : vector<128x128xbf16>, vector<128x128xbf16>, vector<128x128xf32> -> vector<128x128xf32>
    %c0_4 = arith.constant 0 : index
    %c0_5 = arith.constant 0 : index
    %11 = vector.load %arg4[%c0_4, %c0_5] : memref<1x128xf32, #tpu.memory_space<vmem>>, vector<1x128xf32>
    %12 = vector.broadcast %11 : vector<1x128xf32> to vector<128x128xf32>
    %13 = arith.addf %10, %12 : vector<128x128xf32>
    %14 = arith.truncf %13 : vector<128x128xf32> to vector<128x128xbf16>
    %c0_6 = arith.constant 0 : index
    %c0_7 = arith.constant 0 : index
    %15 = vector.load %arg11[%c0_6, %c0_7] : memref<128x256xbf16, #tpu.memory_space<vmem>>, vector<128x256xbf16>
    %cst_8 = arith.constant dense<0.000000e+00> : vector<128x256xf32>
    %16 = tpu.matmul %14, %15, %cst_8 {dimension_numbers = #tpu.dot_dimension_numbers<[1], [0], [0], [1], [0, 0, 1, 1], [], []>} : vector<128x128xbf16>, vector<128x256xbf16>, vector<128x256xf32> -> vector<128x256xf32>
    %cst_9 = arith.constant dense<0xFF800000> : vector<128xf32>
    %17 = vector.multi_reduction <maximumf>, %16, %cst_9 [1] : vector<128x256xf32> to vector<128xf32>
    %18 = vector.shape_cast %17 : vector<128xf32> to vector<128x1xf32>
    %19 = vector.broadcast %18 : vector<128x1xf32> to vector<128x256xf32>
    %20 = arith.subf %16, %19 : vector<128x256xf32>
    %21 = math.exp %20 : vector<128x256xf32>
    %cst_10 = arith.constant dense<0.000000e+00> : vector<128xf32>
    %22 = vector.multi_reduction <add>, %21, %cst_10 [1] : vector<128x256xf32> to vector<128xf32>
    %23 = vector.shape_cast %22 : vector<128xf32> to vector<128x1xf32>
    %24 = arith.truncf %21 : vector<128x256xf32> to vector<128x256xbf16>
    %c0_11 = arith.constant 0 : index
    %c0_12 = arith.constant 0 : index
    %25 = vector.load %arg12[%c0_11, %c0_12] : memref<256x128xbf16, #tpu.memory_space<vmem>>, vector<256x128xbf16>
    %cst_13 = arith.constant dense<0.000000e+00> : vector<128x128xf32>
    %26 = tpu.matmul %24, %25, %cst_13 {dimension_numbers = #tpu.dot_dimension_numbers<[1], [0], [0], [1], [0, 0, 1, 1], [], []>} : vector<128x256xbf16>, vector<256x128xbf16>, vector<128x128xf32> -> vector<128x128xf32>
    %27 = tpu.reciprocal %23 {approx = true} : vector<128x1xf32> -> vector<128x1xf32>
    %28 = vector.broadcast %27 : vector<128x1xf32> to vector<128x128xf32>
    %29 = arith.mulf %26, %28 : vector<128x128xf32>
    %c0_14 = arith.constant 0 : index
    %30 = memref.load %arg9[%c0_14] : memref<1xf32, #tpu.memory_space<smem>>
    %31 = vector.broadcast %30 : f32 to vector<128x128xf32>
    %32 = arith.mulf %31, %29 : vector<128x128xf32>
    %33 = arith.addf %32, %7 : vector<128x128xf32>
    %c0_15 = arith.constant 0 : index
    %c0_16 = arith.constant 0 : index
    %c0_17 = arith.constant 0 : index
    %34 = vector.load %arg10[%c0_15, %c0_16, %c0_17] : memref<1x128x128xf32, #tpu.memory_space<vmem>>, vector<1x128x128xf32>
    %35 = vector.shape_cast %34 : vector<1x128x128xf32> to vector<128x128xf32>
    %36 = vector.shape_cast %33 : vector<128x128xf32> to vector<1x128x128xf32>
    tpu.vector_store %arg10[%c0_15, %c0_16, %c0_17], %36 {strides = array<i32>} : memref<1x128x128xf32, #tpu.memory_space<vmem>>, vector<1x128x128xf32>,
    return
  }
  func.func @transform_0(%arg0: i32, %arg1: i32) -> (i32, i32, i32) {
    %c0_i32 = arith.constant 0 : i32
    %c0_i32_0 = arith.constant 0 : i32
    %c0_i32_1 = arith.constant 0 : i32
    return %arg0, %c0_i32, %c0_i32_0 : i32, i32, i32
  }
  func.func @transform_1(%arg0: i32, %arg1: i32) -> (i32, i32) {
    %c0_i32 = arith.constant 0 : i32
    %c0_i32_0 = arith.constant 0 : i32
    %c0_i32_1 = arith.constant 0 : i32
    return %c0_i32, %c0_i32_0 : i32, i32
  }
  func.func @transform_2(%arg0: i32, %arg1: i32) -> (i32, i32) {
    %c0_i32 = arith.constant 0 : i32
    %c0_i32_0 = arith.constant 0 : i32
    %c0_i32_1 = arith.constant 0 : i32
    return %c0_i32, %c0_i32_0 : i32, i32
  }
  func.func @transform_3(%arg0: i32, %arg1: i32) -> (i32, i32) {
    %c0_i32 = arith.constant 0 : i32
    %c0_i32_0 = arith.constant 0 : i32
    %c0_i32_1 = arith.constant 0 : i32
    return %c0_i32, %c0_i32_0 : i32, i32
  }
  func.func @transform_4(%arg0: i32, %arg1: i32) -> (i32, i32) {
    %c0_i32 = arith.constant 0 : i32
    %c0_i32_0 = arith.constant 0 : i32
    %c0_i32_1 = arith.constant 0 : i32
    return %c0_i32, %c0_i32_0 : i32, i32
  }
  func.func @transform_5(%arg0: i32, %arg1: i32) -> (i32, i32) {
    %c0_i32 = arith.constant 0 : i32
    %c0_i32_0 = arith.constant 0 : i32
    %c0_i32_1 = arith.constant 0 : i32
    return %c0_i32, %c0_i32_0 : i32, i32
  }
  func.func @transform_6(%arg0: i32, %arg1: i32) -> (i32, i32) {
    %c0_i32 = arith.constant 0 : i32
    %c0_i32_0 = arith.constant 0 : i32
    %c0_i32_1 = arith.constant 0 : i32
    return %c0_i32, %c0_i32_0 : i32, i32
  }
  func.func @transform_7(%arg0: i32, %arg1: i32) -> i32 {
    %c0_i32 = arith.constant 0 : i32
    %c0_i32_0 = arith.constant 0 : i32
    return %c0_i32 : i32
  }
  func.func @transform_8(%arg0: i32, %arg1: i32) -> (i32, i32, i32) {
    %c0_i32 = arith.constant 0 : i32
    %c0_i32_0 = arith.constant 0 : i32
    return %arg0, %arg1, %c0_i32 : i32, i32, i32
  }
}

</mosaic_0001>

<bundles_post_ra>
// kernel: tpu_custom_call.1
= control target key start
LH: loop header
LB: loop body
LE: loop exit
PB: predicated region body
PF: predicated region fallthrough
CT: control target
= control target key end

     0   :  { %s3563_s0 = inlined_call_operand.hbm [shape: f32[2,256,128], index: 0, kind: input, shape index: {}]   ;;  %s3564_s1 = inlined_call_operand.hbm [shape: bf16[128,128], index: 1, kind: input, shape index: {}]   ;;  %s3565_s2 = inlined_call_operand.vmem [shape: f32[1,128], index: 2, kind: input, shape index: {}]   ;;  %s3566_s3 = inlined_call_operand.hbm [shape: bf16[128,128], index: 3, kind: input, shape index: {}]   ;;  %s3567_s4 = inlined_call_operand.vmem [shape: f32[1,128], index: 4, kind: input, shape index: {}]   ;;  %s3568_s5 = inlined_call_operand.hbm [shape: bf16[128,128], index: 5, kind: input, shape index: {}]   ;;  %s3569_s6 = inlined_call_operand.vmem [shape: f32[1,128], index: 6, kind: input, shape index: {}]   ;;  %s3570_s7 = inlined_call_operand.<no memory space> [shape: f32[1], index: 7, kind: input, shape index: {}]   ;;  %s3571_s8 = inlined_call_operand.hbm [shape: f32[2,256,128], index: 8, kind: output, shape index: {}]  }
   0x1   :  { %3598 = sst [smem:[#allocation30_spill]] %s3563_s0 }
   0x2   :  { %3599 = sst [smem:[#allocation31_spill]] %s3564_s1 }
   0x3   :  { %13 = sst [smem:[#allocation4]] %s3570_s7 }
   0x4   :  { %14 = vsyncpa [#allocation6], 0 }
   0x5   :  { %15 = vsyncpa [#allocation9], 0 }
   0x6   :  { %16 = vsyncpa [#allocation12], 0 }
   0x7   :  { %17 = vsyncpa [#allocation7], 0 }
   0x8   :  { %19 = vsyncpa [#allocation7 + $0x1], 0  ;;  %s2875_s29 = smov 0   ;;  %s2877_s30 = smov 0  }
   0x9   :  { %s2879_s9 = smov 0   ;;  %s2881_s10 = smov 0  }
   0xa   :  { %s2883_s11 = smov 0   ;;  %s2885_s12 = smov 0  }
   0xb   :  { %s2887_s13 = smov 0   ;;  %s2889_s7 = smov 0  }
   0xc   :  { %s2891_s14 = smov 0   ;;  %s2893_s15 = smov 0  }
   0xd   :  { %s2895_s16 = smov 0  }
   0xe LB: > { %3600 = sst [smem:[#allocation18_spill]] %s2773_s29  ;;  %s1871_s17 = sadd.s32 4294967295, %s2813_s16   ;;  %s2813_s16 = sphi %s2895_s16, %s25_s16   ;;  %s2809_s15 = sphi %s2893_s15, %s3643_s15   ;;  %s2805_s14 = sphi %s2891_s14, %s3642_s14   ;;  %s2801_s7 = sphi %s2889_s7, %s3641_s7   ;;  %s2797_s13 = sphi %s2887_s13, %s3646_s13   ;;  %s2793_s12 = sphi %s2885_s12, %s3639_s12   ;;  %s2789_s11 = sphi %s2883_s11, %s3638_s11   ;;  %s2785_s10 = sphi %s2881_s10, %s3637_s10   ;;  %s2781_s9 = sphi %s2879_s9, %s3636_s9   ;;  %s2777_s30 = sphi %s2877_s30, %s3645_s30   ;;  %s2773_s29 = sphi %s2875_s29, %s3644_s29  }
   0xf   : > { %3601 = sst [smem:[#allocation19_spill]] %s2781_s9  ;;  %s1872_s18 = sadd.s32 4294967294, %s2813_s16  }
  0x10   : > { %3602 = sst [smem:[#allocation20_spill]] %s2789_s11  ;;  %s34_s19 = sadd.s32 1, %s2805_s14 }
  0x11   : > { %3603 = sst [smem:[#allocation21_spill]] %s2793_s12  ;;  %s37_s20 = sadd.s32 1, %s2809_s15 }
  0x12   : > { %3604 = sst [smem:[#allocation22_spill]] %s2805_s14  ;;  %p35_p0 = scmp.ge.s32.totalorder %s34_s19, 2 }
  0x13   : > { %3605 = sst [smem:[#allocation23_spill]] %s2809_s15  ;;  %s44_s21 = sadd.s32 1, %s2793_s12 }
  0x14   : > { %3606 = sst [smem:[#allocation24_spill]] %s2813_s16  ;;  %p57_p1 = scmp.ne.s32.totalorder %s2789_s11, %s2785_s10 }
  0x15   : > { %p2934_p2 = scmp.eq.s32.totalorder %s1871_s17, 0  ;;  %s3648_s19 = smov (%p35_p0, %s34_s19), 0 }
  0x16   : > { %3608 = sst [smem:[#allocation25_spill]] %s3648_s19  ;;  %s3650_s20 = smov (!%p35_p0, %s37_s20), %s2809_s15 }
  0x17   : > { %s3607_s22 = scalar_select %p2934_p2, 1, 0 }
  0x18   : > { %p2943_p3 = por %p2934_p2, %p57_p1  ;;  %s215_s24 = ssub.s32 %s2805_s14, %s3648_s19 }
  0x19   : > { %p39_p4 = scmp.ge.s32.totalorder %s3650_s20, 2  ;;  %s219_s25 = sadd.s32 1, %s2781_s9 }
  0x1a   : > { %s3609_s23 = scalar_select %p2943_p3, 1, 0 }
  0x1b   : > { %p229_p5 = scmp.ne.s32.totalorder %s2781_s9, %s2777_s30  ;;  %p230_p6 = scmp.eq.s32.totalorder %s1871_s17, 3 }
  0x1c   : > { %s3652_s20 = smov (%p39_p4, %s3650_s20), 0  ;;  %p235_p8 = scmp.ne.s32.totalorder %s2777_s30, %s2773_s29 }
  0x1d   : > { %3610 = sst [smem:[#allocation26_spill]] %s3652_s20  ;;  %p2954_p7 = por %p230_p6, %p229_p5 }
  0x1e   : > { %s41_s27 = ssub.s32 %s2809_s15, %s3652_s20  ;;  %p236_p9 = scmp.eq.s32.totalorder %s1872_s18, 3 }
  0x1f   : > { %s3611_s26 = scalar_select %p2954_p7, 1, 0 }
  0x20   : > { %p42_p10 = scmp.eq.s32.totalorder %s41_s27, 0  ;;  %s216_s28 = sor.u32 %s215_s24, %s41_s27 }
  0x21   : > { %p217_p11 = scmp.eq.s32.totalorder %s216_s28, 0  ;;  %p2962_p12 = por %p236_p9, %p235_p8 }
  0x22   : > { %s2967_s17 = scalar_select %p42_p10, %s2793_s12, %s44_s21  }
  0x23   : > { %s3612_s10 = scalar_select %p2962_p12, 1, 0 }
  0x24   : > { %3614 = sst [smem:[#allocation28_spill]] %s2967_s17  ;;  %p1873_p13 = scmp.ge.s32.totalorder %s2813_s16, 1 }
  0x25   : > { %3613 = sst [smem:[#allocation27_spill]] %s3612_s10  ;;  %p243_p0 = scmp.lt.s32.totalorder %s2813_s16, 5 }
  0x26   : > { %s2970_s19 = scalar_select %p217_p11, %s2781_s9, %s219_s25  }
  0x27   : > { %p2974_p1 = pnand %p1873_p13, %p243_p0  ;;  %s2815_s20 = smov [#allocation8]  }
  0x28   : > { %3615 = sst [smem:[#allocation29_spill]] %s2970_s19  ;;  %s271_s18 = sshll.u32 %s2815_s20, 4  ;;  %s272_s18 = int_to_ptr.vmem [resolvable:$true] %s271_s18 }
  0x29   : > { %s3616_s14 = scalar_select %p2974_p1, 1, 0 }
  0x2a   : > { %p2208_p4 = pneg %p2974_p1  ;;  %s3619_s1 = sld [smem:[#allocation31_spill]] }
  0x2c   : > { %p2982_p5 = pnand %p2208_p4, %p2943_p3  ;;  %p2988_p6 = pnand %p2208_p4, %p2934_p2 }
  0x2e   : > { %s3617_s24 = scalar_select %p2982_p5, 1, 0 }
  0x2f   : > { %s3618_s21 = scalar_select %p2988_p6, 1, 0 }
  0x30   : > { %s2569_s28 = scalar_lea.hbm %s3619_s1, 1024  ;;  %p3000_p9 = pneg %p2988_p6 }
  0x31   : > { %p2570_p8 = scmp.ne.s32.totalorder %s3619_s1, %s2569_s28  ;;  %p2576_p13 = scmp.lt.u32.totalorder %s2569_s28, %s3619_s1 }
  0x32   : > { %s3620_s17 = scalar_select %p3000_p9, 1, 0 }
  0x33   : > { %p2572_p10 = pnand %p3000_p9, %p2570_p8 }
  0x35   : > { %p2573_p11 = pneg %p2572_p10 }
  0x37   : > { %p2578_p0 = pnand %p2576_p13, %p2573_p11 }
  0x39   : > { %2581 = shalt.err (!%p2578_p0)
}
  0x3a   : > { %s2582_s25 = scalar_lea.vmem %s272_s18, 1024  ;;  %p2590_p2 = scmp.lt.s32.totalorder %s272_s18, %s272_s18 }
  0x3b   : > { %p2583_p4 = scmp.ne.s32.totalorder %s272_s18, %s2582_s25  ;;  %p2591_p3 = scmp.lt.s32.totalorder %s2582_s25, %s2582_s25 }
  0x3d   : > { %p2585_p12 = pnand %p2583_p4, %p3000_p9  ;;  %p2592_p1 = por %p2591_p3, %p2590_p2 }
  0x3f   : > { %p2586_p7 = pneg %p2585_p12 }
  0x41   : > { %p2593_p5 = pnand %p2592_p1, %p2586_p7 }
  0x43   : > { %2596 = shalt.err (!%p2593_p5)
}
  0x44   : > { %s3592_s15 = smov 64   ;;  %s3594_s11 = smov 4  }
  0x45   : > { %2214 = dma.hbm_to_vmem [thread:$0]  (!%p2988_p6), %s3619_s1, 1024, %s272_s18, [#allocation9], %s3592_s15, %s3592_s15, %s3594_s11  }
  0x46   : > { %s1919_s28 = sshll.u32 %s2801_s7, 12  ;;  %s3621_s0 = sld [smem:[#allocation30_spill]] }
  0x47   : > { %s2818_s9 = smov [#allocation5]   ;;  %p3622_p3 = scmp.ne.s32.totalorder %s3617_s24, 0 }
  0x48   : > { %s258_s10 = sshll.u32 %s2818_s9, 4  ;;  %s259_s10 = int_to_ptr.vmem [resolvable:$true] %s258_s10 }
  0x49   : > { %p2599_p7 = pneg %p3622_p3 }
  0x4c   : > { %s3023_s19 = scalar_lea.hbm %s3621_s0, %s1919_s28  ;;  %s2602_s27 = scalar_lea.hbm %s3621_s0, 8192 }
  0x4d   : > { %s2597_s29 = scalar_lea.hbm %s3023_s19, 4096  ;;  %p2603_p5 = scmp.lt.u32.totalorder %s3023_s19, %s3621_s0 }
  0x4e   : > { %p2598_p2 = scmp.ne.s32.totalorder %s3023_s19, %s2597_s29  ;;  %p2604_p8 = scmp.lt.u32.totalorder %s2602_s27, %s2597_s29 }
  0x4f   : > { %p2606_p11 = scmp.lt.u32.totalorder %s2597_s29, %s3023_s19 }
  0x50   : > { %p2600_p12 = pnand %p2599_p7, %p2598_p2  ;;  %p2605_p10 = por %p2604_p8, %p2603_p5 }
  0x52   : > { %p2601_p1 = pneg %p2600_p12  ;;  %p2607_p13 = por %p2606_p11, %p2605_p10 }
  0x54   : > { %p2608_p0 = pnand %p2607_p13, %p2601_p1 }
  0x56   : > { %2611 = shalt.err (!%p2608_p0)
}
  0x57   : > { %s2612_s9 = scalar_lea.vmem %s259_s10, 4096  ;;  %p2620_p6 = scmp.lt.s32.totalorder %s259_s10, %s259_s10 }
  0x58   : > { %p2613_p4 = scmp.ne.s32.totalorder %s259_s10, %s2612_s9  ;;  %p2621_p9 = scmp.lt.s32.totalorder %s2612_s9, %s2612_s9 }
  0x5a   : > { %p2615_p2 = pnand %p2613_p4, %p2599_p7  ;;  %p2622_p5 = por %p2621_p9, %p2620_p6 }
  0x5c   : > { %p2616_p12 = pneg %p2615_p2 }
  0x5e   : > { %p2623_p8 = pnand %p2622_p5, %p2616_p12 }
  0x60   : > { %2626 = shalt.err (!%p2623_p8)
}
  0x61   : > { %s2819_s25 = smov 128   ;;  %s2820_s29 = smov 8  }
  0x62   : > { %2211 = dma.hbm_to_vmem [thread:$0]  (!%p3622_p3), %s3023_s19, 4096, %s259_s10, [#allocation6], %s2819_s25, %s2819_s25, %s2820_s29  }
  0x63   : > { %s2821_s18 = smov [#allocation10]   ;;  %s2822_s27 = smov [#allocation11]  }
  0x64   : > { %s287_s12 = sshll.u32 %s2821_s18, 4  ;;  %s303_s28 = sshll.u32 %s2822_s27, 4  ;;  %s288_s12 = int_to_ptr.vmem [resolvable:$true] %s287_s12  ;;  %s304_s28 = int_to_ptr.vmem [resolvable:$true] %s303_s28 }
  0x65   : > { %s2627_s11 = scalar_lea.hbm %s3566_s3, 1024  ;;  %p3623_p9 = scmp.ne.s32.totalorder %s3620_s17, 0 }
  0x66   : > { %p2628_p6 = scmp.ne.s32.totalorder %s3566_s3, %s2627_s11  ;;  %p2634_p3 = scmp.lt.u32.totalorder %s2627_s11, %s3566_s3 }
  0x68   : > { %p2630_p7 = pnand %p2628_p6, %p3623_p9 }
  0x6a   : > { %p2631_p1 = pneg %p2630_p7 }
  0x6c   : > { %p2636_p10 = pnand %p2634_p3, %p2631_p1 }
  0x6e   : > { %2639 = shalt.err (!%p2636_p10)
}
  0x6f   : > { %s2640_s19 = scalar_lea.vmem %s288_s12, 1024  ;;  %p2648_p4 = scmp.lt.s32.totalorder %s288_s12, %s288_s12 }
  0x70   : > { %p2641_p11 = scmp.ne.s32.totalorder %s288_s12, %s2640_s19  ;;  %p2649_p2 = scmp.lt.s32.totalorder %s2640_s19, %s2640_s19 }
  0x72   : > { %p2643_p13 = pnand %p2641_p11, %p3623_p9  ;;  %p2650_p12 = por %p2649_p2, %p2648_p4 }
  0x74   : > { %p2644_p0 = pneg %p2643_p13 }
  0x76   : > { %p2651_p5 = pnand %p2650_p12, %p2644_p0 }
  0x78   : > { %2654 = shalt.err (!%p2651_p5)
}
  0x79   : > { %p3624_p8 = scmp.ne.s32.totalorder %s3618_s21, 0  ;;  %s3625_s0 = smov 4  }
  0x7a   : > { %s3626_s10 = smov 64   ;;  %s2655_s11 = scalar_lea.hbm %s3568_s5, 1024 }
  0x7b   : > { %2217 = dma.hbm_to_vmem [thread:$0]  (!%p3624_p8), %s3566_s3, 1024, %s288_s12, [#allocation9], %s3626_s10, %s3626_s10, %s3625_s0  }
  0x7c   : > { %p2656_p6 = scmp.ne.s32.totalorder %s3568_s5, %s2655_s11  ;;  %p2662_p3 = scmp.lt.u32.totalorder %s2655_s11, %s3568_s5 }
  0x7e   : > { %p2658_p7 = pnand %p2656_p6, %p3623_p9 }
  0x80   : > { %p2659_p1 = pneg %p2658_p7 }
  0x82   : > { %p2664_p10 = pnand %p2662_p3, %p2659_p1 }
  0x84   : > { %2667 = shalt.err (!%p2664_p10)
}
  0x85   : > { %s2668_s20 = scalar_lea.vmem %s304_s28, 1024  ;;  %p2676_p4 = scmp.lt.s32.totalorder %s304_s28, %s304_s28 }
  0x86   : > { %p2669_p11 = scmp.ne.s32.totalorder %s304_s28, %s2668_s20  ;;  %p2677_p2 = scmp.lt.s32.totalorder %s2668_s20, %s2668_s20 }
  0x88   : > { %p2671_p13 = pnand %p2669_p11, %p3623_p9  ;;  %p2678_p12 = por %p2677_p2, %p2676_p4 }
  0x8a   : > { %p2672_p0 = pneg %p2671_p13 }
  0x8c   : > { %p2679_p5 = pnand %p2678_p12, %p2672_p0 }
  0x8e   : > { %2682 = shalt.err (!%p2679_p5)
}
  0x8f   : > { %2220 = dma.hbm_to_vmem [thread:$0]  (!%p3624_p8), %s3568_s5, 1024, %s304_s28, [#allocation12], %s3626_s10, %s3626_s10, %s3625_s0  }
  0x90   : > { %p3627_p6 = scmp.ne.s32.totalorder %s3616_s14, 0 }
  0x91   : > { %p3628_p9 = scmp.ne.s32.totalorder (!%p3627_p6), %s3609_s23, 0 }
  0x92   : > { %325 = sbr.rel (%p3627_p6) target bundleno = 1560 (0x618), region = 52 }
  0x99   : > { %2756 = dma.done.wait (%p3628_p9), [#allocation6], 4096  }
  0x9a   : > { %2758 = vsyncadd (%p3628_p9), [#allocation6], 4294963200  ;;  %p3629_p7 = scmp.ne.s32.totalorder %s3607_s22, 0 }
  0x9c   : > { %2760 = dma.done.wait (%p3629_p7), [#allocation9], 2048  }
  0x9d   : > { %2762 = vsyncadd (%p3629_p7), [#allocation9], 4294965248 }
  0x9e   : > { %2764 = dma.done.wait (%p3629_p7), [#allocation12], 1024  }
  0x9f   : > { %2766 = vsyncadd (%p3629_p7), [#allocation12], 4294966272  ;;  %s363_s14 = sand.u32 1, %s2777_s30   ;;  %p1884_p8 = scmp.ne.s32.totalorder %s2797_s13, 0 }
  0xa0   : > { %s1883_s17 = sshll.u32 %s363_s14, 7  ;;  %v2443_v0 = vld [vmem:[#allocation10] sm:$0xff] (!%p1884_p8)   ;;  %v2444_v1 = vld [vmem:[#allocation10 + $0x8] sm:$0xff] (!%p1884_p8)   ;;  %v2445_v2 = vld [vmem:[#allocation10 + $0x10] sm:$0xff] (!%p1884_p8)  }
  0xa1   : > { %s3105_s21 = scalar_lea.vmem [#allocation13], %s1883_s17  ;;  %371 = sbr.rel (%p1884_p8) target bundleno = 636 (0x27c), region = 72  ;;  %2048 = vmatprep.subr.bf16.mxu0 (!%p1884_p8), %v2443_v0  ;;  %v2446_v3 = vld [vmem:[#allocation10 + $0x18] sm:$0xff] (!%p1884_p8)   ;;  %v372_v4 = vld [vmem:[#allocation5] sm:$0xff] (!%p1884_p8)  ;;  %v373_v5 = vld [vmem:[#allocation5 + $0x8] sm:$0xff] (!%p1884_p8) }
  0xa2   : > { %2049 = vmatpush3.bf16.msra.mxu0 (!%p1884_p8), %v2443_v0  ;;  %v404_v6 = vpack.c.bf16 (!%p1884_p8), %v373_v5, %v372_v4  ;;  %v2447_v7 = vld [vmem:[#allocation10 + $0x20] sm:$0xff] (!%p1884_p8)   ;;  %v2448_v8 = vld [vmem:[#allocation10 + $0x28] sm:$0xff] (!%p1884_p8)   ;;  %v2449_v9 = vld [vmem:[#allocation10 + $0x30] sm:$0xff] (!%p1884_p8)  }
  0xa3   : > { %2050 = vmatprep.subr.bf16.mxu0 (!%p1884_p8), %v2444_v1  ;;  %v2451_v10 = vld [vmem:[#allocation11] sm:$0xff] (!%p1884_p8)   ;;  %v2452_v11 = vld [vmem:[#allocation11 + $0x8] sm:$0xff] (!%p1884_p8)   ;;  %v2453_v12 = vld [vmem:[#allocation11 + $0x10] sm:$0xff] (!%p1884_p8)  }
  0xa4   : > { %2064 = vmatprep.mubr.bf16.mxu0 (!%p1884_p8), %v404_v6  ;;  %2112 = vmatprep.mubr.bf16.mxu1 (!%p1884_p8), %v404_v6  ;;  %v2450_v13 = vld [vmem:[#allocation10 + $0x38] sm:$0xff] (!%p1884_p8)   ;;  %v374_v14 = vld [vmem:[#allocation5 + $0x10] sm:$0xff] (!%p1884_p8)  ;;  %v376_v17 = vld [vmem:[#allocation5 + $0x20] sm:$0xff] (!%p1884_p8) }
  0xa5   : > { %2096 = vmatprep.subr.bf16.mxu1 (!%p1884_p8), %v2451_v10  ;;  %v375_v15 = vld [vmem:[#allocation5 + $0x18] sm:$0xff] (!%p1884_p8)  ;;  %v377_v18 = vld [vmem:[#allocation5 + $0x28] sm:$0xff] (!%p1884_p8)  ;;  %v2455_v21 = vld [vmem:[#allocation11 + $0x20] sm:$0xff] (!%p1884_p8)  }
  0xa6   : > { %2051 = vmatpush3.bf16.msra.mxu0 (!%p1884_p8), %v2444_v1  ;;  %2097 = vmatpush3.bf16.msra.mxu1 (!%p1884_p8), %v2451_v10  ;;  %v2454_v16 = vld [vmem:[#allocation11 + $0x18] sm:$0xff] (!%p1884_p8)   ;;  %v405_v19 = vpack.c.bf16 (!%p1884_p8), %v375_v15, %v374_v14  ;;  %v406_v20 = vpack.c.bf16 (!%p1884_p8), %v377_v18, %v376_v17  ;;  %v378_v22 = vld [vmem:[#allocation5 + $0x30] sm:$0xff] (!%p1884_p8)  ;;  %v2456_v24 = vld [vmem:[#allocation11 + $0x28] sm:$0xff] (!%p1884_p8)  }
  0xa7   : > { %2052 = vmatprep.subr.bf16.mxu0 (!%p1884_p8), %v2445_v2  ;;  %2098 = vmatprep.subr.bf16.mxu1 (!%p1884_p8), %v2452_v11  ;;  %v379_v23 = vld [vmem:[#allocation5 + $0x38] sm:$0xff] (!%p1884_p8)  ;;  %v380_v25 = vld [vmem:[#allocation5 + $0x40] sm:$0xff] (!%p1884_p8)  ;;  %v381_v26 = vld [vmem:[#allocation5 + $0x48] sm:$0xff] (!%p1884_p8) }
  0xa8   : > { %v407_v27 = vpack.c.bf16 %v379_v23, %v378_v22  ;;  %v408_v28 = vpack.c.bf16 %v381_v26, %v380_v25  ;;  %v2457_v29 = vld [vmem:[#allocation11 + $0x30] sm:$0xff]   ;;  %v383_v31 = vld [vmem:[#allocation5 + $0x58] sm:$0xff]  ;;  %v384_v33 = vld [vmem:[#allocation5 + $0x60] sm:$0xff] }
  0xa9   : > { %v382_v30 = vld [vmem:[#allocation5 + $0x50] sm:$0xff]  ;;  %v2458_v32 = vld [vmem:[#allocation11 + $0x38] sm:$0xff]   ;;  %v385_v34 = vld [vmem:[#allocation5 + $0x68] sm:$0xff] }
  0xaa   : > { %2053 = vmatpush3.bf16.msra.mxu0 %v2445_v2  ;;  %2099 = vmatpush3.bf16.msra.mxu1 %v2452_v11  ;;  %v409_v35 = vpack.c.bf16 %v383_v31, %v382_v30  ;;  %v410_v36 = vpack.c.bf16 %v385_v34, %v384_v33  ;;  %v386_v37 = vld [vmem:[#allocation5 + $0x70] sm:$0xff]  ;;  %v387_v38 = vld [vmem:[#allocation5 + $0x78] sm:$0xff]  ;;  %v388_v39 = vld [vmem:[#allocation5 + $0x80] sm:$0xff] }
  0xab   : > { %2054 = vmatprep.subr.bf16.mxu0 %v2446_v3  ;;  %2100 = vmatprep.subr.bf16.mxu1 %v2453_v12  ;;  %v389_v40 = vld [vmem:[#allocation5 + $0x88] sm:$0xff]  ;;  %v411_v41 = vpack.c.bf16 %v387_v38, %v386_v37  ;;  %v390_v43 = vld [vmem:[#allocation5 + $0x90] sm:$0xff]  ;;  %v391_v44 = vld [vmem:[#allocation5 + $0x98] sm:$0xff] }
  0xac   : > { %v412_v42 = vpack.c.bf16 %v389_v40, %v388_v39  ;;  %v392_v45 = vld [vmem:[#allocation5 + $0xa0] sm:$0xff]  ;;  %v393_v46 = vld [vmem:[#allocation5 + $0xa8] sm:$0xff]  ;;  %v413_v47 = vpack.c.bf16 %v391_v44, %v390_v43  ;;  %v394_v49 = vld [vmem:[#allocation5 + $0xb0] sm:$0xff] }
  0xad   : > { %v414_v48 = vpack.c.bf16 %v393_v46, %v392_v45  ;;  %v395_v50 = vld [vmem:[#allocation5 + $0xb8] sm:$0xff]  ;;  %v396_v51 = vld [vmem:[#allocation5 + $0xc0] sm:$0xff]  ;;  %v397_v52 = vld [vmem:[#allocation5 + $0xc8] sm:$0xff] }
  0xae   : > { %2055 = vmatpush3.bf16.msra.mxu0 %v2446_v3  ;;  %2101 = vmatpush3.bf16.msra.mxu1 %v2453_v12  ;;  %v415_v53 = vpack.c.bf16 %v395_v50, %v394_v49  ;;  %v416_v54 = vpack.c.bf16 %v397_v52, %v396_v51  ;;  %v398_v55 = vld [vmem:[#allocation5 + $0xd0] sm:$0xff]  ;;  %v399_v56 = vld [vmem:[#allocation5 + $0xd8] sm:$0xff]  ;;  %v400_v57 = vld [vmem:[#allocation5 + $0xe0] sm:$0xff] }
  0xaf   : > { %2056 = vmatprep.subr.bf16.mxu0 %v2447_v7  ;;  %2102 = vmatprep.subr.bf16.mxu1 %v2454_v16  ;;  %v401_v58 = vld [vmem:[#allocation5 + $0xe8] sm:$0xff]  ;;  %v417_v59 = vpack.c.bf16 %v399_v56, %v398_v55  ;;  %v402_v61 = vld [vmem:[#allocation5 + $0xf0] sm:$0xff]  ;;  %v403_v62 = vld [vmem:[#allocation5 + $0xf8] sm:$0xff] }
  0xb0   : > { %v418_v60 = vpack.c.bf16 %v401_v58, %v400_v57  ;;  %v419_v63 = vpack.c.bf16 %v403_v62, %v402_v61  ;;  %v3115_v10 = vld [vmem:[%s3569_s6] ss:$0 sm:$0xff] }
  0xb1   : > { %v3134_v23 = vld [vmem:[%s3567_s4] ss:$0 sm:$0xff] }
  0xb2   : > { %2057 = vmatpush3.bf16.msra.mxu0 %v2447_v7  ;;  %2103 = vmatpush3.bf16.msra.mxu1 %v2454_v16 }
  0xb3   : > { %2058 = vmatprep.subr.bf16.mxu0 %v2448_v8  ;;  %2104 = vmatprep.subr.bf16.mxu1 %v2455_v21 }
  0xb6   : > { %2059 = vmatpush3.bf16.msra.mxu0 %v2448_v8  ;;  %2105 = vmatpush3.bf16.msra.mxu1 %v2455_v21 }
  0xb7   : > { %2060 = vmatprep.subr.bf16.mxu0 %v2449_v9  ;;  %2106 = vmatprep.subr.bf16.mxu1 %v2456_v24 }
  0xba   : > { %2061 = vmatpush3.bf16.msra.mxu0 %v2449_v9  ;;  %2107 = vmatpush3.bf16.msra.mxu1 %v2456_v24 }
  0xbb   : > { %2062 = vmatprep.subr.bf16.mxu0 %v2450_v13  ;;  %2108 = vmatprep.subr.bf16.mxu1 %v2457_v29 }
  0xbe   : > { %2063 = vmatpush3.bf16.msra.mxu0 %v2450_v13  ;;  %2109 = vmatpush3.bf16.msra.mxu1 %v2457_v29 }
  0xbf   : > { %2110 = vmatprep.subr.bf16.mxu1 %v2458_v32 }
  0xc1   : > { %2065 = vmatmul.mubr.bf16.vlgmr.msra.gmra.mrb[0].mxu0 %v405_v19 }
  0xc2   : > { %2068 = vmatprep.mubr.bf16.mxu0 %v406_v20  ;;  %2111 = vmatpush3.bf16.msra.mxu1 %v2458_v32 }
  0xc5   : > { %2113 = vmatmul.mubr.bf16.vlgmr.msra.gmra.mrb[0].mxu1 %v405_v19 }
  0xc6   : > { %2116 = vmatprep.mubr.bf16.mxu1 %v406_v20 }
  0xc9   : > { %2069 = vmatmul.mubr.bf16.gmra.mrb[4].mxu0 %v407_v27 }
  0xca   : > { %2072 = vmatprep.mubr.bf16.mxu0 %v408_v28 }
  0xcd   : > { %2117 = vmatmul.mubr.bf16.gmra.mrb[4].mxu1 %v407_v27 }
  0xce   : > { %2120 = vmatprep.mubr.bf16.mxu1 %v408_v28 }
  0xd1   : > { %2073 = vmatmul.mubr.bf16.gmra.mrb[8].mxu0 %v409_v35 }
  0xd2   : > { %2076 = vmatprep.mubr.bf16.mxu0 %v410_v36 }
  0xd5   : > { %2121 = vmatmul.mubr.bf16.gmra.mrb[8].mxu1 %v409_v35 }
  0xd6   : > { %2124 = vmatprep.mubr.bf16.mxu1 %v410_v36 }
  0xd9   : > { %2077 = vmatmul.mubr.bf16.gmra.mrb[12].mxu0 %v411_v41 }
  0xda   : > { %2080 = vmatprep.mubr.bf16.mxu0 %v412_v42 }
  0xdd   : > { %2125 = vmatmul.mubr.bf16.gmra.mrb[12].mxu1 %v411_v41 }
  0xde   : > { %2128 = vmatprep.mubr.bf16.mxu1 %v412_v42 }
  0xe1   : > { %2081 = vmatmul.mubr.bf16.gmra.mrb[16].mxu0 %v413_v47 }
  0xe2   : > { %2084 = vmatprep.mubr.bf16.mxu0 %v414_v48 }
  0xe5   : > { %2129 = vmatmul.mubr.bf16.gmra.mrb[16].mxu1 %v413_v47 }
  0xe6   : > { %2132 = vmatprep.mubr.bf16.mxu1 %v414_v48 }
  0xe9   : > { %2085 = vmatmul.mubr.bf16.gmra.mrb[20].mxu0 %v415_v53 }
  0xea   : > { %2088 = vmatprep.mubr.bf16.mxu0 %v416_v54 }
  0xed   : > { %2133 = vmatmul.mubr.bf16.gmra.mrb[20].mxu1 %v415_v53 }
  0xee   : > { %2136 = vmatprep.mubr.bf16.mxu1 %v416_v54 }
  0xf1   : > { %2089 = vmatmul.mubr.bf16.gmra.mrb[24].mxu0 %v417_v59 }
  0xf2   : > { %2092 = vmatprep.mubr.bf16.mxu0 %v418_v60 }
  0xf5   : > { %2137 = vmatmul.mubr.bf16.gmra.mrb[24].mxu1 %v417_v59 }
  0xf6   : > { %2140 = vmatprep.mubr.bf16.mxu1 %v418_v60 }
  0xf9   : > { %2093 = vmatmul.mubr.bf16.gmra.mrb[28].mxu0 %v419_v63 }
  0xfd   : > { %2141 = vmatmul.mubr.bf16.gmra.mrb[28].mxu1 %v419_v63 }
 0x194   : > { %v2066_v0 = vpop.f32.mrb[0].mxu0 }
 0x195   : > { %v525_v1 = vpop.f32.mrb[1].mxu0  ;;  %v534_v25 = vadd.f32 %v2066_v0, %v3134_v23 }
 0x196   : > { %v2067_v2 = vpop.f32.mrb[2].mxu0  ;;  %v526_v28 = vadd.f32 %v3134_v23, %v525_v1 }
 0x197   : > { %v528_v3 = vpop.f32.mrb[3].mxu0  ;;  %v537_v31 = vadd.f32 %v2067_v2, %v3134_v23 }
 0x198   : > { %v2114_v13 = vpop.f32.mrb[0].mxu1  ;;  %v529_v35 = vadd.f32 %v3134_v23, %v528_v3 }
 0x199   : > { %v766_v14 = vadd.f32 %v2114_v13, %v3115_v10  ;;  %v757_v15 = vpop.f32.mrb[1].mxu1 }
 0x19a   : > { %v2115_v16 = vpop.f32.mrb[2].mxu1  ;;  %v758_v40 = vadd.f32 %v3115_v10, %v757_v15 }
 0x19b   : > { %v769_v17 = vadd.f32 %v2115_v16, %v3115_v10  ;;  %v760_v41 = vpop.f32.mrb[3].mxu1 }
 0x19c   : > { %v2070_v4 = vpop.f32.mrb[4].mxu0  ;;  %v761_v43 = vadd.f32 %v3115_v10, %v760_v41 }
 0x19d   : > { %v541_v5 = vpop.f32.mrb[5].mxu0  ;;  %v981_v19 = vpack.c.bf16 %v769_v17, %v766_v14  ;;  %v3147_v44 = vadd.f32 %v2070_v4, %v3134_v23 }
 0x19e   : > { %v2071_v6 = vpop.f32.mrb[6].mxu0  ;;  %v542_v47 = vadd.f32 %v3134_v23, %v541_v5  ;;  %v980_v50 = vpack.c.bf16 %v761_v43, %v758_v40 }
 0x19f   : > { %v544_v7 = vpop.f32.mrb[7].mxu0  ;;  %997 = vst [vmem:[#allocation3 + $0x8] sm:$0xff] %v981_v19  ;;  %v3155_v51 = vadd.f32 %v2071_v6, %v3134_v23 }
 0x1a0   : > { %v545_v55 = vadd.f32 %v3134_v23, %v544_v7  ;;  %996 = vst [vmem:[#allocation3] sm:$0xff] %v980_v50  ;;  %v2118_v58 = vpop.f32.mrb[4].mxu1 }
 0x1a1   : > { %v773_v60 = vpop.f32.mrb[5].mxu1  ;;  %v782_v63 = vadd.f32 %v2118_v58, %v3115_v10 }
 0x1a2   : > { %v2119_v62 = vpop.f32.mrb[6].mxu1  ;;  %v774_v0 = vadd.f32 %v3115_v10, %v773_v60 }
 0x1a3   : > { %v785_v1 = vadd.f32 %v2119_v62, %v3115_v10  ;;  %v776_v2 = vpop.f32.mrb[7].mxu1 }
 0x1a4   : > { %v3108_v8 = vpop.f32.mrb[8].mxu0  ;;  %v777_v4 = vadd.f32 %v3115_v10, %v776_v2 }
 0x1a5   : > { %v3110_v9 = vpop.f32.mrb[9].mxu0  ;;  %v3172_v5 = vadd.f32 %v3108_v8, %v3134_v23  ;;  %v983_v13 = vpack.c.bf16 %v785_v1, %v782_v63 }
 0x1a6   : > { %v3117_v11 = vpop.f32.mrb[10].mxu0  ;;  %v558_v14 = vadd.f32 %v3134_v23, %v3110_v9  ;;  %v982_v17 = vpack.c.bf16 %v777_v4, %v774_v0 }
 0x1a7   : > { %v3119_v12 = vpop.f32.mrb[11].mxu0  ;;  %v3182_v19 = vadd.f32 %v3117_v11, %v3134_v23  ;;  %999 = vst [vmem:[#allocation3 + $0x18] sm:$0xff] %v983_v13 }
 0x1a8   : > { %v561_v9 = vadd.f32 %v3134_v23, %v3119_v12  ;;  %998 = vst [vmem:[#allocation3 + $0x10] sm:$0xff] %v982_v17 }
 0x1ac   : > { %v3123_v18 = vpop.f32.mrb[12].mxu0 }
 0x1ad   : > { %v3125_v20 = vpop.f32.mrb[13].mxu0 }
 0x1ae   : > { %v3127_v21 = vpop.f32.mrb[14].mxu0  ;;  %v574_v41 = vadd.f32 %v3134_v23, %v3125_v20 }
 0x1af   : > { %v3129_v22 = vpop.f32.mrb[15].mxu0 }
 0x1b0   : > { %v577_v20 = vadd.f32 %v3134_v23, %v3129_v22 }
 0x1b4   : > { %v2082_v24 = vpop.f32.mrb[16].mxu0 }
 0x1b5   : > { %v598_v26 = vadd.f32 %v2082_v24, %v3134_v23  ;;  %v589_v27 = vpop.f32.mrb[17].mxu0 }
 0x1b6   : > { %v590_v29 = vadd.f32 %v3134_v23, %v589_v27  ;;  %v2083_v30 = vpop.f32.mrb[18].mxu0 }
 0x1b7   : > { %v601_v32 = vadd.f32 %v2083_v30, %v3134_v23  ;;  %v592_v33 = vpop.f32.mrb[19].mxu0  ;;  %v2335_v34 = vpack.i.bf16 %v598_v26, %v534_v25 }
 0x1b8   : > { %v593_v36 = vadd.f32 %v3134_v23, %v592_v33  ;;  %v2331_v37 = vpack.i.bf16 %v590_v29, %v526_v28  ;;  %v2122_v28 = vpop.f32.mrb[8].mxu1 }
 0x1b9   : > { %v2337_v38 = vpack.i.bf16 %v601_v32, %v537_v31  ;;  %v789_v29 = vpop.f32.mrb[9].mxu1  ;;  %v798_v32 = vadd.f32 %v2122_v28, %v3115_v10 }
 0x1ba   : > { %2332 = vxpose.xlu0.b32.start [1/16] %v2331_v37, 128  ;;  %v2333_v39 = vpack.i.bf16 %v593_v36, %v529_v35  ;;  %v2123_v31 = vpop.f32.mrb[10].mxu1  ;;  %v790_v33 = vadd.f32 %v3115_v10, %v789_v29  ;;  %v3200_v37 = vadd.f32 %v3123_v18, %v3134_v23 }
 0x1bb   : > { %v792_v35 = vpop.f32.mrb[11].mxu1 }
 0x1bc   : > { %v2086_v42 = vpop.f32.mrb[20].mxu0  ;;  %v793_v36 = vadd.f32 %v3115_v10, %v792_v35 }
 0x1bd   : > { %v3150_v45 = vadd.f32 %v2086_v42, %v3134_v23  ;;  %v605_v46 = vpop.f32.mrb[21].mxu0 }
 0x1be   : > { %v606_v48 = vadd.f32 %v3134_v23, %v605_v46  ;;  %v2087_v49 = vpop.f32.mrb[22].mxu0  ;;  %2334 = vxpose.xlu0.b32.cont [2/16] %v2333_v39, 128  ;;  %v984_v46 = vpack.c.bf16 %v793_v36, %v790_v33 }
 0x1bf   : > { %v3158_v52 = vadd.f32 %v2087_v49, %v3134_v23  ;;  %v608_v53 = vpop.f32.mrb[23].mxu0  ;;  %v2343_v54 = vpack.i.bf16 %v3150_v45, %v3147_v44 }
 0x1c0   : > { %v609_v56 = vadd.f32 %v3134_v23, %v608_v53  ;;  %v2339_v57 = vpack.i.bf16 %v606_v48, %v542_v47  ;;  %v3210_v47 = vadd.f32 %v3127_v21, %v3134_v23  ;;  %1000 = vst [vmem:[#allocation3 + $0x20] sm:$0xff] %v984_v46 }
 0x1c1   : > { %v2345_v59 = vpack.i.bf16 %v3158_v52, %v3155_v51 }
 0x1c2   : > { %2336 = vxpose.xlu0.b32.cont [3/16] %v2335_v34, 128  ;;  %v2341_v61 = vpack.i.bf16 %v609_v56, %v545_v55  ;;  %v801_v34 = vadd.f32 %v2123_v31, %v3115_v10  ;;  %v2126_v55 = vpop.f32.mrb[12].mxu1 }
 0x1c3   : > { %v805_v56 = vpop.f32.mrb[13].mxu1  ;;  %v814_v60 = vadd.f32 %v2126_v55, %v3115_v10 }
 0x1c4   : > { %v2090_v3 = vpop.f32.mrb[24].mxu0  ;;  %v985_v40 = vpack.c.bf16 %v801_v34, %v798_v32  ;;  %v2127_v58 = vpop.f32.mrb[14].mxu1 }
 0x1c5   : > { %v3175_v6 = vadd.f32 %v2090_v3, %v3134_v23  ;;  %v621_v7 = vpop.f32.mrb[25].mxu0  ;;  %v817_v22 = vadd.f32 %v2127_v58, %v3115_v10 }
 0x1c6   : > { %v622_v15 = vadd.f32 %v3134_v23, %v621_v7  ;;  %v2091_v16 = vpop.f32.mrb[26].mxu0  ;;  %2338 = vxpose.xlu0.b32.cont [4/16] %v2337_v38, 128  ;;  %1001 = vst [vmem:[#allocation3 + $0x28] sm:$0xff] %v985_v40 }
 0x1c7   : > { %v3185_v8 = vadd.f32 %v2091_v16, %v3134_v23  ;;  %v624_v24 = vpop.f32.mrb[27].mxu0  ;;  %v2351_v25 = vpack.i.bf16 %v3175_v6, %v3172_v5  ;;  %v987_v63 = vpack.c.bf16 %v817_v22, %v814_v60 }
 0x1c8   : > { %v625_v26 = vadd.f32 %v3134_v23, %v624_v24  ;;  %v2347_v27 = vpack.i.bf16 %v622_v15, %v558_v14 }
 0x1c9   : > { %v2353_v11 = vpack.i.bf16 %v3185_v8, %v3182_v19  ;;  %1003 = vst [vmem:[#allocation3 + $0x38] sm:$0xff] %v987_v63 }
 0x1ca   : > { %2340 = vxpose.xlu0.b32.cont [5/16] %v2339_v57, 128  ;;  %v2349_v30 = vpack.i.bf16 %v625_v26, %v561_v9 }
 0x1cc   : > { %v2094_v12 = vpop.f32.mrb[28].mxu0 }
 0x1cd   : > { %v3203_v38 = vadd.f32 %v2094_v12, %v3134_v23  ;;  %v637_v39 = vpop.f32.mrb[29].mxu0 }
 0x1ce   : > { %v638_v42 = vadd.f32 %v3134_v23, %v637_v39  ;;  %v2095_v43 = vpop.f32.mrb[30].mxu0  ;;  %2342 = vxpose.xlu0.b32.cont [6/16] %v2341_v61, 128  ;;  %v806_v61 = vadd.f32 %v3115_v10, %v805_v56 }
 0x1cf   : > { %v3213_v18 = vadd.f32 %v2095_v43, %v3134_v23  ;;  %v640_v48 = vpop.f32.mrb[31].mxu0  ;;  %v2359_v49 = vpack.i.bf16 %v3203_v38, %v3200_v37 }
 0x1d0   : > { %v641_v50 = vadd.f32 %v3134_v23, %v640_v48  ;;  %v2355_v53 = vpack.i.bf16 %v638_v42, %v574_v41  ;;  %v808_v23 = vpop.f32.mrb[15].mxu1 }
 0x1d1   : > { %v2361_v21 = vpack.i.bf16 %v3213_v18, %v3210_v47  ;;  %v809_v62 = vadd.f32 %v3115_v10, %v808_v23  ;;  %v2130_v44 = vpop.f32.mrb[16].mxu1 }
 0x1d2   : > { %2344 = vxpose.xlu0.b32.cont [7/16] %v2343_v54, 128  ;;  %v2357_v57 = vpack.i.bf16 %v641_v50, %v577_v20  ;;  %v821_v45 = vpop.f32.mrb[17].mxu1  ;;  %v830_v1 = vadd.f32 %v2130_v44, %v3115_v10 }
 0x1d3   : > { %v986_v0 = vpack.c.bf16 %v809_v62, %v806_v61  ;;  %v2131_v54 = vpop.f32.mrb[18].mxu1  ;;  %v822_v2 = vadd.f32 %v3115_v10, %v821_v45 }
 0x1d4   : > { %v833_v3 = vadd.f32 %v2131_v54, %v3115_v10  ;;  %v824_v4 = vpop.f32.mrb[19].mxu1 }
 0x1d5   : > { %1002 = vst [vmem:[#allocation3 + $0x30] sm:$0xff] %v986_v0  ;;  %v825_v7 = vadd.f32 %v3115_v10, %v824_v4  ;;  %v2134_v52 = vpop.f32.mrb[20].mxu1 }
 0x1d6   : > { %2346 = vxpose.xlu0.b32.cont [8/16] %v2345_v59, 128  ;;  %v989_v13 = vpack.c.bf16 %v833_v3, %v830_v1  ;;  %v837_v59 = vpop.f32.mrb[21].mxu1  ;;  %v846_v15 = vadd.f32 %v2134_v52, %v3115_v10 }
 0x1d7   : > { %v988_v51 = vpack.c.bf16 %v825_v7, %v822_v2  ;;  %v2135_v14 = vpop.f32.mrb[22].mxu1  ;;  %v838_v16 = vadd.f32 %v3115_v10, %v837_v59 }
 0x1d8   : > { %1005 = vst [vmem:[#allocation3 + $0x48] sm:$0xff] %v989_v13  ;;  %v849_v17 = vadd.f32 %v2135_v14, %v3115_v10  ;;  %v840_v24 = vpop.f32.mrb[23].mxu1 }
 0x1d9   : > { %1004 = vst [vmem:[#allocation3 + $0x40] sm:$0xff] %v988_v51  ;;  %v841_v9 = vadd.f32 %v3115_v10, %v840_v24  ;;  %v2138_v5 = vpop.f32.mrb[24].mxu1 }
 0x1da   : > { %2348 = vxpose.xlu0.b32.cont [9/16] %v2347_v27, 128  ;;  %v991_v26 = vpack.c.bf16 %v849_v17, %v846_v15  ;;  %v853_v6 = vpop.f32.mrb[25].mxu1  ;;  %v862_v28 = vadd.f32 %v2138_v5, %v3115_v10 }
 0x1db   : > { %v990_v27 = vpack.c.bf16 %v841_v9, %v838_v16  ;;  %v854_v29 = vadd.f32 %v3115_v10, %v853_v6 }
 0x1dc   : > { %1007 = vst [vmem:[#allocation3 + $0x58] sm:$0xff] %v991_v26 }
 0x1dd   : > { %1006 = vst [vmem:[#allocation3 + $0x50] sm:$0xff] %v990_v27 }
 0x1de   : > { %2350 = vxpose.xlu0.b32.cont [10/16] %v2349_v30, 128 }
 0x1e2   : > { %2352 = vxpose.xlu0.b32.cont [11/16] %v2351_v25, 128  ;;  %v2139_v25 = vpop.f32.mrb[26].mxu1 }
 0x1e3   : > { %v865_v30 = vadd.f32 %v2139_v25, %v3115_v10  ;;  %v856_v31 = vpop.f32.mrb[27].mxu1 }
 0x1e4   : > { %v857_v32 = vadd.f32 %v3115_v10, %v856_v31  ;;  %v2142_v8 = vpop.f32.mrb[28].mxu1 }
 0x1e5   : > { %v993_v33 = vpack.c.bf16 %v865_v30, %v862_v28  ;;  %v878_v35 = vadd.f32 %v2142_v8, %v3115_v10 }
 0x1e6   : > { %2354 = vxpose.xlu0.b32.cont [12/16] %v2353_v11, 128  ;;  %v992_v19 = vpack.c.bf16 %v857_v32, %v854_v29  ;;  %v869_v11 = vpop.f32.mrb[29].mxu1 }
 0x1e7   : > { %1009 = vst [vmem:[#allocation3 + $0x68] sm:$0xff] %v993_v33  ;;  %v2143_v34 = vpop.f32.mrb[30].mxu1  ;;  %v870_v12 = vadd.f32 %v3115_v10, %v869_v11 }
 0x1e8   : > { %1008 = vst [vmem:[#allocation3 + $0x60] sm:$0xff] %v992_v19  ;;  %v881_v36 = vadd.f32 %v2143_v34, %v3115_v10  ;;  %v872_v39 = vpop.f32.mrb[31].mxu1 }
 0x1e9   : > { %v873_v40 = vadd.f32 %v3115_v10, %v872_v39 }
 0x1ea   : > { %2356 = vxpose.xlu0.b32.cont [13/16] %v2355_v53, 128  ;;  %v995_v41 = vpack.c.bf16 %v881_v36, %v878_v35 }
 0x1eb   : > { %v994_v42 = vpack.c.bf16 %v873_v40, %v870_v12 }
 0x1ec   : > { %1011 = vst [vmem:[#allocation3 + $0x78] sm:$0xff] %v995_v41 }
 0x1ed   : > { %1010 = vst [vmem:[#allocation3 + $0x70] sm:$0xff] %v994_v42 }
 0x1ee   : > { %2358 = vxpose.xlu0.b32.cont [14/16] %v2357_v57, 128 }
 0x1f2   : > { %2360 = vxpose.xlu0.b32.cont [15/16] %v2359_v49, 128 }
 0x1f6   : > { %2362 = vxpose.xlu0.b32.end [16/16] %v2361_v21, 128 }
 0x23a   : > { %v2363_v37 = vpop.trf.xlu0 }
 0x23b   : > { %v2367_v38 = vunpack.i.h.bf16 %v2363_v37  ;;  %v2364_v43 = vunpack.i.l.bf16 %v2363_v37 }
 0x23e   : > { %v2368_v46 = vpop.trf.xlu0 }
 0x23f   : > { %v2372_v48 = vunpack.i.h.bf16 %v2368_v46  ;;  %v2369_v49 = vunpack.i.l.bf16 %v2368_v46 }
 0x241   : > { %v948_v20 = vpack.c.bf16 %v2369_v49, %v2364_v43  ;;  %v949_v50 = vpack.c.bf16 %v2372_v48, %v2367_v38 }
 0x242   : > { %v2373_v53 = vpop.trf.xlu0 }
 0x243   : > { %964 = vst [vmem:[#allocation2] sm:$0xff] %v948_v20  ;;  %965 = vst [vmem:[#allocation2 + $0x8] sm:$0xff] %v949_v50  ;;  %v2377_v10 = vunpack.i.h.bf16 %v2373_v53  ;;  %v2374_v55 = vunpack.i.l.bf16 %v2373_v53 }
 0x246   : > { %v2378_v56 = vpop.trf.xlu0 }
 0x247   : > { %v2382_v57 = vunpack.i.h.bf16 %v2378_v56  ;;  %v2379_v47 = vunpack.i.l.bf16 %v2378_v56 }
 0x249   : > { %v950_v18 = vpack.c.bf16 %v2379_v47, %v2374_v55  ;;  %v951_v21 = vpack.c.bf16 %v2382_v57, %v2377_v10 }
 0x24a   : > { %v2383_v58 = vpop.trf.xlu0 }
 0x24b   : > { %966 = vst [vmem:[#allocation2 + $0x10] sm:$0xff] %v950_v18  ;;  %967 = vst [vmem:[#allocation2 + $0x18] sm:$0xff] %v951_v21  ;;  %v2387_v60 = vunpack.i.h.bf16 %v2383_v58  ;;  %v2384_v61 = vunpack.i.l.bf16 %v2383_v58 }
 0x24e   : > { %v2388_v22 = vpop.trf.xlu0 }
 0x24f   : > { %v2392_v23 = vunpack.i.h.bf16 %v2388_v22  ;;  %v2389_v62 = vunpack.i.l.bf16 %v2388_v22 }
 0x251   : > { %v952_v63 = vpack.c.bf16 %v2389_v62, %v2384_v61  ;;  %v953_v0 = vpack.c.bf16 %v2392_v23, %v2387_v60 }
 0x252   : > { %v2393_v44 = vpop.trf.xlu0 }
 0x253   : > { %968 = vst [vmem:[#allocation2 + $0x20] sm:$0xff] %v952_v63  ;;  %969 = vst [vmem:[#allocation2 + $0x28] sm:$0xff] %v953_v0  ;;  %v2397_v45 = vunpack.i.h.bf16 %v2393_v44  ;;  %v2394_v54 = vunpack.i.l.bf16 %v2393_v44 }
 0x256   : > { %v2398_v1 = vpop.trf.xlu0 }
 0x257   : > { %v2402_v2 = vunpack.i.h.bf16 %v2398_v1  ;;  %v2399_v3 = vunpack.i.l.bf16 %v2398_v1 }
 0x259   : > { %v954_v4 = vpack.c.bf16 %v2399_v3, %v2394_v54  ;;  %v955_v7 = vpack.c.bf16 %v2402_v2, %v2397_v45 }
 0x25a   : > { %v2403_v13 = vpop.trf.xlu0 }
 0x25b   : > { %970 = vst [vmem:[#allocation2 + $0x30] sm:$0xff] %v954_v4  ;;  %971 = vst [vmem:[#allocation2 + $0x38] sm:$0xff] %v955_v7  ;;  %v2407_v51 = vunpack.i.h.bf16 %v2403_v13  ;;  %v2404_v52 = vunpack.i.l.bf16 %v2403_v13 }
 0x25e   : > { %v2408_v59 = vpop.trf.xlu0 }
 0x25f   : > { %v2412_v14 = vunpack.i.h.bf16 %v2408_v59  ;;  %v2409_v15 = vunpack.i.l.bf16 %v2408_v59 }
 0x261   : > { %v956_v16 = vpack.c.bf16 %v2409_v15, %v2404_v52  ;;  %v957_v17 = vpack.c.bf16 %v2412_v14, %v2407_v51 }
 0x262   : > { %v2413_v24 = vpop.trf.xlu0 }
 0x263   : > { %972 = vst [vmem:[#allocation2 + $0x40] sm:$0xff] %v956_v16  ;;  %973 = vst [vmem:[#allocation2 + $0x48] sm:$0xff] %v957_v17  ;;  %v2417_v9 = vunpack.i.h.bf16 %v2413_v24  ;;  %v2414_v26 = vunpack.i.l.bf16 %v2413_v24 }
 0x266   : > { %v2418_v27 = vpop.trf.xlu0 }
 0x267   : > { %v2422_v5 = vunpack.i.h.bf16 %v2418_v27  ;;  %v2419_v6 = vunpack.i.l.bf16 %v2418_v27 }
 0x269   : > { %v958_v25 = vpack.c.bf16 %v2419_v6, %v2414_v26  ;;  %v959_v28 = vpack.c.bf16 %v2422_v5, %v2417_v9 }
 0x26a   : > { %v2423_v29 = vpop.trf.xlu0 }
 0x26b   : > { %974 = vst [vmem:[#allocation2 + $0x50] sm:$0xff] %v958_v25  ;;  %975 = vst [vmem:[#allocation2 + $0x58] sm:$0xff] %v959_v28  ;;  %v2427_v30 = vunpack.i.h.bf16 %v2423_v29  ;;  %v2424_v31 = vunpack.i.l.bf16 %v2423_v29 }
 0x26e   : > { %v2428_v32 = vpop.trf.xlu0 }
 0x26f   : > { %v2432_v33 = vunpack.i.h.bf16 %v2428_v32  ;;  %v2429_v19 = vunpack.i.l.bf16 %v2428_v32 }
 0x271   : > { %v960_v8 = vpack.c.bf16 %v2429_v19, %v2424_v31  ;;  %v961_v11 = vpack.c.bf16 %v2432_v33, %v2427_v30 }
 0x272   : > { %v2433_v34 = vpop.trf.xlu0 }
 0x273   : > { %976 = vst [vmem:[#allocation2 + $0x60] sm:$0xff] %v960_v8  ;;  %977 = vst [vmem:[#allocation2 + $0x68] sm:$0xff] %v961_v11  ;;  %v2437_v35 = vunpack.i.h.bf16 %v2433_v34  ;;  %v2434_v12 = vunpack.i.l.bf16 %v2433_v34 }
 0x276   : > { %v2438_v36 = vpop.trf.xlu0 }
 0x277   : > { %v2442_v39 = vunpack.i.h.bf16 %v2438_v36  ;;  %v2439_v40 = vunpack.i.l.bf16 %v2438_v36 }
 0x279   : > { %v962_v41 = vpack.c.bf16 %v2439_v40, %v2434_v12  ;;  %v963_v42 = vpack.c.bf16 %v2442_v39, %v2437_v35 }
 0x27b   : > { %978 = vst [vmem:[#allocation2 + $0x70] sm:$0xff] %v962_v41  ;;  %979 = vst [vmem:[#allocation2 + $0x78] sm:$0xff] %v963_v42 }
 0x27c PF: > { %v2459_v37 = vld [vmem:[#allocation8] sm:$0xff]   ;;  %v2460_v38 = vld [vmem:[#allocation8 + $0x8] sm:$0xff]   ;;  %s1903_s0 = sshll.u32 %s2797_s13, 7  ;;  %v2461_v43 = vld [vmem:[#allocation8 + $0x10] sm:$0xff]   ;;  %v2823_v29 = vmov 0   ;;  %s1696_s24 = sld [smem:[#allocation4]] }
 0x27d   : > { %2144 = vmatprep.subr.bf16.mxu0 %v2459_v37  ;;  %v2462_v46 = vld [vmem:[#allocation8 + $0x18] sm:$0xff]   ;;  %s3261_s10 = scalar_lea.vmem [#allocation5], %s1903_s0  ;;  %v2463_v50 = vld [vmem:[#allocation8 + $0x20] sm:$0xff]   ;;  %v1215_v53 = vld [vmem:[#allocation2 + $0x8] sm:$0xff]  ;;  %1262 = vmatprep.mubr.bf16.mxu1 %v2823_v29  ;;  %s1914_s15 = sshll.u32 %s2797_s13, 4 }
 0x27e   : > { %2145 = vmatpush3.bf16.msra.mxu0 %v2459_v37  ;;  %v3264_v48 = vld [vmem:[%s3261_s10] sm:$0xff]  ;;  %v3267_v49 = vld [vmem:[%s3261_s10 + $0x8] sm:$0xff]  ;;  %1230 = vmatprep.subr.bf16.mxu1 %v1215_v53  ;;  %v1217_v55 = vld [vmem:[#allocation2 + $0x18] sm:$0xff]  ;;  %s1915_s11 = sshll.u32 %s2801_s7, 5  ;;  %s1762_s7 = sshll.u32 %s3105_s21, 4  ;;  %s3495_s7 = int_to_ptr.vmem [resolvable:$true] %s1762_s7 }
 0x27f   : > { %2146 = vmatprep.subr.bf16.mxu0 %v2460_v38  ;;  %v1030_v20 = vpack.c.bf16 %v3267_v49, %v3264_v48  ;;  %v1214_v10 = vld [vmem:[#allocation2] sm:$0xff]  ;;  %v2464_v56 = vld [vmem:[#allocation8 + $0x28] sm:$0xff]   ;;  %v1216_v57 = vld [vmem:[#allocation2 + $0x10] sm:$0xff]  ;;  %s1759_s25 = sadd.s32 %s1915_s11, %s1914_s15  ;;  %s3502_s20 = scalar_lea.sflag [#allocation7], %s363_s14 }
 0x280   : > { %1231 = vmatpush1.bf16.msra.mxu1 %v1214_v10  ;;  %v1219_v47 = vld [vmem:[#allocation2 + $0x28] sm:$0xff]  ;;  %v2465_v18 = vld [vmem:[#allocation8 + $0x30] sm:$0xff]   ;;  %v1218_v21 = vld [vmem:[#allocation2 + $0x20] sm:$0xff]  ;;  %s1916_s13 = sshll.u32 %s1759_s25, 7  ;;  %s2683_s12 = scalar_lea.vmem %s3495_s7, 2048 }
 0x281   : > { %2160 = vmatprep.mubr.bf16.mxu0 %v1030_v20  ;;  %1232 = vmatprep.subr.bf16.mxu1 %v1217_v55  ;;  %v1221_v58 = vld [vmem:[#allocation2 + $0x38] sm:$0xff]  ;;  %v1220_v61 = vld [vmem:[#allocation2 + $0x30] sm:$0xff]  ;;  %v1223_v22 = vld [vmem:[#allocation2 + $0x48] sm:$0xff]  ;;  %s3493_s27 = scalar_lea.hbm %s3571_s8, %s1916_s13  ;;  %p2684_p1 = scmp.ne.s32.totalorder %s3495_s7, %s2683_s12 }
 0x282   : > { %2147 = vmatpush3.bf16.msra.mxu0 %v2460_v38  ;;  %v2466_v60 = vld [vmem:[#allocation8 + $0x38] sm:$0xff]   ;;  %v3272_v23 = vld [vmem:[%s3261_s10 + $0x10] sm:$0xff]  ;;  %v3278_v63 = vld [vmem:[%s3261_s10 + $0x20] sm:$0xff]  ;;  %p3630_p3 = scmp.ne.s32.totalorder %s3611_s26, 0  ;;  %s2824_s9 = smov [#allocation13]  }
 0x283   : > { %2148 = vmatprep.subr.bf16.mxu0 %v2461_v43  ;;  %v3275_v62 = vld [vmem:[%s3261_s10 + $0x18] sm:$0xff]  ;;  %v3281_v0 = vld [vmem:[%s3261_s10 + $0x28] sm:$0xff]  ;;  %v1222_v44 = vld [vmem:[#allocation2 + $0x40] sm:$0xff]  ;;  %s2687_s17 = sshll.u32 %s2824_s9, 4  ;;  %s2688_s17 = int_to_ptr.vmem [resolvable:$false] %s2687_s17 }
 0x284   : > { %1233 = vmatpush1.bf16.msra.mxu1 %v1216_v57  ;;  %v1225_v45 = vld [vmem:[#allocation2 + $0x58] sm:$0xff]  ;;  %v1031_v54 = vpack.c.bf16 %v3275_v62, %v3272_v23  ;;  %v1032_v1 = vpack.c.bf16 %v3281_v0, %v3278_v63  ;;  %v1224_v2 = vld [vmem:[#allocation2 + $0x50] sm:$0xff]  ;;  %v3294_v7 = vld [vmem:[%s3261_s10 + $0x40] sm:$0xff]  ;;  %p2685_p10 = pnand %p2684_p1, %p3630_p3  ;;  %s2689_s22 = scalar_lea.vmem %s2688_s17, 4096 }
 0x285   : > { %1234 = vmatprep.subr.bf16.mxu1 %v1219_v47  ;;  %v3288_v3 = vld [vmem:[%s3261_s10 + $0x30] sm:$0xff]  ;;  %v3291_v4 = vld [vmem:[%s3261_s10 + $0x38] sm:$0xff]  ;;  %v3297_v13 = vld [vmem:[%s3261_s10 + $0x48] sm:$0xff]  ;;  %p2690_p13 = scmp.lt.s32.totalorder %s3495_s7, %s2688_s17  ;;  %p2691_p0 = scmp.lt.s32.totalorder %s2689_s22, %s2683_s12 }
 0x286   : > { %2149 = vmatpush3.bf16.msra.mxu0 %v2461_v43  ;;  %v1033_v51 = vpack.c.bf16 %v3291_v4, %v3288_v3  ;;  %v1034_v52 = vpack.c.bf16 %v3297_v13, %v3294_v7  ;;  %v1024_v59 = vld [vmem:[%s3261_s10 + $0x50] sm:$0xff]  ;;  %v1025_v14 = vld [vmem:[%s3261_s10 + $0x58] sm:$0xff]  ;;  %v1026_v15 = vld [vmem:[%s3261_s10 + $0x60] sm:$0xff]  ;;  %p2686_p11 = pneg %p2685_p10 }
 0x287   : > { %2150 = vmatprep.subr.bf16.mxu0 %v2462_v46  ;;  %v1027_v16 = vld [vmem:[%s3261_s10 + $0x68] sm:$0xff]  ;;  %v1035_v17 = vpack.c.bf16 %v1025_v14, %v1024_v59  ;;  %v1028_v9 = vld [vmem:[%s3261_s10 + $0x70] sm:$0xff]  ;;  %v1029_v26 = vld [vmem:[%s3261_s10 + $0x78] sm:$0xff]  ;;  %p2692_p4 = por %p2691_p0, %p2690_p13 }
 0x288   : > { %1235 = vmatpush1.bf16.msra.mxu1 %v1218_v21  ;;  %v1036_v24 = vpack.c.bf16 %v1027_v16, %v1026_v15  ;;  %v1037_v27 = vpack.c.bf16 %v1029_v26, %v1028_v9  ;;  %v1227_v5 = vld [vmem:[#allocation2 + $0x68] sm:$0xff]  ;;  %v1226_v6 = vld [vmem:[#allocation2 + $0x60] sm:$0xff]  ;;  %v1229_v25 = vld [vmem:[#allocation2 + $0x78] sm:$0xff] }
 0x289   : > { %1236 = vmatprep.subr.bf16.mxu1 %v1221_v58  ;;  %v1228_v28 = vld [vmem:[#allocation2 + $0x70] sm:$0xff]  ;;  %v1904_v31 = vld [vmem:[%s3565_s2] ss:$0 sm:$0xff]  ;;  %v1560_v16 = vld [vmem:[#allocation3 + $0x48] sm:$0xff]  ;;  %p2693_p2 = pnand %p2692_p4, %p2686_p11 }
 0x28a   : > { %2151 = vmatpush3.bf16.msra.mxu0 %v2462_v46  ;;  %v1559_v14 = vld [vmem:[#allocation3 + $0x40] sm:$0xff]  ;;  %v1553_v9 = vld [vmem:[#allocation3 + $0x10] sm:$0xff] }
 0x28b   : > { %2152 = vmatprep.subr.bf16.mxu0 %v2463_v50  ;;  %v1551_v15 = vld [vmem:[#allocation3] sm:$0xff] }
 0x28c   : > { %1237 = vmatpush1.bf16.msra.mxu1 %v1220_v61 }
 0x28d   : > { %1238 = vmatprep.subr.bf16.mxu1 %v1223_v22 }
 0x28e   : > { %2153 = vmatpush3.bf16.msra.mxu0 %v2463_v50 }
 0x28f   : > { %2154 = vmatprep.subr.bf16.mxu0 %v2464_v56 }
 0x290   : > { %1239 = vmatpush1.bf16.msra.mxu1 %v1222_v44 }
 0x291   : > { %1240 = vmatprep.subr.bf16.mxu1 %v1225_v45 }
 0x292   : > { %2155 = vmatpush3.bf16.msra.mxu0 %v2464_v56 }
 0x293   : > { %2156 = vmatprep.subr.bf16.mxu0 %v2465_v18 }
 0x294   : > { %1241 = vmatpush1.bf16.msra.mxu1 %v1224_v2 }
 0x295   : > { %1242 = vmatprep.subr.bf16.mxu1 %v1227_v5 }
 0x296   : > { %2157 = vmatpush3.bf16.msra.mxu0 %v2465_v18 }
 0x297   : > { %2158 = vmatprep.subr.bf16.mxu0 %v2466_v60 }
 0x298   : > { %1243 = vmatpush1.bf16.msra.mxu1 %v1226_v6 }
 0x299   : > { %1244 = vmatprep.subr.bf16.mxu1 %v1229_v25 }
 0x29a   : > { %2159 = vmatpush3.bf16.msra.mxu0 %v2466_v60 }
 0x29b   : > { %1984 = vmatprep.subr.bf16.mxu0 %v1559_v14 }
 0x29c   : > { %1245 = vmatpush1.bf16.msra.mxu1 %v1228_v28 }
 0x29d   : > { %2161 = vmatmul.mubr.bf16.vlgmr.msra.gmra.mrb[0].mxu0 %v1031_v54  ;;  %2176 = vmatprep.subr.bf16.mxu1 %v1559_v14 }
 0x29e   : > { %2164 = vmatprep.mubr.bf16.mxu0 %v1032_v1  ;;  %1985 = vmatpush3.bf16.msra.mxu0 %v1551_v15 }
 0x29f   : > { %1986 = vmatprep.subr.bf16.mxu0 %v1560_v16 }
 0x2a5   : > { %2165 = vmatmul.mubr.bf16.gmra.mrb[4].mxu0 %v1033_v51 }
 0x2a6   : > { %2168 = vmatprep.mubr.bf16.mxu0 %v1034_v52 }
 0x2ad   : > { %2169 = vmatmul.mubr.bf16.gmra.mrb[8].mxu0 %v1035_v17  ;;  %v1552_v17 = vld [vmem:[#allocation3 + $0x8] sm:$0xff] }
 0x2ae   : > { %2172 = vmatprep.mubr.bf16.mxu0 %v1036_v24  ;;  %v1561_v24 = vld [vmem:[#allocation3 + $0x50] sm:$0xff]  ;;  %1987 = vmatpush3.bf16.msra.mxu0 %v1552_v17 }
 0x2af   : > { %1988 = vmatprep.subr.bf16.mxu0 %v1561_v24 }
 0x2b2   : > { %1989 = vmatpush3.bf16.msra.mxu0 %v1553_v9 }
 0x2b5   : > { %2173 = vmatmul.mubr.bf16.gmra.mrb[12].mxu0 %v1037_v27 }
 0x370   : > { %v2162_v30 = vpop.f32.mrb[0].mxu0 }
 0x371   : > { %v1143_v32 = vpop.f32.mrb[1].mxu0  ;;  %v1152_v19 = vadd.f32 %v2162_v30, %v1904_v31 }
 0x372   : > { %v2163_v33 = vpop.f32.mrb[2].mxu0  ;;  %v1144_v34 = vadd.f32 %v1904_v31, %v1143_v32 }
 0x373   : > { %v1155_v8 = vadd.f32 %v2163_v33, %v1904_v31  ;;  %v1146_v11 = vpop.f32.mrb[3].mxu0 }
 0x374   : > { %v1147_v35 = vadd.f32 %v1904_v31, %v1146_v11 }
 0x375   : > { %v1207_v12 = vpack.c.bf16 %v1155_v8, %v1152_v19 }
 0x376   : > { %v1206_v36 = vpack.c.bf16 %v1147_v35, %v1144_v34 }
 0x378   : > { %1263 = vmatmul.mubr.bf16.vlgmr.msra.gmra.mrb[0].mxu1 %v1206_v36  ;;  %v2166_v39 = vpop.f32.mrb[4].mxu0 }
 0x379   : > { %v1168_v40 = vadd.f32 %v2166_v39, %v1904_v31  ;;  %v1159_v41 = vpop.f32.mrb[5].mxu0  ;;  %1272 = vmatprep.mubr.bf16.mxu1 %v2823_v29  ;;  %2184 = vmatpush3.bf16.msra.mxu1 %v1551_v15  ;;  %v1562_v39 = vld [vmem:[#allocation3 + $0x58] sm:$0xff] }
 0x37a   : > { %v1160_v42 = vadd.f32 %v1904_v31, %v1159_v41  ;;  %v2167_v37 = vpop.f32.mrb[6].mxu0  ;;  %2177 = vmatprep.subr.bf16.mxu1 %v1560_v16  ;;  %1990 = vmatprep.subr.bf16.mxu0 %v1562_v39 }
 0x37b   : > { %v1171_v38 = vadd.f32 %v2167_v37, %v1904_v31  ;;  %v1162_v43 = vpop.f32.mrb[7].mxu0 }
 0x37c   : > { %v1163_v46 = vadd.f32 %v1904_v31, %v1162_v43 }
 0x37d   : > { %v1209_v20 = vpack.c.bf16 %v1171_v38, %v1168_v40  ;;  %2185 = vmatpush3.bf16.msra.mxu1 %v1552_v17  ;;  %v1554_v40 = vld [vmem:[#allocation3 + $0x18] sm:$0xff]  ;;  %v1555_v38 = vld [vmem:[#allocation3 + $0x20] sm:$0xff] }
 0x37e   : > { %v1208_v50 = vpack.c.bf16 %v1163_v46, %v1160_v42  ;;  %2178 = vmatprep.subr.bf16.mxu1 %v1561_v24  ;;  %1991 = vmatpush3.bf16.msra.mxu0 %v1554_v40  ;;  %v1563_v42 = vld [vmem:[#allocation3 + $0x60] sm:$0xff] }
 0x37f   : > { %1992 = vmatprep.subr.bf16.mxu0 %v1563_v42 }
 0x380   : > { %1273 = vmatmul.mubr.bf16.gmra.mrb[4].mxu1 %v1207_v12  ;;  %v2170_v53 = vpop.f32.mrb[8].mxu0 }
 0x381   : > { %1282 = vmatprep.mubr.bf16.mxu1 %v2823_v29  ;;  %v1184_v10 = vadd.f32 %v2170_v53, %v1904_v31  ;;  %v1175_v55 = vpop.f32.mrb[9].mxu0  ;;  %2186 = vmatpush3.bf16.msra.mxu1 %v1553_v9  ;;  %v1564_v53 = vld [vmem:[#allocation3 + $0x68] sm:$0xff] }
 0x382   : > { %v1176_v56 = vadd.f32 %v1904_v31, %v1175_v55  ;;  %v2171_v57 = vpop.f32.mrb[10].mxu0  ;;  %2179 = vmatprep.subr.bf16.mxu1 %v1562_v39  ;;  %1993 = vmatpush3.bf16.msra.mxu0 %v1555_v38 }
 0x383   : > { %v1187_v47 = vadd.f32 %v2171_v57, %v1904_v31  ;;  %v1178_v18 = vpop.f32.mrb[11].mxu0  ;;  %1994 = vmatprep.subr.bf16.mxu0 %v1564_v53 }
 0x384   : > { %v1179_v21 = vadd.f32 %v1904_v31, %v1178_v18 }
 0x385   : > { %v1211_v58 = vpack.c.bf16 %v1187_v47, %v1184_v10  ;;  %2187 = vmatpush3.bf16.msra.mxu1 %v1554_v40  ;;  %v1556_v10 = vld [vmem:[#allocation3 + $0x28] sm:$0xff]  ;;  %v1557_v47 = vld [vmem:[#allocation3 + $0x30] sm:$0xff] }
 0x386   : > { %v1210_v60 = vpack.c.bf16 %v1179_v21, %v1176_v56  ;;  %2180 = vmatprep.subr.bf16.mxu1 %v1563_v42  ;;  %1995 = vmatpush3.bf16.msra.mxu0 %v1556_v10  ;;  %v1565_v56 = vld [vmem:[#allocation3 + $0x70] sm:$0xff] }
 0x387   : > { %1996 = vmatprep.subr.bf16.mxu0 %v1565_v56 }
 0x388   : > { %1283 = vmatmul.mubr.bf16.gmra.mrb[8].mxu1 %v1208_v50  ;;  %v2174_v61 = vpop.f32.mrb[12].mxu0 }
 0x389   : > { %1292 = vmatprep.mubr.bf16.mxu1 %v2823_v29  ;;  %v1200_v22 = vadd.f32 %v2174_v61, %v1904_v31  ;;  %v1191_v44 = vpop.f32.mrb[13].mxu0  ;;  %2188 = vmatpush3.bf16.msra.mxu1 %v1555_v38  ;;  %v1566_v61 = vld [vmem:[#allocation3 + $0x78] sm:$0xff] }
 0x38a   : > { %v1192_v45 = vadd.f32 %v1904_v31, %v1191_v44  ;;  %v2175_v54 = vpop.f32.mrb[14].mxu0  ;;  %2181 = vmatprep.subr.bf16.mxu1 %v1564_v53  ;;  %1997 = vmatpush3.bf16.msra.mxu0 %v1557_v47 }
 0x38b   : > { %v1203_v1 = vadd.f32 %v2175_v54, %v1904_v31  ;;  %v1194_v2 = vpop.f32.mrb[15].mxu0  ;;  %1998 = vmatprep.subr.bf16.mxu0 %v1566_v61 }
 0x38c   : > { %v1195_v51 = vadd.f32 %v1904_v31, %v1194_v2 }
 0x38d   : > { %v1213_v52 = vpack.c.bf16 %v1203_v1, %v1200_v22  ;;  %2189 = vmatpush3.bf16.msra.mxu1 %v1556_v10  ;;  %v1558_v22 = vld [vmem:[#allocation3 + $0x38] sm:$0xff] }
 0x38e   : > { %v1212_v59 = vpack.c.bf16 %v1195_v51, %v1192_v45  ;;  %2182 = vmatprep.subr.bf16.mxu1 %v1565_v56  ;;  %1999 = vmatpush3.bf16.msra.mxu0 %v1558_v22 }
 0x390   : > { %1293 = vmatmul.mubr.bf16.gmra.mrb[12].mxu1 %v1209_v20 }
 0x391   : > { %1302 = vmatprep.mubr.bf16.mxu1 %v2823_v29  ;;  %2190 = vmatpush3.bf16.msra.mxu1 %v1557_v47 }
 0x392   : > { %2183 = vmatprep.subr.bf16.mxu1 %v1566_v61 }
 0x395   : > { %2191 = vmatpush3.bf16.msra.mxu1 %v1558_v22 }
 0x398   : > { %1303 = vmatmul.mubr.bf16.gmra.mrb[16].mxu1 %v1210_v60 }
 0x399   : > { %1312 = vmatprep.mubr.bf16.mxu1 %v2823_v29 }
 0x3a0   : > { %1313 = vmatmul.mubr.bf16.gmra.mrb[20].mxu1 %v1211_v58 }
 0x3a1   : > { %1322 = vmatprep.mubr.bf16.mxu1 %v2823_v29 }
 0x3a8   : > { %1323 = vmatmul.mubr.bf16.gmra.mrb[24].mxu1 %v1212_v59 }
 0x3a9   : > { %1332 = vmatprep.mubr.bf16.mxu1 %v2823_v29 }
 0x3b0   : > { %1333 = vmatmul.mubr.bf16.gmra.mrb[28].mxu1 %v1213_v52 }
 0x44b   : > { %v3312_v26 = vpop.f32.mrb[0].mxu1 }
 0x44c   : > { %v3314_v27 = vpop.f32.mrb[1].mxu1 }
 0x44d   : > { %v3316_v5 = vpop.f32.mrb[2].mxu1  ;;  %v1343_v6 = vmax.f32 %v3312_v26, %v3314_v27 }
 0x44e   : > { %v3320_v25 = vpop.f32.mrb[3].mxu1 }
 0x44f   : > { %1344 = vmax.xlane.f32.xlu0 %v1343_v6  ;;  %v1346_v28 = vmax.f32 %v3316_v5, %v3320_v25 }
 0x453   : > { %1347 = vmax.xlane.f32.xlu0 %v1346_v28  ;;  %v3324_v29 = vpop.f32.mrb[4].mxu1 }
 0x454   : > { %v3326_v30 = vpop.f32.mrb[5].mxu1 }
 0x455   : > { %v3328_v31 = vpop.f32.mrb[6].mxu1  ;;  %v1349_v32 = vmax.f32 %v3324_v29, %v3326_v30 }
 0x456   : > { %v3332_v33 = vpop.f32.mrb[7].mxu1 }
 0x457   : > { %1350 = vmax.xlane.f32.xlu1 %v1349_v32  ;;  %v1352_v19 = vmax.f32 %v3328_v31, %v3332_v33 }
 0x45b   : > { %1353 = vmax.xlane.f32.xlu1 %v1352_v19  ;;  %v3336_v8 = vpop.f32.mrb[8].mxu1 }
 0x45c   : > { %v3338_v11 = vpop.f32.mrb[9].mxu1 }
 0x45d   : > { %v3340_v34 = vpop.f32.mrb[10].mxu1  ;;  %v1355_v35 = vmax.f32 %v3336_v8, %v3338_v11 }
 0x45e   : > { %v3344_v12 = vpop.f32.mrb[11].mxu1 }
 0x45f   : > { %1356 = vmax.xlane.f32.xlu0 %v1355_v35  ;;  %v1358_v36 = vmax.f32 %v3340_v34, %v3344_v12 }
 0x461   : > { %1359 = vmax.xlane.f32.xlu1 %v1358_v36 }
 0x463   : > { %v3348_v41 = vpop.f32.mrb[12].mxu1 }
 0x464   : > { %v3350_v37 = vpop.f32.mrb[13].mxu1 }
 0x465   : > { %v3352_v43 = vpop.f32.mrb[14].mxu1  ;;  %v1361_v46 = vmax.f32 %v3348_v41, %v3350_v37 }
 0x466   : > { %v3356_v20 = vpop.f32.mrb[15].mxu1 }
 0x467   : > { %1362 = vmax.xlane.f32.xlu0 %v1361_v46  ;;  %v1364_v50 = vmax.f32 %v3352_v43, %v3356_v20 }
 0x469   : > { %1365 = vmax.xlane.f32.xlu1 %v1364_v50 }
 0x46b   : > { %v3360_v55 = vpop.f32.mrb[16].mxu1 }
 0x46c   : > { %v3362_v57 = vpop.f32.mrb[17].mxu1 }
 0x46d   : > { %v3364_v18 = vpop.f32.mrb[18].mxu1  ;;  %v1367_v21 = vmax.f32 %v3360_v55, %v3362_v57 }
 0x46e   : > { %v3368_v58 = vpop.f32.mrb[19].mxu1 }
 0x46f   : > { %1368 = vmax.xlane.f32.xlu0 %v1367_v21  ;;  %v1370_v60 = vmax.f32 %v3364_v18, %v3368_v58 }
 0x471   : > { %1371 = vmax.xlane.f32.xlu1 %v1370_v60 }
 0x473   : > { %v3372_v44 = vpop.f32.mrb[20].mxu1 }
 0x474   : > { %v3374_v45 = vpop.f32.mrb[21].mxu1 }
 0x475   : > { %v3376_v54 = vpop.f32.mrb[22].mxu1  ;;  %v1373_v1 = vmax.f32 %v3372_v44, %v3374_v45 }
 0x476   : > { %v3380_v2 = vpop.f32.mrb[23].mxu1 }
 0x477   : > { %v1376_v51 = vmax.f32 %v3376_v54, %v3380_v2 }
 0x47b   : > { %v3384_v52 = vpop.f32.mrb[24].mxu1 }
 0x47c   : > { %v3386_v59 = vpop.f32.mrb[25].mxu1 }
 0x47d   : > { %v3388_v14 = vpop.f32.mrb[26].mxu1  ;;  %v1379_v15 = vmax.f32 %v3384_v52, %v3386_v59 }
 0x47e   : > { %v3392_v16 = vpop.f32.mrb[27].mxu1 }
 0x47f   : > { %1380 = vmax.xlane.f32.xlu0 %v1379_v15  ;;  %v1382_v17 = vmax.f32 %v3388_v14, %v3392_v16 }
 0x481   : > { %1383 = vmax.xlane.f32.xlu1 %v1382_v17 }
 0x483   : > { %1374 = vmax.xlane.f32.xlu0 %v1373_v1  ;;  %v3396_v24 = vpop.f32.mrb[28].mxu1 }
 0x484   : > { %v3398_v9 = vpop.f32.mrb[29].mxu1 }
 0x485   : > { %1377 = vmax.xlane.f32.xlu1 %v1376_v51  ;;  %v3400_v6 = vpop.f32.mrb[30].mxu1  ;;  %v1385_v28 = vmax.f32 %v3396_v24, %v3398_v9 }
 0x486   : > { %v3404_v32 = vpop.f32.mrb[31].mxu1 }
 0x487   : > { %1386 = vmax.xlane.f32.xlu0 %v1385_v28  ;;  %v1388_v19 = vmax.f32 %v3400_v6, %v3404_v32 }
 0x489   : > { %1389 = vmax.xlane.f32.xlu1 %v1388_v19 }
 0x4dc   : > { %v1345_v35 = vpop.xlane.xlu0 %1344 }
 0x4dd   : > { %v1391_v36 = vsub.f32 %v3312_v26, %v1345_v35  ;;  %v1392_v39 = vsub.f32 %v3314_v27, %v1345_v35 }
 0x4df   : > { %v1423_v40 = vmul.f32 1.442695, %v1391_v36  ;;  %v1425_v42 = vmul.f32 1.442695, %v1392_v39 }
 0x4e0   : > { %v1348_v38 = vpop.xlane.xlu0 %1347 }
 0x4e1   : > { %2467 = vpow2.f32 %v1423_v40  ;;  %v1393_v46 = vsub.f32 %v3316_v5, %v1348_v38  ;;  %v1394_v50 = vsub.f32 %v3320_v25, %v1348_v38 }
 0x4e2   : > { %2469 = vpow2.f32 %v1425_v42 }
 0x4e3   : > { %v1427_v53 = vmul.f32 1.442695, %v1393_v46  ;;  %v1429_v10 = vmul.f32 1.442695, %v1394_v50 }
 0x4e4   : > { %v1351_v56 = vpop.xlane.xlu1 %1350 }
 0x4e5   : > { %2471 = vpow2.f32 %v1427_v53  ;;  %v1395_v47 = vsub.f32 %v3324_v29, %v1351_v56  ;;  %v1396_v21 = vsub.f32 %v3326_v30, %v1351_v56 }
 0x4e6   : > { %2473 = vpow2.f32 %v1429_v10 }
 0x4e7   : > { %v1431_v26 = vmul.f32 1.442695, %v1395_v47  ;;  %v1433_v27 = vmul.f32 1.442695, %v1396_v21 }
 0x4e8   : > { %v1354_v60 = vpop.xlane.xlu1 %1353 }
 0x4e9   : > { %2475 = vpow2.f32 %v1431_v26  ;;  %v1397_v61 = vsub.f32 %v3328_v31, %v1354_v60  ;;  %v1398_v5 = vsub.f32 %v3332_v33, %v1354_v60 }
 0x4ea   : > { %2477 = vpow2.f32 %v1433_v27 }
 0x4eb   : > { %v2468_v25 = vpop.eup %2467  ;;  %v1435_v22 = vmul.f32 1.442695, %v1397_v61  ;;  %v1437_v1 = vmul.f32 1.442695, %v1398_v5 }
 0x4ec   : > { %v2470_v51 = vpop.eup %2469  ;;  %v1357_v15 = vpop.xlane.xlu0 %1356 }
 0x4ed   : > { %2479 = vpow2.f32 %v1435_v22  ;;  %v1399_v29 = vsub.f32 %v3336_v8, %v1357_v15  ;;  %v1400_v30 = vsub.f32 %v3338_v11, %v1357_v15  ;;  %v1487_v17 = vadd.f32 %v2470_v51, %v2468_v25 }
 0x4ee   : > { %2481 = vpow2.f32 %v1437_v1  ;;  %v1360_v28 = vpop.xlane.xlu1 %1359 }
 0x4ef   : > { %v2472_v19 = vpop.eup %2471  ;;  %v1439_v35 = vmul.f32 1.442695, %v1399_v29  ;;  %v1441_v36 = vmul.f32 1.442695, %v1400_v30  ;;  %v1401_v31 = vsub.f32 %v3340_v34, %v1360_v28  ;;  %v1402_v33 = vsub.f32 %v3344_v12, %v1360_v28  ;;  %1488 = vadd.xlane.f32.xlu0 %v1487_v17 }
 0x4f0   : > { %v2474_v39 = vpop.eup %2473  ;;  %v1535_v40 = vpack.c.bf16 %v2472_v19, %v2468_v25 }
 0x4f1   : > { %2483 = vpow2.f32 %v1439_v35  ;;  %v1443_v42 = vmul.f32 1.442695, %v1401_v31  ;;  %v1445_v38 = vmul.f32 1.442695, %v1402_v33  ;;  %v1536_v46 = vpack.c.bf16 %v2474_v39, %v2470_v51 }
 0x4f2   : > { %2485 = vpow2.f32 %v1441_v36  ;;  %v1490_v8 = vadd.f32 %v2474_v39, %v2472_v19 }
 0x4f3   : > { %v2476_v11 = vpop.eup %2475  ;;  %2487 = vpow2.f32 %v1443_v42  ;;  %1599 = vmatprep.mubr.bf16.mxu0 %v1536_v46 }
 0x4f4   : > { %v2478_v50 = vpop.eup %2477  ;;  %2489 = vpow2.f32 %v1445_v38  ;;  %1491 = vadd.xlane.f32.xlu1 %v1490_v8  ;;  %1600 = vmatmul.mubr.bf16.vlgmr.msra.gmra.mrb[16].mxu0 %v1535_v40  ;;  %v1363_v53 = vpop.xlane.xlu0 %1362 }
 0x4f5   : > { %v1403_v34 = vsub.f32 %v3348_v41, %v1363_v53  ;;  %v1404_v12 = vsub.f32 %v3350_v37, %v1363_v53  ;;  %v1493_v10 = vadd.f32 %v2478_v50, %v2476_v11 }
 0x4f6   : > { %v1366_v56 = vpop.xlane.xlu1 %1365 }
 0x4f7   : > { %v2480_v47 = vpop.eup %2479  ;;  %v1447_v21 = vmul.f32 1.442695, %v1403_v34  ;;  %v1449_v26 = vmul.f32 1.442695, %v1404_v12  ;;  %v1405_v27 = vsub.f32 %v3352_v43, %v1366_v56  ;;  %v1406_v60 = vsub.f32 %v3356_v20, %v1366_v56  ;;  %1494 = vadd.xlane.f32.xlu0 %v1493_v10 }
 0x4f8   : > { %v2482_v61 = vpop.eup %2481  ;;  %v1537_v5 = vpack.c.bf16 %v2480_v47, %v2476_v11 }
 0x4f9   : > { %2491 = vpow2.f32 %v1447_v21  ;;  %v1451_v25 = vmul.f32 1.442695, %v1405_v27  ;;  %v1453_v22 = vmul.f32 1.442695, %v1406_v60  ;;  %v1538_v1 = vpack.c.bf16 %v2482_v61, %v2478_v50 }
 0x4fa   : > { %2493 = vpow2.f32 %v1449_v26  ;;  %v1496_v41 = vadd.f32 %v2482_v61, %v2480_v47 }
 0x4fb   : > { %v2484_v51 = vpop.eup %2483  ;;  %2495 = vpow2.f32 %v1451_v25  ;;  %1607 = vmatprep.mubr.bf16.mxu0 %v1538_v1 }
 0x4fc   : > { %v2486_v37 = vpop.eup %2485  ;;  %2497 = vpow2.f32 %v1453_v22  ;;  %1497 = vadd.xlane.f32.xlu1 %v1496_v41  ;;  %1608 = vmatmul.mubr.bf16.gmra.mrb[20].mxu0 %v1537_v5  ;;  %v1369_v15 = vpop.xlane.xlu0 %1368 }
 0x4fd   : > { %v2488_v43 = vpop.eup %2487  ;;  %v1407_v20 = vsub.f32 %v3360_v55, %v1369_v15  ;;  %v1408_v29 = vsub.f32 %v3362_v57, %v1369_v15  ;;  %v1499_v30 = vadd.f32 %v2486_v37, %v2484_v51 }
 0x4fe   : > { %v2490_v17 = vpop.eup %2489  ;;  %v1372_v28 = vpop.xlane.xlu1 %1371  ;;  %v1539_v19 = vpack.c.bf16 %v2488_v43, %v2484_v51 }
 0x4ff   : > { %v1455_v35 = vmul.f32 1.442695, %v1407_v20  ;;  %v1457_v36 = vmul.f32 1.442695, %v1408_v29  ;;  %v1409_v31 = vsub.f32 %v3364_v18, %v1372_v28  ;;  %v1410_v33 = vsub.f32 %v3368_v58, %v1372_v28  ;;  %1500 = vadd.xlane.f32.xlu0 %v1499_v30 }
 0x500   : > { %v1540_v39 = vpack.c.bf16 %v2490_v17, %v2486_v37  ;;  %v1502_v40 = vadd.f32 %v2490_v17, %v2488_v43 }
 0x501   : > { %2499 = vpow2.f32 %v1455_v35  ;;  %v1459_v42 = vmul.f32 1.442695, %v1409_v31  ;;  %v1461_v38 = vmul.f32 1.442695, %v1410_v33 }
 0x502   : > { %2501 = vpow2.f32 %v1457_v36  ;;  %1615 = vmatprep.mubr.bf16.mxu0 %v1540_v39  ;;  %1503 = vadd.xlane.f32.xlu1 %v1502_v40 }
 0x503   : > { %v2492_v55 = vpop.eup %2491  ;;  %2503 = vpow2.f32 %v1459_v42 }
 0x504   : > { %v2494_v57 = vpop.eup %2493  ;;  %2505 = vpow2.f32 %v1461_v38  ;;  %1616 = vmatmul.mubr.bf16.gmra.mrb[24].mxu0 %v1539_v19 }
 0x505   : > { %v2496_v46 = vpop.eup %2495  ;;  %v1505_v8 = vadd.f32 %v2494_v57, %v2492_v55 }
 0x506   : > { %v2498_v11 = vpop.eup %2497  ;;  %v1541_v18 = vpack.c.bf16 %v2496_v46, %v2492_v55 }
 0x507   : > { %1506 = vadd.xlane.f32.xlu0 %v1505_v8  ;;  %v1542_v58 = vpack.c.bf16 %v2498_v11, %v2494_v57  ;;  %v1508_v50 = vadd.f32 %v2498_v11, %v2496_v46 }
 0x509   : > { %1623 = vmatprep.mubr.bf16.mxu0 %v1542_v58  ;;  %1509 = vadd.xlane.f32.xlu1 %v1508_v50 }
 0x50b   : > { %v2500_v53 = vpop.eup %2499 }
 0x50c   : > { %v2502_v34 = vpop.eup %2501  ;;  %1624 = vmatmul.mubr.bf16.gmra.mrb[28].mxu0 %v1541_v18  ;;  %v1381_v12 = vpop.xlane.xlu0 %1380 }
 0x50d   : > { %v2504_v10 = vpop.eup %2503  ;;  %v1415_v56 = vsub.f32 %v3384_v52, %v1381_v12  ;;  %v1416_v47 = vsub.f32 %v3386_v59, %v1381_v12  ;;  %v1511_v21 = vadd.f32 %v2502_v34, %v2500_v53 }
 0x50e   : > { %v2506_v26 = vpop.eup %2505  ;;  %v1384_v27 = vpop.xlane.xlu1 %1383  ;;  %v1543_v60 = vpack.c.bf16 %v2504_v10, %v2500_v53 }
 0x50f   : > { %v1471_v61 = vmul.f32 1.442695, %v1415_v56  ;;  %v1473_v5 = vmul.f32 1.442695, %v1416_v47  ;;  %v1417_v25 = vsub.f32 %v3388_v14, %v1384_v27  ;;  %v1418_v22 = vsub.f32 %v3392_v16, %v1384_v27  ;;  %1512 = vadd.xlane.f32.xlu0 %v1511_v21 }
 0x510   : > { %v1544_v1 = vpack.c.bf16 %v2506_v26, %v2502_v34  ;;  %v1375_v41 = vpop.xlane.xlu0 %1374  ;;  %v1514_v51 = vadd.f32 %v2506_v26, %v2504_v10 }
 0x511   : > { %2507 = vpow2.f32 %v1471_v61  ;;  %v1475_v37 = vmul.f32 1.442695, %v1417_v25  ;;  %v1477_v15 = vmul.f32 1.442695, %v1418_v22  ;;  %v1411_v52 = vsub.f32 %v3372_v44, %v1375_v41 }
 0x512   : > { %2509 = vpow2.f32 %v1473_v5  ;;  %1631 = vmatprep.mubr.bf16.mxu0 %v1544_v1  ;;  %v1412_v59 = vsub.f32 %v3374_v45, %v1375_v41  ;;  %1515 = vadd.xlane.f32.xlu1 %v1514_v51  ;;  %v1378_v43 = vpop.xlane.xlu1 %1377 }
 0x513   : > { %2511 = vpow2.f32 %v1475_v37  ;;  %v1463_v20 = vmul.f32 1.442695, %v1411_v52  ;;  %v1413_v14 = vsub.f32 %v3376_v54, %v1378_v43  ;;  %v1414_v16 = vsub.f32 %v3380_v2, %v1378_v43 }
 0x514   : > { %2513 = vpow2.f32 %v1477_v15  ;;  %v1465_v29 = vmul.f32 1.442695, %v1412_v59  ;;  %1632 = vmatmul.mubr.bf16.gmra.mrb[32].mxu0 %v1543_v60  ;;  %v1387_v30 = vpop.xlane.xlu0 %1386  ;;  %v3440_v37 = vstv %s1696_s24 }
 0x515   : > { %2515 = vpow2.f32 %v1463_v20  ;;  %v1467_v17 = vmul.f32 1.442695, %v1413_v14  ;;  %v1469_v28 = vmul.f32 1.442695, %v1414_v16  ;;  %v1419_v44 = vsub.f32 %v3396_v24, %v1387_v30 }
 0x516   : > { %2517 = vpow2.f32 %v1465_v29  ;;  %v1420_v45 = vsub.f32 %v3398_v9, %v1387_v30  ;;  %v1390_v19 = vpop.xlane.xlu1 %1389 }
 0x517   : > { %2519 = vpow2.f32 %v1467_v17  ;;  %v1479_v35 = vmul.f32 1.442695, %v1419_v44  ;;  %v1421_v36 = vsub.f32 %v3400_v6, %v1390_v19  ;;  %v1422_v54 = vsub.f32 %v3404_v32, %v1390_v19 }
 0x518   : > { %2521 = vpow2.f32 %v1469_v28  ;;  %v1481_v2 = vmul.f32 1.442695, %v1420_v45 }
 0x519   : > { %2523 = vpow2.f32 %v1479_v35  ;;  %v1483_v31 = vmul.f32 1.442695, %v1421_v36  ;;  %v1485_v33 = vmul.f32 1.442695, %v1422_v54 }
 0x51a   : > { %2525 = vpow2.f32 %v1481_v2 }
 0x51b   : > { %v2508_v39 = vpop.eup %2507  ;;  %2527 = vpow2.f32 %v1483_v31 }
 0x51c   : > { %v2510_v40 = vpop.eup %2509  ;;  %2529 = vpow2.f32 %v1485_v33 }
 0x51d   : > { %v2512_v24 = vpop.eup %2511  ;;  %v1523_v42 = vadd.f32 %v2510_v40, %v2508_v39 }
 0x51e   : > { %v2514_v9 = vpop.eup %2513  ;;  %v1547_v38 = vpack.c.bf16 %v2512_v24, %v2508_v39 }
 0x51f   : > { %v2516_v55 = vpop.eup %2515  ;;  %v1548_v57 = vpack.c.bf16 %v2514_v9, %v2510_v40  ;;  %v1526_v46 = vadd.f32 %v2514_v9, %v2512_v24 }
 0x520   : > { %v2518_v6 = vpop.eup %2517 }
 0x521   : > { %v2520_v8 = vpop.eup %2519  ;;  %1647 = vmatprep.mubr.bf16.mxu1 %v1548_v57  ;;  %v1517_v32 = vadd.f32 %v2518_v6, %v2516_v55 }
 0x522   : > { %v2522_v11 = vpop.eup %2521  ;;  %1648 = vmatmul.mubr.bf16.vlgmr.msra.gmra.mrb[32].mxu1 %v1547_v38  ;;  %v1545_v18 = vpack.c.bf16 %v2520_v8, %v2516_v55 }
 0x523   : > { %v2524_v58 = vpop.eup %2523  ;;  %1518 = vadd.xlane.f32.xlu0 %v1517_v32  ;;  %v1546_v50 = vpack.c.bf16 %v2522_v11, %v2518_v6  ;;  %v1520_v53 = vadd.f32 %v2522_v11, %v2520_v8 }
 0x524   : > { %v2526_v34 = vpop.eup %2525 }
 0x525   : > { %v2528_v12 = vpop.eup %2527  ;;  %1639 = vmatprep.mubr.bf16.mxu0 %v1546_v50  ;;  %1521 = vadd.xlane.f32.xlu1 %v1520_v53  ;;  %v1529_v10 = vadd.f32 %v2526_v34, %v2524_v58 }
 0x526   : > { %v2530_v56 = vpop.eup %2529  ;;  %1640 = vmatmul.mubr.bf16.gmra.mrb[36].mxu0 %v1545_v18  ;;  %v1549_v47 = vpack.c.bf16 %v2528_v12, %v2524_v58 }
 0x527   : > { %1524 = vadd.xlane.f32.xlu0 %v1523_v42  ;;  %v1550_v21 = vpack.c.bf16 %v2530_v56, %v2526_v34  ;;  %v1532_v26 = vadd.f32 %v2530_v56, %v2528_v12 }
 0x529   : > { %1527 = vadd.xlane.f32.xlu1 %v1526_v46  ;;  %1655 = vmatprep.mubr.bf16.mxu1 %v1550_v21 }
 0x52a   : > { %1656 = vmatmul.mubr.bf16.gmra.mrb[36].mxu1 %v1549_v47 }
 0x52b   : > { %1530 = vadd.xlane.f32.xlu0 %v1529_v10 }
 0x52d   : > { %1533 = vadd.xlane.f32.xlu1 %v1532_v26 }
 0x57c   : > { %v1489_v27 = vpop.xlane.xlu0 %1488 }
 0x57d   : > { %2531 = vrcp.f32 %v1489_v27 }
 0x581   : > { %v1492_v60 = vpop.xlane.xlu1 %1491 }
 0x582   : > { %2533 = vrcp.f32 %v1492_v60 }
 0x584   : > { %v1495_v61 = vpop.xlane.xlu0 %1494 }
 0x585   : > { %2535 = vrcp.f32 %v1495_v61 }
 0x587   : > { %v2532_v51 = vpop.eup %2531 }
 0x589   : > { %v1498_v5 = vpop.xlane.xlu1 %1497 }
 0x58a   : > { %2537 = vrcp.f32 %v1498_v5 }
 0x58c   : > { %v2534_v43 = vpop.eup %2533  ;;  %v1501_v20 = vpop.xlane.xlu0 %1500 }
 0x58d   : > { %2539 = vrcp.f32 %v1501_v20 }
 0x58f   : > { %v1504_v29 = vpop.xlane.xlu1 %1503  ;;  %v2536_v36 = vpop.eup %2535 }
 0x590   : > { %2541 = vrcp.f32 %v1504_v29 }
 0x594   : > { %v2538_v33 = vpop.eup %2537  ;;  %v1507_v39 = vpop.xlane.xlu0 %1506 }
 0x595   : > { %2543 = vrcp.f32 %v1507_v39 }
 0x596   : > { %v1510_v24 = vpop.xlane.xlu1 %1509 }
 0x597   : > { %v2540_v6 = vpop.eup %2539  ;;  %2545 = vrcp.f32 %v1510_v24 }
 0x59a   : > { %v2542_v18 = vpop.eup %2541 }
 0x59c   : > { %v1513_v58 = vpop.xlane.xlu0 %1512 }
 0x59d   : > { %2547 = vrcp.f32 %v1513_v58 }
 0x59f   : > { %v1516_v53 = vpop.xlane.xlu1 %1515  ;;  %v2544_v26 = vpop.eup %2543 }
 0x5a0   : > { %2549 = vrcp.f32 %v1516_v53  ;;  %v2564_v53 = vld [vmem:[%s3261_s10 + $0x68] sm:$0xff] }
 0x5a1   : > { %v2546_v5 = vpop.eup %2545 }
 0x5a7   : > { %v2548_v20 = vpop.eup %2547 }
 0x5c7   : > { %v2000_v25 = vpop.f32.mrb[16].mxu0 }
 0x5c8   : > { %v2001_v22 = vpop.f32.mrb[17].mxu0 }
 0x5c9   : > { %v2002_v1 = vadd.f32 %v2001_v22, %v2000_v25  ;;  %v2003_v41 = vpop.f32.mrb[18].mxu0 }
 0x5ca   : > { %v2004_v15 = vpop.f32.mrb[19].mxu0 }
 0x5cb   : > { %v1680_v52 = vmul.f32 %v2532_v51, %v2002_v1  ;;  %v2005_v59 = vadd.f32 %v2004_v15, %v2003_v41  ;;  %v1522_v1 = vpop.xlane.xlu1 %1521 }
 0x5cd   : > { %v1698_v14 = vmul.f32 %v3440_v37, %v1680_v52  ;;  %v1681_v16 = vmul.f32 %v2534_v43, %v2005_v59 }
 0x5cf   : > { %v1714_v30 = vadd.f32 %v1698_v14, %v3264_v48  ;;  %v1699_v17 = vmul.f32 %v3440_v37, %v1681_v16  ;;  %v2006_v28 = vpop.f32.mrb[20].mxu0 }
 0x5d0   : > { %v2007_v44 = vpop.f32.mrb[21].mxu0 }
 0x5d1   : > { %1730 = vst [vmem:[%s3105_s21] sm:$0xff] %v1714_v30  ;;  %v1715_v45 = vadd.f32 %v1699_v17, %v3267_v49  ;;  %v2008_v19 = vadd.f32 %v2007_v44, %v2006_v28  ;;  %v2009_v35 = vpop.f32.mrb[22].mxu0  ;;  %v2550_v17 = vpop.eup %2549 }
 0x5d2   : > { %v2010_v54 = vpop.f32.mrb[23].mxu0  ;;  %v1528_v28 = vpop.xlane.xlu1 %1527 }
 0x5d3   : > { %1731 = vst [vmem:[%s3105_s21 + $0x8] sm:$0xff] %v1715_v45  ;;  %v1682_v2 = vmul.f32 %v2536_v36, %v2008_v19  ;;  %v2011_v31 = vadd.f32 %v2010_v54, %v2009_v35 }
 0x5d5   : > { %v1700_v48 = vmul.f32 %v3440_v37, %v1682_v2  ;;  %v1683_v40 = vmul.f32 %v2538_v33, %v2011_v31 }
 0x5d6   : > { %v1534_v36 = vpop.xlane.xlu1 %1533 }
 0x5d7   : > { %v1716_v42 = vadd.f32 %v1700_v48, %v3272_v23  ;;  %v1701_v49 = vmul.f32 %v3440_v37, %v1683_v40  ;;  %v2012_v9 = vpop.f32.mrb[24].mxu0 }
 0x5d8   : > { %v2013_v38 = vpop.f32.mrb[25].mxu0 }
 0x5d9   : > { %1732 = vst [vmem:[%s3105_s21 + $0x10] sm:$0xff] %v1716_v42  ;;  %v1717_v55 = vadd.f32 %v1701_v49, %v3275_v62  ;;  %v2014_v57 = vadd.f32 %v2013_v38, %v2012_v9  ;;  %v2015_v46 = vpop.f32.mrb[26].mxu0 }
 0x5da   : > { %v2016_v8 = vpop.f32.mrb[27].mxu0 }
 0x5db   : > { %1733 = vst [vmem:[%s3105_s21 + $0x18] sm:$0xff] %v1717_v55  ;;  %v1684_v32 = vmul.f32 %v2540_v6, %v2014_v57  ;;  %v2017_v11 = vadd.f32 %v2016_v8, %v2015_v46  ;;  %v2563_v6 = vld [vmem:[%s3261_s10 + $0x60] sm:$0xff] }
 0x5dd   : > { %v1702_v23 = vmul.f32 %v3440_v37, %v1684_v32  ;;  %v1685_v50 = vmul.f32 %v2542_v18, %v2017_v11 }
 0x5df   : > { %v1718_v34 = vadd.f32 %v1702_v23, %v3278_v63  ;;  %v1703_v62 = vmul.f32 %v3440_v37, %v1685_v50  ;;  %v2018_v12 = vpop.f32.mrb[28].mxu0  ;;  %v1519_v63 = vpop.xlane.xlu0 %1518 }
 0x5e0   : > { %v2019_v10 = vpop.f32.mrb[29].mxu0 }
 0x5e1   : > { %1734 = vst [vmem:[%s3105_s21 + $0x20] sm:$0xff] %v1718_v34  ;;  %v1719_v56 = vadd.f32 %v1703_v62, %v3281_v0  ;;  %v2020_v47 = vadd.f32 %v2019_v10, %v2018_v12  ;;  %v2021_v21 = vpop.f32.mrb[30].mxu0 }
 0x5e2   : > { %v2022_v27 = vpop.f32.mrb[31].mxu0 }
 0x5e3   : > { %1735 = vst [vmem:[%s3105_s21 + $0x28] sm:$0xff] %v1719_v56  ;;  %v1686_v60 = vmul.f32 %v2544_v26, %v2020_v47  ;;  %v2023_v61 = vadd.f32 %v2022_v27, %v2021_v21  ;;  %v1525_v16 = vpop.xlane.xlu0 %1524  ;;  %v2565_v26 = vld [vmem:[%s3261_s10 + $0x50] sm:$0xff] }
 0x5e4   : > { %2551 = vrcp.f32 %v1525_v16 }
 0x5e5   : > { %v1704_v25 = vmul.f32 %v3440_v37, %v1686_v60  ;;  %v1687_v22 = vmul.f32 %v2546_v5, %v2023_v61  ;;  %2553 = vrcp.f32 %v1528_v28 }
 0x5e6   : > { %2555 = vrcp.f32 %v1519_v63 }
 0x5e7   : > { %v1720_v41 = vadd.f32 %v1704_v25, %v3288_v3  ;;  %v1705_v0 = vmul.f32 %v3440_v37, %v1687_v22  ;;  %v2024_v51 = vpop.f32.mrb[32].mxu0  ;;  %v1531_v35 = vpop.xlane.xlu0 %1530  ;;  %2557 = vrcp.f32 %v1522_v1  ;;  %v2566_v25 = vld [vmem:[%s3261_s10 + $0x58] sm:$0xff] }
 0x5e8   : > { %v2025_v15 = vpop.f32.mrb[33].mxu0  ;;  %2559 = vrcp.f32 %v1531_v35 }
 0x5e9   : > { %1736 = vst [vmem:[%s3105_s21 + $0x30] sm:$0xff] %v1720_v41  ;;  %v1721_v52 = vadd.f32 %v1705_v0, %v3291_v4  ;;  %v2026_v59 = vadd.f32 %v2025_v15, %v2024_v51  ;;  %v2027_v43 = vpop.f32.mrb[34].mxu0  ;;  %2561 = vrcp.f32 %v1534_v36  ;;  %v2567_v0 = vld [vmem:[%s3261_s10 + $0x70] sm:$0xff] }
 0x5ea   : > { %v2028_v14 = vpop.f32.mrb[35].mxu0 }
 0x5eb   : > { %1737 = vst [vmem:[%s3105_s21 + $0x38] sm:$0xff] %v1721_v52  ;;  %v1688_v29 = vmul.f32 %v2548_v20, %v2026_v59  ;;  %v2029_v30 = vadd.f32 %v2028_v14, %v2027_v43  ;;  %v2568_v52 = vld [vmem:[%s3261_s10 + $0x78] sm:$0xff] }
 0x5ed   : > { %v1706_v3 = vmul.f32 %v3440_v37, %v1688_v29  ;;  %v1689_v44 = vmul.f32 %v2550_v17, %v2029_v30 }
 0x5ee   : > { %v2552_v39 = vpop.eup %2551 }
 0x5ef   : > { %v1722_v45 = vadd.f32 %v1706_v3, %v3294_v7  ;;  %v1707_v4 = vmul.f32 %v3440_v37, %v1689_v44 }
 0x5f1   : > { %1738 = vst [vmem:[%s3105_s21 + $0x40] sm:$0xff] %v1722_v45  ;;  %v1723_v19 = vadd.f32 %v1707_v4, %v3297_v13  ;;  %v2554_v13 = vpop.eup %2553 }
 0x5f2   : > { %v2556_v57 = vpop.eup %2555 }
 0x5f3   : > { %1739 = vst [vmem:[%s3105_s21 + $0x48] sm:$0xff] %v1723_v19  ;;  %v2558_v23 = vpop.eup %2557 }
 0x5f4   : > { %v2560_v47 = vpop.eup %2559 }
 0x5f5   : > { %v2036_v54 = vpop.f32.mrb[32].mxu1  ;;  %v2562_v63 = vpop.eup %2561 }
 0x5f6   : > { %v2037_v2 = vpop.f32.mrb[33].mxu1 }
 0x5f7   : > { %v2038_v31 = vadd.f32 %v2037_v2, %v2036_v54  ;;  %v2039_v33 = vpop.f32.mrb[34].mxu1 }
 0x5f8   : > { %v2040_v7 = vpop.f32.mrb[35].mxu1 }
 0x5f9   : > { %v1692_v48 = vmul.f32 %v2552_v39, %v2038_v31  ;;  %v2041_v40 = vadd.f32 %v2040_v7, %v2039_v33  ;;  %v2030_v24 = vpop.f32.mrb[36].mxu0 }
 0x5fa   : > { %v2031_v42 = vpop.f32.mrb[37].mxu0 }
 0x5fb   : > { %v1710_v49 = vmul.f32 %v3440_v37, %v1692_v48  ;;  %v1693_v9 = vmul.f32 %v2554_v13, %v2041_v40  ;;  %v2032_v38 = vadd.f32 %v2031_v42, %v2030_v24  ;;  %v2033_v55 = vpop.f32.mrb[38].mxu0 }
 0x5fc   : > { %v2034_v46 = vpop.f32.mrb[39].mxu0 }
 0x5fd   : > { %v1726_v8 = vadd.f32 %v2563_v6, %v1710_v49  ;;  %v1711_v32 = vmul.f32 %v3440_v37, %v1693_v9  ;;  %v1690_v11 = vmul.f32 %v2556_v57, %v2032_v38  ;;  %v2035_v18 = vadd.f32 %v2034_v46, %v2033_v55  ;;  %v2042_v58 = vpop.f32.mrb[36].mxu1 }
 0x5fe   : > { %v2043_v50 = vpop.f32.mrb[37].mxu1 }
 0x5ff   : > { %1742 = vst [vmem:[%s3105_s21 + $0x60] sm:$0xff] %v1726_v8  ;;  %v1727_v34 = vadd.f32 %v2564_v53, %v1711_v32  ;;  %v1708_v62 = vmul.f32 %v3440_v37, %v1690_v11  ;;  %v1691_v12 = vmul.f32 %v2558_v23, %v2035_v18  ;;  %v2044_v10 = vadd.f32 %v2043_v50, %v2042_v58  ;;  %v2045_v56 = vpop.f32.mrb[38].mxu1 }
 0x600   : > { %v2046_v21 = vpop.f32.mrb[39].mxu1 }
 0x601   : > { %1743 = vst [vmem:[%s3105_s21 + $0x68] sm:$0xff] %v1727_v34  ;;  %v1724_v27 = vadd.f32 %v2565_v26, %v1708_v62  ;;  %v1709_v60 = vmul.f32 %v3440_v37, %v1691_v12  ;;  %v1694_v61 = vmul.f32 %v2560_v47, %v2044_v10  ;;  %v2047_v5 = vadd.f32 %v2046_v21, %v2045_v56 }
 0x603   : > { %1740 = vst [vmem:[%s3105_s21 + $0x50] sm:$0xff] %v1724_v27  ;;  %v1725_v22 = vadd.f32 %v2566_v25, %v1709_v60  ;;  %v1712_v1 = vmul.f32 %v3440_v37, %v1694_v61  ;;  %v1695_v41 = vmul.f32 %v2562_v63, %v2047_v5 }
 0x605   : > { %1741 = vst [vmem:[%s3105_s21 + $0x58] sm:$0xff] %v1725_v22  ;;  %v1728_v51 = vadd.f32 %v2567_v0, %v1712_v1  ;;  %v1713_v15 = vmul.f32 %v3440_v37, %v1695_v41 }
 0x607   : > { %1744 = vst [vmem:[%s3105_s21 + $0x70] sm:$0xff] %v1728_v51  ;;  %v1729_v59 = vadd.f32 %v2568_v52, %v1713_v15 }
 0x609   : > { %1745 = vst [vmem:[%s3105_s21 + $0x78] sm:$0xff] %v1729_v59 }
 0x60a   : > { %2696 = shalt.err (!%p2693_p2)
}
 0x60b   : > { %s2697_s14 = scalar_lea.hbm %s3493_s27, 2048  ;;  %s2701_s28 = scalar_lea.hbm %s3571_s8, 8192 }
 0x60c   : > { %p2698_p12 = scmp.ne.s32.totalorder %s3493_s27, %s2697_s14  ;;  %p2702_p9 = scmp.lt.u32.totalorder %s3493_s27, %s3571_s8 }
 0x60d   : > { %p2703_p7 = scmp.lt.u32.totalorder %s2701_s28, %s2697_s14  ;;  %p2705_p1 = scmp.lt.u32.totalorder %s2697_s14, %s3493_s27 }
 0x60e   : > { %p2699_p5 = pnand %p2698_p12, %p3630_p3 }
 0x60f   : > { %p2704_p8 = por %p2703_p7, %p2702_p9 }
 0x610   : > { %p2700_p6 = pneg %p2699_p5 }
 0x611   : > { %p2706_p10 = por %p2705_p1, %p2704_p8 }
 0x613   : > { %p2707_p11 = pnand %p2706_p10, %p2700_p6 }
 0x615   : > { %2710 = shalt.err (!%p2707_p11)
}
 0x616   : > { %s2825_s10 = smov 128   ;;  %s2826_s1 = smov 8  }
 0x617   : > { %2206 = dma.vmem_to_hbm [thread:$0]  (%p3630_p3), %s3495_s7, 2048, %s3493_s27, %s3502_s20, %s2825_s10, %s2825_s10, %s2826_s1  }
 0x618 PF: > { %s3631_s16 = sld [smem:[#allocation24_spill]]  ;;  %s3632_s24 = sld [smem:[#allocation18_spill]] }
 0x619   : > { %s3633_s15 = sld [smem:[#allocation27_spill]] }
 0x61e   : > { %p2231_p13 = scmp.ge.s32.totalorder %s3631_s16, 2  ;;  %s1777_s11 = sand.u32 1, %s3632_s24  }
 0x61f   : > { %p3634_p0 = scmp.ne.s32.totalorder %s3633_s15, 0  ;;  %s1778_s25 = scalar_lea.sflag [#allocation7], %s1777_s11 }
 0x621   : > { %p2222_p4 = pnand %p2231_p13, %p3634_p0 }
 0x623   : > { %2768 = dma.done.wait (!%p2222_p4), %s1778_s25, 2048  }
 0x624   : > { %2770 = vsyncadd (!%p2222_p4), %s1778_s25, 4294965248  ;;  %s25_s16 = sadd.s32 1, %s3631_s16   ;;  %s3635_s13 = sld [smem:[#allocation19_spill]] }
 0x625   : > { %p22_p2 = scmp.ge.s32.totalorder %s25_s16, 6   ;;  %s3636_s9 = sld [smem:[#allocation29_spill]] }
 0x626   : > { %s3637_s10 = sld [smem:[#allocation20_spill]]  ;;  %s3638_s11 = sld [smem:[#allocation21_spill]] }
 0x627   : > { %s3639_s12 = sld [smem:[#allocation28_spill]]  ;;  %s3640_s26 = sld [smem:[#allocation22_spill]] }
 0x628   : > { %s3641_s7 = sld [smem:[#allocation23_spill]]  ;;  %s3642_s14 = sld [smem:[#allocation25_spill]] }
 0x629   : > { %s3643_s15 = sld [smem:[#allocation26_spill]]  ;;  %s3644_s29 = smov %s2777_s30 }
 0x62a   : > { %s3645_s30 = smov %s3635_s13  ;;  %24 = sbr.rel (!%p22_p2) target bundleno = 14 (0xe), region = 107 }
 0x62d   : > { %s3646_s13 = smov %s3640_s26 }
 0x631   :  { %1783 = vsyncpa [#allocation6], 1 }
 0x632   :  { %1785 = vsyncpa [#allocation6 + $0x1], 1 }
 0x633   :  { %1786 = vsyncpa [#allocation9], 1 }
 0x634   :  { %1787 = vsyncpa [#allocation12], 1 }
 0x635   :  { %1788 = vsyncpa [#allocation7], 1 }
 0x636   :  { %1790 = vsyncpa [#allocation7 + $0x1], 1 }

// kernel: tpu_custom_call.1
= control target key start
LH: loop header
LB: loop body
LE: loop exit
PB: predicated region body
PF: predicated region fallthrough
CT: control target
= control target key end

     0   :  { %s3668_s0 = inlined_call_operand.hbm [shape: f32[2,256,128], index: 0, kind: input, shape index: {}]   ;;  %s3669_s1 = inlined_call_operand.hbm [shape: bf16[128,128], index: 1, kind: input, shape index: {}]   ;;  %s3670_s2 = inlined_call_operand.vmem [shape: f32[1,128], index: 2, kind: input, shape index: {}]   ;;  %s3671_s3 = inlined_call_operand.hbm [shape: bf16[128,128], index: 3, kind: input, shape index: {}]   ;;  %s3672_s4 = inlined_call_operand.vmem [shape: f32[1,128], index: 4, kind: input, shape index: {}]   ;;  %s3673_s5 = inlined_call_operand.hbm [shape: bf16[128,128], index: 5, kind: input, shape index: {}]   ;;  %s3674_s6 = inlined_call_operand.vmem [shape: f32[1,128], index: 6, kind: input, shape index: {}]   ;;  %s3675_s7 = inlined_call_operand.<no memory space> [shape: f32[1], index: 7, kind: input, shape index: {}]   ;;  %s3676_s8 = inlined_call_operand.hbm [shape: f32[2,256,128], index: 8, kind: output, shape index: {}]  }
   0x1   :  { %3687 = sst [smem:[#allocation22_spill]] %s3669_s1 }
   0x2   :  { %3688 = sst [smem:[#allocation23_spill]] %s3670_s2 }
   0x3   :  { %3689 = sst [smem:[#allocation24_spill]] %s3671_s3 }
   0x4   :  { %3690 = sst [smem:[#allocation25_spill]] %s3672_s4 }
   0x5   :  { %3691 = sst [smem:[#allocation26_spill]] %s3674_s6 }
   0x6   :  { %3692 = sst [smem:[#allocation27_spill]] %s3676_s8 }
   0x7   :  { %13 = sst [smem:[#allocation4]] %s3675_s7 }
   0x8   :  { %14 = vsyncpa [#allocation6], 0 }
   0x9   :  { %16 = vsyncpa [#allocation6 + $0x1], 0 }
   0xa   :  { %17 = vsyncpa [#allocation9], 0 }
   0xb   :  { %18 = vsyncpa [#allocation12], 0 }
   0xc   :  { %19 = vsyncpa [#allocation7], 0 }
   0xd   :  { %21 = vsyncpa [#allocation7 + $0x1], 0  ;;  %s2905_s29 = smov 0   ;;  %s2907_s30 = smov 0  }
   0xe   :  { %s2909_s9 = smov 0   ;;  %s2911_s10 = smov 0  }
   0xf   :  { %s2913_s11 = smov 0   ;;  %s2915_s12 = smov 0  }
  0x10   :  { %s2917_s13 = smov 0   ;;  %s2919_s7 = smov 0  }
  0x11   :  { %s2921_s14 = smov 0   ;;  %s2923_s15 = smov 0  }
  0x12   :  { %s2925_s16 = smov 0  }
  0x13 LB: > { %3693 = sst [smem:[#allocation18_spill]] %s2803_s29  ;;  %s1897_s17 = sadd.s32 4294967295, %s2843_s16   ;;  %s2843_s16 = sphi %s2925_s16, %s27_s16   ;;  %s2839_s15 = sphi %s2923_s15, %s3731_s15   ;;  %s2835_s14 = sphi %s2921_s14, %s3730_s14   ;;  %s2831_s7 = sphi %s2919_s7, %s3729_s7   ;;  %s2827_s13 = sphi %s2917_s13, %s3728_s13   ;;  %s2823_s12 = sphi %s2915_s12, %s3727_s12   ;;  %s2819_s11 = sphi %s2913_s11, %s3726_s11   ;;  %s2815_s10 = sphi %s2911_s10, %s3725_s10   ;;  %s2811_s9 = sphi %s2909_s9, %s3724_s9   ;;  %s2807_s30 = sphi %s2907_s30, %s3723_s30   ;;  %s2803_s29 = sphi %s2905_s29, %s3722_s29  }
  0x14   : > { %3694 = sst [smem:[#allocation19_spill]] %s2831_s7  ;;  %s1898_s18 = sadd.s32 4294967294, %s2843_s16  }
  0x15   : > { %p59_p0 = scmp.ne.s32.totalorder %s2819_s11, %s2815_s10  ;;  %p2961_p1 = scmp.eq.s32.totalorder %s1897_s17, 0 }
  0x16   : > { %p231_p2 = scmp.ne.s32.totalorder %s2811_s9, %s2807_s30  ;;  %p232_p4 = scmp.eq.s32.totalorder %s1897_s17, 3 }
  0x17   : > { %s3695_s19 = scalar_select %p2961_p1, 1, 0 }
  0x18   : > { %p2970_p3 = por %p2961_p1, %p59_p0  ;;  %p237_p5 = scmp.ne.s32.totalorder %s2807_s30, %s2803_s29 }
  0x19   : > { %p238_p6 = scmp.eq.s32.totalorder %s1898_s18, 3  ;;  %p2976_p7 = por %p232_p4, %p231_p2 }
  0x1a   : > { %s3696_s21 = scalar_select %p2970_p3, 1, 0 }
  0x1b   : > { %s3697_s22 = scalar_select %p2976_p7, 1, 0 }
  0x1c   : > { %p1899_p8 = scmp.ge.s32.totalorder %s2843_s16, 1  ;;  %p2981_p9 = por %p238_p6, %p237_p5 }
  0x1d   : > { %3698 = sst [smem:[#allocation20_spill]] %s3697_s22  ;;  %p245_p10 = scmp.lt.s32.totalorder %s2843_s16, 5 }
  0x1e   : > { %s3699_s23 = scalar_select %p2981_p9, 1, 0 }
  0x1f   : > { %p2986_p11 = pnand %p1899_p8, %p245_p10  ;;  %s2845_s25 = smov [#allocation8]  }
  0x20   : > { %3700 = sst [smem:[#allocation21_spill]] %s3699_s23  ;;  %s257_s26 = sshll.u32 %s2845_s25, 4  ;;  %s2990_s26 = int_to_ptr.vmem [resolvable:$true] %s257_s26 }
  0x21   : > { %s3701_s24 = scalar_select %p2986_p11, 1, 0 }
  0x22   : > { %p2237_p12 = pneg %p2986_p11  ;;  %s2846_s28 = smov [#allocation10]  }
  0x23   : > { %s273_s10 = sshll.u32 %s2846_s28, 4  ;;  %s2847_s17 = smov [#allocation11]   ;;  %s3000_s10 = int_to_ptr.vmem [resolvable:$true] %s273_s10 }
  0x24   : > { %p2996_p13 = pnand %p2237_p12, %p2961_p1  ;;  %s3002_s18 = sshll.u32 %s2847_s17, 4  ;;  %s290_s18 = int_to_ptr.vmem [resolvable:$true] %s3002_s18 }
  0x25   : > { %s3703_s1 = sld [smem:[#allocation22_spill]] }
  0x26   : > { %p3012_p2 = pneg %p2996_p13 }
  0x2b   : > { %s2599_s25 = scalar_lea.hbm %s3703_s1, 1024 }
  0x2c   : > { %p2600_p0 = scmp.ne.s32.totalorder %s3703_s1, %s2599_s25  ;;  %p2606_p6 = scmp.lt.u32.totalorder %s2599_s25, %s3703_s1 }
  0x2e   : > { %p2602_p4 = pnand %p3012_p2, %p2600_p0 }
  0x30   : > { %p2603_p5 = pneg %p2602_p4 }
  0x32   : > { %p2608_p8 = pnand %p2606_p6, %p2603_p5 }
  0x34   : > { %2611 = shalt.err (!%p2608_p8)
}
  0x35   : > { %s2612_s8 = scalar_lea.vmem %s2990_s26, 1024  ;;  %p2620_p7 = scmp.lt.s32.totalorder %s2990_s26, %s2990_s26 }
  0x36   : > { %p2613_p10 = scmp.ne.s32.totalorder %s2990_s26, %s2612_s8  ;;  %p2621_p1 = scmp.lt.s32.totalorder %s2612_s8, %s2612_s8 }
  0x38   : > { %p2615_p12 = pnand %p2613_p10, %p3012_p2  ;;  %p2622_p0 = por %p2621_p1, %p2620_p7 }
  0x3a   : > { %p2616_p9 = pneg %p2615_p12 }
  0x3c   : > { %p2623_p4 = pnand %p2622_p0, %p2616_p9 }
  0x3e   : > { %2626 = shalt.err (!%p2623_p4)
}
  0x3f   : > { %s2848_s29 = smov 64   ;;  %s2849_s20 = smov 4  }
  0x40   : > { %2240 = dma.hbm_to_vmem [thread:$0]  (!%p2996_p13), %s3703_s1, 1024, %s2990_s26, [#allocation9], %s2848_s29, %s2848_s29, %s2849_s20  }
  0x41   : > { %s3705_s3 = sld [smem:[#allocation24_spill]] }
  0x47   : > { %s2627_s8 = scalar_lea.hbm %s3705_s3, 1024 }
  0x48   : > { %p2628_p1 = scmp.ne.s32.totalorder %s3705_s3, %s2627_s8  ;;  %p2634_p5 = scmp.lt.u32.totalorder %s2627_s8, %s3705_s3 }
  0x4a   : > { %p2630_p7 = pnand %p2628_p1, %p3012_p2 }
  0x4c   : > { %p2631_p9 = pneg %p2630_p7 }
  0x4e   : > { %p2636_p6 = pnand %p2634_p5, %p2631_p9 }
  0x50   : > { %2639 = shalt.err (!%p2636_p6)
}
  0x51   : > { %s2640_s26 = scalar_lea.vmem %s3000_s10, 1024  ;;  %p2648_p0 = scmp.lt.s32.totalorder %s3000_s10, %s3000_s10 }
  0x52   : > { %p2641_p8 = scmp.ne.s32.totalorder %s3000_s10, %s2640_s26  ;;  %p2649_p4 = scmp.lt.s32.totalorder %s2640_s26, %s2640_s26 }
  0x54   : > { %p2643_p10 = pnand %p2641_p8, %p3012_p2  ;;  %p2650_p1 = por %p2649_p4, %p2648_p0 }
  0x56   : > { %p2644_p12 = pneg %p2643_p10 }
  0x58   : > { %p2651_p7 = pnand %p2650_p1, %p2644_p12 }
  0x5a   : > { %2654 = shalt.err (!%p2651_p7)
}
  0x5b   : > { %2243 = dma.hbm_to_vmem [thread:$0]  (!%p2996_p13), %s3705_s3, 1024, %s3000_s10, [#allocation9], %s2848_s29, %s2848_s29, %s2849_s20  }
  0x5c   : > { %s2655_s23 = scalar_lea.hbm %s3673_s5, 1024 }
  0x5d   : > { %p2656_p9 = scmp.ne.s32.totalorder %s3673_s5, %s2655_s23  ;;  %p2662_p8 = scmp.lt.u32.totalorder %s2655_s23, %s3673_s5 }
  0x5f   : > { %p2658_p5 = pnand %p2656_p9, %p3012_p2 }
  0x61   : > { %p2659_p6 = pneg %p2658_p5 }
  0x63   : > { %p2664_p10 = pnand %p2662_p8, %p2659_p6 }
  0x65   : > { %2667 = shalt.err (!%p2664_p10)
}
  0x66   : > { %s2668_s26 = scalar_lea.vmem %s290_s18, 1024  ;;  %p2676_p1 = scmp.lt.s32.totalorder %s290_s18, %s290_s18 }
  0x67   : > { %p2669_p12 = scmp.ne.s32.totalorder %s290_s18, %s2668_s26  ;;  %p2677_p7 = scmp.lt.s32.totalorder %s2668_s26, %s2668_s26 }
  0x69   : > { %p2671_p0 = pnand %p2669_p12, %p3012_p2  ;;  %p2678_p3 = por %p2677_p7, %p2676_p1 }
  0x6b   : > { %p2672_p4 = pneg %p2671_p0 }
  0x6d   : > { %p2679_p11 = pnand %p2678_p3, %p2672_p4 }
  0x6f   : > { %2682 = shalt.err (!%p2679_p11)
}
  0x70   : > { %2246 = dma.hbm_to_vmem [thread:$0]  (!%p2996_p13), %s3673_s5, 1024, %s290_s18, [#allocation12], %s2848_s29, %s2848_s29, %s2849_s20  }
  0x71   : > { %s36_s22 = sadd.s32 1, %s2835_s14  ;;  %s39_s27 = sadd.s32 1, %s2839_s15 }
  0x72   : > { %p37_p3 = scmp.ge.s32.totalorder %s36_s22, 2  ;;  %s46_s4 = sadd.s32 1, %s2823_s12 }
  0x73   : > { %p53_p11 = scmp.ne.s32.totalorder %s2823_s12, %s2819_s11  ;;  %p54_p2 = scmp.eq.s32.totalorder %s2843_s16, 0 }
  0x74   : > { %s3733_s22 = smov (%p37_p3, %s36_s22), 0  ;;  %s3735_s27 = smov (!%p37_p3, %s39_s27), %s2839_s15 }
  0x75   : > { %s217_s6 = ssub.s32 %s2835_s14, %s3733_s22  ;;  %p41_p9 = scmp.ge.s32.totalorder %s3735_s27, 2 }
  0x76   : > { %p2258_p5 = scmp.lt.s32.totalorder %s2843_s16, 4  ;;  %p3096_p13 = por %p54_p2, %p53_p11 }
  0x77   : > { %s309_s29 = sand.u32 1, %s2823_s12   ;;  %s3737_s27 = smov (%p41_p9, %s3735_s27), 0 }
  0x78   : > { %s1904_s20 = sshll.u32 %s309_s29, 8  ;;  %s43_s7 = ssub.s32 %s2839_s15, %s3737_s27 }
  0x79   : > { %p44_p6 = scmp.eq.s32.totalorder %s43_s7, 0  ;;  %s218_s23 = sor.u32 %s217_s6, %s43_s7 }
  0x7a   : > { %p219_p8 = scmp.eq.s32.totalorder %s218_s23, 0  ;;  %s1948_s25 = sshll.u32 %s2839_s15, 12 }
  0x7b   : > { %s3107_s28 = scalar_select %p44_p6, %s2823_s12, %s46_s4  }
  0x7c   : > { %s3707_s17 = sadd.s32 1, %s2811_s9  ;;  %s3117_s2 = scalar_lea.hbm %s3668_s0, %s1948_s25 }
  0x7d   : > { %s3112_s8 = scalar_select %p219_p8, %s2811_s9, %s3707_s17  }
  0x7e   : > { %s313_s1 = scalar_lea.vmem [#allocation5], %s1904_s20  ;;  %p3125_p10 = pnand %p2258_p5, %p3096_p13 }
  0x7f   : > { %s320_s3 = sshll.u32 %s313_s1, 4  ;;  %s3129_s6 = scalar_lea.sflag [#allocation6], %s309_s29  ;;  %s3119_s3 = int_to_ptr.vmem [resolvable:$true] %s320_s3 }
  0x80   : > { %s2683_s7 = scalar_lea.hbm %s3117_s2, 4096  ;;  %p2685_p0 = pneg %p3125_p10 }
  0x81   : > { %p2684_p12 = scmp.ne.s32.totalorder %s3117_s2, %s2683_s7  ;;  %s2688_s18 = scalar_lea.hbm %s3668_s0, 8192 }
  0x82   : > { %p2689_p7 = scmp.lt.u32.totalorder %s3117_s2, %s3668_s0  ;;  %p2690_p3 = scmp.lt.u32.totalorder %s2688_s18, %s2683_s7 }
  0x83   : > { %p2686_p4 = pnand %p2685_p0, %p2684_p12  ;;  %p2692_p2 = scmp.lt.u32.totalorder %s2683_s7, %s3117_s2 }
  0x84   : > { %p2691_p11 = por %p2690_p3, %p2689_p7 }
  0x85   : > { %p2687_p1 = pneg %p2686_p4 }
  0x86   : > { %p2693_p9 = por %p2692_p2, %p2691_p11 }
  0x88   : > { %p2694_p5 = pnand %p2693_p9, %p2687_p1 }
  0x8a   : > { %2697 = shalt.err (!%p2694_p5)
}
  0x8b   : > { %s2698_s29 = scalar_lea.vmem %s3119_s3, 4096  ;;  %s2850_s17 = smov [#allocation5]  }
  0x8c   : > { %p2699_p13 = scmp.ne.s32.totalorder %s3119_s3, %s2698_s29  ;;  %s2703_s26 = sshll.u32 %s2850_s17, 4  ;;  %s2704_s26 = int_to_ptr.vmem [resolvable:$false] %s2703_s26 }
  0x8d   : > { %s2705_s10 = scalar_lea.vmem %s2704_s26, 8192  ;;  %p2706_p12 = scmp.lt.s32.totalorder %s3119_s3, %s2704_s26 }
  0x8e   : > { %p2701_p6 = pnand %p2699_p13, %p2685_p0  ;;  %p2707_p4 = scmp.lt.s32.totalorder %s2705_s10, %s2698_s29 }
  0x90   : > { %p2702_p8 = pneg %p2701_p6  ;;  %p2708_p7 = por %p2707_p4, %p2706_p12 }
  0x92   : > { %p2709_p3 = pnand %p2708_p7, %p2702_p8 }
  0x94   : > { %2712 = shalt.err (!%p2709_p3)
}
  0x95   : > { %s2851_s7 = smov 128   ;;  %s2852_s1 = smov 8  }
  0x96   : > { %2250 = dma.hbm_to_vmem [thread:$0]  (!%p3125_p10), %s3117_s2, 4096, %s3119_s3, %s3129_s6, %s2851_s7, %s2851_s7, %s2852_s1  }
  0x97   : > { %p3709_p0 = scmp.ne.s32.totalorder %s3701_s24, 0 }
  0x98   : > { %s334_s20 = sand.u32 (!%p3709_p0), 1, %s2819_s11   ;;  %p3710_p1 = scmp.ne.s32.totalorder (!%p3709_p0), %s3696_s21, 0 }
  0x99   : > { %332 = sbr.rel (%p3709_p0) target bundleno = 1567 (0x61f), region = 52  ;;  %s1908_s18 = sshll.u32 (!%p3709_p0), %s334_s20, 8 }
  0x9a   : > { %s335_s23 = scalar_lea.sflag (!%p3709_p0), [#allocation6], %s334_s20  ;;  %s3160_s25 = scalar_lea.vmem (!%p3709_p0), [#allocation5], %s1908_s18 }
  0xa0   : > { %2786 = dma.done.wait (%p3710_p1), %s335_s23, 4096  }
  0xa1   : > { %2788 = vsyncadd (%p3710_p1), %s335_s23, 4294963200  ;;  %p3711_p11 = scmp.ne.s32.totalorder %s3695_s19, 0 }
  0xa3   : > { %2790 = dma.done.wait (%p3711_p11), [#allocation9], 2048  }
  0xa4   : > { %2792 = vsyncadd (%p3711_p11), [#allocation9], 4294965248 }
  0xa5   : > { %2794 = dma.done.wait (%p3711_p11), [#allocation12], 1024  }
  0xa6   : > { %2796 = vsyncadd (%p3711_p11), [#allocation12], 4294966272  ;;  %s380_s3 = sand.u32 1, %s2807_s30   ;;  %p1913_p10 = scmp.ne.s32.totalorder %s2827_s13, 0 }
  0xa7   : > { %s1912_s24 = sshll.u32 %s380_s3, 7  ;;  %v2473_v0 = vld [vmem:[#allocation10] sm:$0xff] (!%p1913_p10)   ;;  %v2474_v1 = vld [vmem:[#allocation10 + $0x8] sm:$0xff] (!%p1913_p10)   ;;  %v2475_v2 = vld [vmem:[#allocation10 + $0x10] sm:$0xff] (!%p1913_p10)   ;;  %s3712_s4 = sld [smem:[#allocation26_spill]] (!%p1913_p10) }
  0xa8   : > { %s3177_s2 = scalar_lea.vmem [#allocation13], %s1912_s24  ;;  %388 = sbr.rel (%p1913_p10) target bundleno = 643 (0x283), region = 72  ;;  %2077 = vmatprep.subr.bf16.mxu0 (!%p1913_p10), %v2473_v0  ;;  %v2476_v3 = vld [vmem:[#allocation10 + $0x18] sm:$0xff] (!%p1913_p10)   ;;  %v389_v4 = vld [vmem:[%s3160_s25] sm:$0xff] (!%p1913_p10)  ;;  %v390_v5 = vld [vmem:[%s3160_s25 + $0x8] sm:$0xff] (!%p1913_p10) }
  0xa9   : > { %2078 = vmatpush3.bf16.msra.mxu0 (!%p1913_p10), %v2473_v0  ;;  %v421_v6 = vpack.c.bf16 (!%p1913_p10), %v390_v5, %v389_v4  ;;  %v2477_v7 = vld [vmem:[#allocation10 + $0x20] sm:$0xff] (!%p1913_p10)   ;;  %v2478_v8 = vld [vmem:[#allocation10 + $0x28] sm:$0xff] (!%p1913_p10)   ;;  %v2479_v9 = vld [vmem:[#allocation10 + $0x30] sm:$0xff] (!%p1913_p10)   ;;  %s3713_s17 = sld [smem:[#allocation25_spill]] (!%p1913_p10) }
  0xaa   : > { %2079 = vmatprep.subr.bf16.mxu0 (!%p1913_p10), %v2474_v1  ;;  %v2481_v10 = vld [vmem:[#allocation11] sm:$0xff] (!%p1913_p10)   ;;  %v2482_v11 = vld [vmem:[#allocation11 + $0x8] sm:$0xff] (!%p1913_p10)   ;;  %v2483_v12 = vld [vmem:[#allocation11 + $0x10] sm:$0xff] (!%p1913_p10)  }
  0xab   : > { %2093 = vmatprep.mubr.bf16.mxu0 (!%p1913_p10), %v421_v6  ;;  %2141 = vmatprep.mubr.bf16.mxu1 (!%p1913_p10), %v421_v6  ;;  %v2480_v13 = vld [vmem:[#allocation10 + $0x38] sm:$0xff] (!%p1913_p10)   ;;  %v391_v14 = vld [vmem:[%s3160_s25 + $0x10] sm:$0xff] (!%p1913_p10)  ;;  %v393_v17 = vld [vmem:[%s3160_s25 + $0x20] sm:$0xff] (!%p1913_p10) }
  0xac   : > { %2125 = vmatprep.subr.bf16.mxu1 (!%p1913_p10), %v2481_v10  ;;  %v392_v15 = vld [vmem:[%s3160_s25 + $0x18] sm:$0xff] (!%p1913_p10)  ;;  %v394_v18 = vld [vmem:[%s3160_s25 + $0x28] sm:$0xff] (!%p1913_p10)  ;;  %v2485_v21 = vld [vmem:[#allocation11 + $0x20] sm:$0xff] (!%p1913_p10)  }
  0xad   : > { %2080 = vmatpush3.bf16.msra.mxu0 (!%p1913_p10), %v2474_v1  ;;  %2126 = vmatpush3.bf16.msra.mxu1 (!%p1913_p10), %v2481_v10  ;;  %v2484_v16 = vld [vmem:[#allocation11 + $0x18] sm:$0xff] (!%p1913_p10)   ;;  %v422_v19 = vpack.c.bf16 (!%p1913_p10), %v392_v15, %v391_v14  ;;  %v423_v20 = vpack.c.bf16 (!%p1913_p10), %v394_v18, %v393_v17  ;;  %v395_v22 = vld [vmem:[%s3160_s25 + $0x30] sm:$0xff] (!%p1913_p10)  ;;  %v2486_v24 = vld [vmem:[#allocation11 + $0x28] sm:$0xff] (!%p1913_p10)  }
  0xae   : > { %2081 = vmatprep.subr.bf16.mxu0 (!%p1913_p10), %v2475_v2  ;;  %2127 = vmatprep.subr.bf16.mxu1 (!%p1913_p10), %v2482_v11  ;;  %v396_v23 = vld [vmem:[%s3160_s25 + $0x38] sm:$0xff] (!%p1913_p10)  ;;  %v397_v25 = vld [vmem:[%s3160_s25 + $0x40] sm:$0xff] (!%p1913_p10)  ;;  %v398_v26 = vld [vmem:[%s3160_s25 + $0x48] sm:$0xff] (!%p1913_p10) }
  0xaf   : > { %v424_v27 = vpack.c.bf16 %v396_v23, %v395_v22  ;;  %v425_v28 = vpack.c.bf16 %v398_v26, %v397_v25  ;;  %v2487_v29 = vld [vmem:[#allocation11 + $0x30] sm:$0xff]   ;;  %v400_v31 = vld [vmem:[%s3160_s25 + $0x58] sm:$0xff]  ;;  %v401_v33 = vld [vmem:[%s3160_s25 + $0x60] sm:$0xff] }
  0xb0   : > { %v399_v30 = vld [vmem:[%s3160_s25 + $0x50] sm:$0xff]  ;;  %v2488_v32 = vld [vmem:[#allocation11 + $0x38] sm:$0xff]   ;;  %v402_v34 = vld [vmem:[%s3160_s25 + $0x68] sm:$0xff] }
  0xb1   : > { %2082 = vmatpush3.bf16.msra.mxu0 %v2475_v2  ;;  %2128 = vmatpush3.bf16.msra.mxu1 %v2482_v11  ;;  %v426_v35 = vpack.c.bf16 %v400_v31, %v399_v30  ;;  %v427_v36 = vpack.c.bf16 %v402_v34, %v401_v33  ;;  %v403_v37 = vld [vmem:[%s3160_s25 + $0x70] sm:$0xff]  ;;  %v404_v38 = vld [vmem:[%s3160_s25 + $0x78] sm:$0xff]  ;;  %v405_v39 = vld [vmem:[%s3160_s25 + $0x80] sm:$0xff] }
  0xb2   : > { %2083 = vmatprep.subr.bf16.mxu0 %v2476_v3  ;;  %2129 = vmatprep.subr.bf16.mxu1 %v2483_v12  ;;  %v406_v40 = vld [vmem:[%s3160_s25 + $0x88] sm:$0xff]  ;;  %v428_v41 = vpack.c.bf16 %v404_v38, %v403_v37  ;;  %v407_v43 = vld [vmem:[%s3160_s25 + $0x90] sm:$0xff]  ;;  %v408_v44 = vld [vmem:[%s3160_s25 + $0x98] sm:$0xff] }
  0xb3   : > { %v429_v42 = vpack.c.bf16 %v406_v40, %v405_v39  ;;  %v409_v45 = vld [vmem:[%s3160_s25 + $0xa0] sm:$0xff]  ;;  %v410_v46 = vld [vmem:[%s3160_s25 + $0xa8] sm:$0xff]  ;;  %v430_v47 = vpack.c.bf16 %v408_v44, %v407_v43  ;;  %v411_v49 = vld [vmem:[%s3160_s25 + $0xb0] sm:$0xff] }
  0xb4   : > { %v431_v48 = vpack.c.bf16 %v410_v46, %v409_v45  ;;  %v412_v50 = vld [vmem:[%s3160_s25 + $0xb8] sm:$0xff]  ;;  %v413_v51 = vld [vmem:[%s3160_s25 + $0xc0] sm:$0xff]  ;;  %v414_v52 = vld [vmem:[%s3160_s25 + $0xc8] sm:$0xff] }
  0xb5   : > { %2084 = vmatpush3.bf16.msra.mxu0 %v2476_v3  ;;  %2130 = vmatpush3.bf16.msra.mxu1 %v2483_v12  ;;  %v432_v53 = vpack.c.bf16 %v412_v50, %v411_v49  ;;  %v433_v54 = vpack.c.bf16 %v414_v52, %v413_v51  ;;  %v415_v55 = vld [vmem:[%s3160_s25 + $0xd0] sm:$0xff]  ;;  %v416_v56 = vld [vmem:[%s3160_s25 + $0xd8] sm:$0xff]  ;;  %v417_v57 = vld [vmem:[%s3160_s25 + $0xe0] sm:$0xff] }
  0xb6   : > { %2085 = vmatprep.subr.bf16.mxu0 %v2477_v7  ;;  %2131 = vmatprep.subr.bf16.mxu1 %v2484_v16  ;;  %v418_v58 = vld [vmem:[%s3160_s25 + $0xe8] sm:$0xff]  ;;  %v434_v59 = vpack.c.bf16 %v416_v56, %v415_v55  ;;  %v419_v61 = vld [vmem:[%s3160_s25 + $0xf0] sm:$0xff]  ;;  %v420_v62 = vld [vmem:[%s3160_s25 + $0xf8] sm:$0xff] }
  0xb7   : > { %v435_v60 = vpack.c.bf16 %v418_v58, %v417_v57  ;;  %v436_v63 = vpack.c.bf16 %v420_v62, %v419_v61  ;;  %v3219_v10 = vld [vmem:[%s3712_s4] ss:$0 sm:$0xff] }
  0xb8   : > { %v3238_v23 = vld [vmem:[%s3713_s17] ss:$0 sm:$0xff] }
  0xb9   : > { %2086 = vmatpush3.bf16.msra.mxu0 %v2477_v7  ;;  %2132 = vmatpush3.bf16.msra.mxu1 %v2484_v16 }
  0xba   : > { %2087 = vmatprep.subr.bf16.mxu0 %v2478_v8  ;;  %2133 = vmatprep.subr.bf16.mxu1 %v2485_v21 }
  0xbd   : > { %2088 = vmatpush3.bf16.msra.mxu0 %v2478_v8  ;;  %2134 = vmatpush3.bf16.msra.mxu1 %v2485_v21 }
  0xbe   : > { %2089 = vmatprep.subr.bf16.mxu0 %v2479_v9  ;;  %2135 = vmatprep.subr.bf16.mxu1 %v2486_v24 }
  0xc1   : > { %2090 = vmatpush3.bf16.msra.mxu0 %v2479_v9  ;;  %2136 = vmatpush3.bf16.msra.mxu1 %v2486_v24 }
  0xc2   : > { %2091 = vmatprep.subr.bf16.mxu0 %v2480_v13  ;;  %2137 = vmatprep.subr.bf16.mxu1 %v2487_v29 }
  0xc5   : > { %2092 = vmatpush3.bf16.msra.mxu0 %v2480_v13  ;;  %2138 = vmatpush3.bf16.msra.mxu1 %v2487_v29 }
  0xc6   : > { %2139 = vmatprep.subr.bf16.mxu1 %v2488_v32 }
  0xc8   : > { %2094 = vmatmul.mubr.bf16.vlgmr.msra.gmra.mrb[0].mxu0 %v422_v19 }
  0xc9   : > { %2097 = vmatprep.mubr.bf16.mxu0 %v423_v20  ;;  %2140 = vmatpush3.bf16.msra.mxu1 %v2488_v32 }
  0xcc   : > { %2142 = vmatmul.mubr.bf16.vlgmr.msra.gmra.mrb[0].mxu1 %v422_v19 }
  0xcd   : > { %2145 = vmatprep.mubr.bf16.mxu1 %v423_v20 }
  0xd0   : > { %2098 = vmatmul.mubr.bf16.gmra.mrb[4].mxu0 %v424_v27 }
  0xd1   : > { %2101 = vmatprep.mubr.bf16.mxu0 %v425_v28 }
  0xd4   : > { %2146 = vmatmul.mubr.bf16.gmra.mrb[4].mxu1 %v424_v27 }
  0xd5   : > { %2149 = vmatprep.mubr.bf16.mxu1 %v425_v28 }
  0xd8   : > { %2102 = vmatmul.mubr.bf16.gmra.mrb[8].mxu0 %v426_v35 }
  0xd9   : > { %2105 = vmatprep.mubr.bf16.mxu0 %v427_v36 }
  0xdc   : > { %2150 = vmatmul.mubr.bf16.gmra.mrb[8].mxu1 %v426_v35 }
  0xdd   : > { %2153 = vmatprep.mubr.bf16.mxu1 %v427_v36 }
  0xe0   : > { %2106 = vmatmul.mubr.bf16.gmra.mrb[12].mxu0 %v428_v41 }
  0xe1   : > { %2109 = vmatprep.mubr.bf16.mxu0 %v429_v42 }
  0xe4   : > { %2154 = vmatmul.mubr.bf16.gmra.mrb[12].mxu1 %v428_v41 }
  0xe5   : > { %2157 = vmatprep.mubr.bf16.mxu1 %v429_v42 }
  0xe8   : > { %2110 = vmatmul.mubr.bf16.gmra.mrb[16].mxu0 %v430_v47 }
  0xe9   : > { %2113 = vmatprep.mubr.bf16.mxu0 %v431_v48 }
  0xec   : > { %2158 = vmatmul.mubr.bf16.gmra.mrb[16].mxu1 %v430_v47 }
  0xed   : > { %2161 = vmatprep.mubr.bf16.mxu1 %v431_v48 }
  0xf0   : > { %2114 = vmatmul.mubr.bf16.gmra.mrb[20].mxu0 %v432_v53 }
  0xf1   : > { %2117 = vmatprep.mubr.bf16.mxu0 %v433_v54 }
  0xf4   : > { %2162 = vmatmul.mubr.bf16.gmra.mrb[20].mxu1 %v432_v53 }
  0xf5   : > { %2165 = vmatprep.mubr.bf16.mxu1 %v433_v54 }
  0xf8   : > { %2118 = vmatmul.mubr.bf16.gmra.mrb[24].mxu0 %v434_v59 }
  0xf9   : > { %2121 = vmatprep.mubr.bf16.mxu0 %v435_v60 }
  0xfc   : > { %2166 = vmatmul.mubr.bf16.gmra.mrb[24].mxu1 %v434_v59 }
  0xfd   : > { %2169 = vmatprep.mubr.bf16.mxu1 %v435_v60 }
 0x100   : > { %2122 = vmatmul.mubr.bf16.gmra.mrb[28].mxu0 %v436_v63 }
 0x104   : > { %2170 = vmatmul.mubr.bf16.gmra.mrb[28].mxu1 %v436_v63 }
 0x19b   : > { %v2095_v0 = vpop.f32.mrb[0].mxu0 }
 0x19c   : > { %v542_v1 = vpop.f32.mrb[1].mxu0  ;;  %v551_v25 = vadd.f32 %v2095_v0, %v3238_v23 }
 0x19d   : > { %v2096_v2 = vpop.f32.mrb[2].mxu0  ;;  %v543_v28 = vadd.f32 %v3238_v23, %v542_v1 }
 0x19e   : > { %v545_v3 = vpop.f32.mrb[3].mxu0  ;;  %v554_v31 = vadd.f32 %v2096_v2, %v3238_v23 }
 0x19f   : > { %v2143_v13 = vpop.f32.mrb[0].mxu1  ;;  %v546_v35 = vadd.f32 %v3238_v23, %v545_v3 }
 0x1a0   : > { %v783_v14 = vadd.f32 %v2143_v13, %v3219_v10  ;;  %v774_v15 = vpop.f32.mrb[1].mxu1 }
 0x1a1   : > { %v2144_v16 = vpop.f32.mrb[2].mxu1  ;;  %v775_v40 = vadd.f32 %v3219_v10, %v774_v15 }
 0x1a2   : > { %v786_v17 = vadd.f32 %v2144_v16, %v3219_v10  ;;  %v777_v41 = vpop.f32.mrb[3].mxu1 }
 0x1a3   : > { %v2099_v4 = vpop.f32.mrb[4].mxu0  ;;  %v778_v43 = vadd.f32 %v3219_v10, %v777_v41 }
 0x1a4   : > { %v558_v5 = vpop.f32.mrb[5].mxu0  ;;  %v998_v19 = vpack.c.bf16 %v786_v17, %v783_v14  ;;  %v3251_v44 = vadd.f32 %v2099_v4, %v3238_v23 }
 0x1a5   : > { %v2100_v6 = vpop.f32.mrb[6].mxu0  ;;  %v559_v47 = vadd.f32 %v3238_v23, %v558_v5  ;;  %v997_v50 = vpack.c.bf16 %v778_v43, %v775_v40 }
 0x1a6   : > { %v561_v7 = vpop.f32.mrb[7].mxu0  ;;  %1014 = vst [vmem:[#allocation3 + $0x8] sm:$0xff] %v998_v19  ;;  %v3259_v51 = vadd.f32 %v2100_v6, %v3238_v23 }
 0x1a7   : > { %v562_v55 = vadd.f32 %v3238_v23, %v561_v7  ;;  %1013 = vst [vmem:[#allocation3] sm:$0xff] %v997_v50  ;;  %v2147_v58 = vpop.f32.mrb[4].mxu1 }
 0x1a8   : > { %v790_v60 = vpop.f32.mrb[5].mxu1  ;;  %v799_v63 = vadd.f32 %v2147_v58, %v3219_v10 }
 0x1a9   : > { %v2148_v62 = vpop.f32.mrb[6].mxu1  ;;  %v791_v0 = vadd.f32 %v3219_v10, %v790_v60 }
 0x1aa   : > { %v802_v1 = vadd.f32 %v2148_v62, %v3219_v10  ;;  %v793_v2 = vpop.f32.mrb[7].mxu1 }
 0x1ab   : > { %v3212_v8 = vpop.f32.mrb[8].mxu0  ;;  %v794_v4 = vadd.f32 %v3219_v10, %v793_v2 }
 0x1ac   : > { %v3214_v9 = vpop.f32.mrb[9].mxu0  ;;  %v3276_v5 = vadd.f32 %v3212_v8, %v3238_v23  ;;  %v1000_v13 = vpack.c.bf16 %v802_v1, %v799_v63 }
 0x1ad   : > { %v3221_v11 = vpop.f32.mrb[10].mxu0  ;;  %v575_v14 = vadd.f32 %v3238_v23, %v3214_v9  ;;  %v999_v17 = vpack.c.bf16 %v794_v4, %v791_v0 }
 0x1ae   : > { %v3223_v12 = vpop.f32.mrb[11].mxu0  ;;  %v3286_v19 = vadd.f32 %v3221_v11, %v3238_v23  ;;  %1016 = vst [vmem:[#allocation3 + $0x18] sm:$0xff] %v1000_v13 }
 0x1af   : > { %v578_v9 = vadd.f32 %v3238_v23, %v3223_v12  ;;  %1015 = vst [vmem:[#allocation3 + $0x10] sm:$0xff] %v999_v17 }
 0x1b3   : > { %v3227_v18 = vpop.f32.mrb[12].mxu0 }
 0x1b4   : > { %v3229_v20 = vpop.f32.mrb[13].mxu0 }
 0x1b5   : > { %v3231_v21 = vpop.f32.mrb[14].mxu0  ;;  %v591_v41 = vadd.f32 %v3238_v23, %v3229_v20 }
 0x1b6   : > { %v3233_v22 = vpop.f32.mrb[15].mxu0 }
 0x1b7   : > { %v594_v20 = vadd.f32 %v3238_v23, %v3233_v22 }
 0x1bb   : > { %v2111_v24 = vpop.f32.mrb[16].mxu0 }
 0x1bc   : > { %v615_v26 = vadd.f32 %v2111_v24, %v3238_v23  ;;  %v606_v27 = vpop.f32.mrb[17].mxu0 }
 0x1bd   : > { %v607_v29 = vadd.f32 %v3238_v23, %v606_v27  ;;  %v2112_v30 = vpop.f32.mrb[18].mxu0 }
 0x1be   : > { %v618_v32 = vadd.f32 %v2112_v30, %v3238_v23  ;;  %v609_v33 = vpop.f32.mrb[19].mxu0  ;;  %v2365_v34 = vpack.i.bf16 %v615_v26, %v551_v25 }
 0x1bf   : > { %v610_v36 = vadd.f32 %v3238_v23, %v609_v33  ;;  %v2361_v37 = vpack.i.bf16 %v607_v29, %v543_v28  ;;  %v2151_v28 = vpop.f32.mrb[8].mxu1 }
 0x1c0   : > { %v2367_v38 = vpack.i.bf16 %v618_v32, %v554_v31  ;;  %v806_v29 = vpop.f32.mrb[9].mxu1  ;;  %v815_v32 = vadd.f32 %v2151_v28, %v3219_v10 }
 0x1c1   : > { %2362 = vxpose.xlu0.b32.start [1/16] %v2361_v37, 128  ;;  %v2363_v39 = vpack.i.bf16 %v610_v36, %v546_v35  ;;  %v2152_v31 = vpop.f32.mrb[10].mxu1  ;;  %v807_v33 = vadd.f32 %v3219_v10, %v806_v29  ;;  %v3304_v37 = vadd.f32 %v3227_v18, %v3238_v23 }
 0x1c2   : > { %v809_v35 = vpop.f32.mrb[11].mxu1 }
 0x1c3   : > { %v2115_v42 = vpop.f32.mrb[20].mxu0  ;;  %v810_v36 = vadd.f32 %v3219_v10, %v809_v35 }
 0x1c4   : > { %v3254_v45 = vadd.f32 %v2115_v42, %v3238_v23  ;;  %v622_v46 = vpop.f32.mrb[21].mxu0 }
 0x1c5   : > { %v623_v48 = vadd.f32 %v3238_v23, %v622_v46  ;;  %v2116_v49 = vpop.f32.mrb[22].mxu0  ;;  %2364 = vxpose.xlu0.b32.cont [2/16] %v2363_v39, 128  ;;  %v1001_v46 = vpack.c.bf16 %v810_v36, %v807_v33 }
 0x1c6   : > { %v3262_v52 = vadd.f32 %v2116_v49, %v3238_v23  ;;  %v625_v53 = vpop.f32.mrb[23].mxu0  ;;  %v2373_v54 = vpack.i.bf16 %v3254_v45, %v3251_v44 }
 0x1c7   : > { %v626_v56 = vadd.f32 %v3238_v23, %v625_v53  ;;  %v2369_v57 = vpack.i.bf16 %v623_v48, %v559_v47  ;;  %v3314_v47 = vadd.f32 %v3231_v21, %v3238_v23  ;;  %1017 = vst [vmem:[#allocation3 + $0x20] sm:$0xff] %v1001_v46 }
 0x1c8   : > { %v2375_v59 = vpack.i.bf16 %v3262_v52, %v3259_v51 }
 0x1c9   : > { %2366 = vxpose.xlu0.b32.cont [3/16] %v2365_v34, 128  ;;  %v2371_v61 = vpack.i.bf16 %v626_v56, %v562_v55  ;;  %v818_v34 = vadd.f32 %v2152_v31, %v3219_v10  ;;  %v2155_v55 = vpop.f32.mrb[12].mxu1 }
 0x1ca   : > { %v822_v56 = vpop.f32.mrb[13].mxu1  ;;  %v831_v60 = vadd.f32 %v2155_v55, %v3219_v10 }
 0x1cb   : > { %v2119_v3 = vpop.f32.mrb[24].mxu0  ;;  %v1002_v40 = vpack.c.bf16 %v818_v34, %v815_v32  ;;  %v2156_v58 = vpop.f32.mrb[14].mxu1 }
 0x1cc   : > { %v3279_v6 = vadd.f32 %v2119_v3, %v3238_v23  ;;  %v638_v7 = vpop.f32.mrb[25].mxu0  ;;  %v834_v22 = vadd.f32 %v2156_v58, %v3219_v10 }
 0x1cd   : > { %v639_v15 = vadd.f32 %v3238_v23, %v638_v7  ;;  %v2120_v16 = vpop.f32.mrb[26].mxu0  ;;  %2368 = vxpose.xlu0.b32.cont [4/16] %v2367_v38, 128  ;;  %1018 = vst [vmem:[#allocation3 + $0x28] sm:$0xff] %v1002_v40 }
 0x1ce   : > { %v3289_v8 = vadd.f32 %v2120_v16, %v3238_v23  ;;  %v641_v24 = vpop.f32.mrb[27].mxu0  ;;  %v2381_v25 = vpack.i.bf16 %v3279_v6, %v3276_v5  ;;  %v1004_v63 = vpack.c.bf16 %v834_v22, %v831_v60 }
 0x1cf   : > { %v642_v26 = vadd.f32 %v3238_v23, %v641_v24  ;;  %v2377_v27 = vpack.i.bf16 %v639_v15, %v575_v14 }
 0x1d0   : > { %v2383_v11 = vpack.i.bf16 %v3289_v8, %v3286_v19  ;;  %1020 = vst [vmem:[#allocation3 + $0x38] sm:$0xff] %v1004_v63 }
 0x1d1   : > { %2370 = vxpose.xlu0.b32.cont [5/16] %v2369_v57, 128  ;;  %v2379_v30 = vpack.i.bf16 %v642_v26, %v578_v9 }
 0x1d3   : > { %v2123_v12 = vpop.f32.mrb[28].mxu0 }
 0x1d4   : > { %v3307_v38 = vadd.f32 %v2123_v12, %v3238_v23  ;;  %v654_v39 = vpop.f32.mrb[29].mxu0 }
 0x1d5   : > { %v655_v42 = vadd.f32 %v3238_v23, %v654_v39  ;;  %v2124_v43 = vpop.f32.mrb[30].mxu0  ;;  %2372 = vxpose.xlu0.b32.cont [6/16] %v2371_v61, 128  ;;  %v823_v61 = vadd.f32 %v3219_v10, %v822_v56 }
 0x1d6   : > { %v3317_v18 = vadd.f32 %v2124_v43, %v3238_v23  ;;  %v657_v48 = vpop.f32.mrb[31].mxu0  ;;  %v2389_v49 = vpack.i.bf16 %v3307_v38, %v3304_v37 }
 0x1d7   : > { %v658_v50 = vadd.f32 %v3238_v23, %v657_v48  ;;  %v2385_v53 = vpack.i.bf16 %v655_v42, %v591_v41  ;;  %v825_v23 = vpop.f32.mrb[15].mxu1 }
 0x1d8   : > { %v2391_v21 = vpack.i.bf16 %v3317_v18, %v3314_v47  ;;  %v826_v62 = vadd.f32 %v3219_v10, %v825_v23  ;;  %v2159_v44 = vpop.f32.mrb[16].mxu1 }
 0x1d9   : > { %2374 = vxpose.xlu0.b32.cont [7/16] %v2373_v54, 128  ;;  %v2387_v57 = vpack.i.bf16 %v658_v50, %v594_v20  ;;  %v838_v45 = vpop.f32.mrb[17].mxu1  ;;  %v847_v1 = vadd.f32 %v2159_v44, %v3219_v10 }
 0x1da   : > { %v1003_v0 = vpack.c.bf16 %v826_v62, %v823_v61  ;;  %v2160_v54 = vpop.f32.mrb[18].mxu1  ;;  %v839_v2 = vadd.f32 %v3219_v10, %v838_v45 }
 0x1db   : > { %v850_v3 = vadd.f32 %v2160_v54, %v3219_v10  ;;  %v841_v4 = vpop.f32.mrb[19].mxu1 }
 0x1dc   : > { %1019 = vst [vmem:[#allocation3 + $0x30] sm:$0xff] %v1003_v0  ;;  %v842_v7 = vadd.f32 %v3219_v10, %v841_v4  ;;  %v2163_v52 = vpop.f32.mrb[20].mxu1 }
 0x1dd   : > { %2376 = vxpose.xlu0.b32.cont [8/16] %v2375_v59, 128  ;;  %v1006_v13 = vpack.c.bf16 %v850_v3, %v847_v1  ;;  %v854_v59 = vpop.f32.mrb[21].mxu1  ;;  %v863_v15 = vadd.f32 %v2163_v52, %v3219_v10 }
 0x1de   : > { %v1005_v51 = vpack.c.bf16 %v842_v7, %v839_v2  ;;  %v2164_v14 = vpop.f32.mrb[22].mxu1  ;;  %v855_v16 = vadd.f32 %v3219_v10, %v854_v59 }
 0x1df   : > { %1022 = vst [vmem:[#allocation3 + $0x48] sm:$0xff] %v1006_v13  ;;  %v866_v17 = vadd.f32 %v2164_v14, %v3219_v10  ;;  %v857_v24 = vpop.f32.mrb[23].mxu1 }
 0x1e0   : > { %1021 = vst [vmem:[#allocation3 + $0x40] sm:$0xff] %v1005_v51  ;;  %v858_v9 = vadd.f32 %v3219_v10, %v857_v24  ;;  %v2167_v5 = vpop.f32.mrb[24].mxu1 }
 0x1e1   : > { %2378 = vxpose.xlu0.b32.cont [9/16] %v2377_v27, 128  ;;  %v1008_v26 = vpack.c.bf16 %v866_v17, %v863_v15  ;;  %v870_v6 = vpop.f32.mrb[25].mxu1  ;;  %v879_v28 = vadd.f32 %v2167_v5, %v3219_v10 }
 0x1e2   : > { %v1007_v27 = vpack.c.bf16 %v858_v9, %v855_v16  ;;  %v871_v29 = vadd.f32 %v3219_v10, %v870_v6 }
 0x1e3   : > { %1024 = vst [vmem:[#allocation3 + $0x58] sm:$0xff] %v1008_v26 }
 0x1e4   : > { %1023 = vst [vmem:[#allocation3 + $0x50] sm:$0xff] %v1007_v27 }
 0x1e5   : > { %2380 = vxpose.xlu0.b32.cont [10/16] %v2379_v30, 128 }
 0x1e9   : > { %2382 = vxpose.xlu0.b32.cont [11/16] %v2381_v25, 128  ;;  %v2168_v25 = vpop.f32.mrb[26].mxu1 }
 0x1ea   : > { %v882_v30 = vadd.f32 %v2168_v25, %v3219_v10  ;;  %v873_v31 = vpop.f32.mrb[27].mxu1 }
 0x1eb   : > { %v874_v32 = vadd.f32 %v3219_v10, %v873_v31  ;;  %v2171_v8 = vpop.f32.mrb[28].mxu1 }
 0x1ec   : > { %v1010_v33 = vpack.c.bf16 %v882_v30, %v879_v28  ;;  %v895_v35 = vadd.f32 %v2171_v8, %v3219_v10 }
 0x1ed   : > { %2384 = vxpose.xlu0.b32.cont [12/16] %v2383_v11, 128  ;;  %v1009_v19 = vpack.c.bf16 %v874_v32, %v871_v29  ;;  %v886_v11 = vpop.f32.mrb[29].mxu1 }
 0x1ee   : > { %1026 = vst [vmem:[#allocation3 + $0x68] sm:$0xff] %v1010_v33  ;;  %v2172_v34 = vpop.f32.mrb[30].mxu1  ;;  %v887_v12 = vadd.f32 %v3219_v10, %v886_v11 }
 0x1ef   : > { %1025 = vst [vmem:[#allocation3 + $0x60] sm:$0xff] %v1009_v19  ;;  %v898_v36 = vadd.f32 %v2172_v34, %v3219_v10  ;;  %v889_v39 = vpop.f32.mrb[31].mxu1 }
 0x1f0   : > { %v890_v40 = vadd.f32 %v3219_v10, %v889_v39 }
 0x1f1   : > { %2386 = vxpose.xlu0.b32.cont [13/16] %v2385_v53, 128  ;;  %v1012_v41 = vpack.c.bf16 %v898_v36, %v895_v35 }
 0x1f2   : > { %v1011_v42 = vpack.c.bf16 %v890_v40, %v887_v12 }
 0x1f3   : > { %1028 = vst [vmem:[#allocation3 + $0x78] sm:$0xff] %v1012_v41 }
 0x1f4   : > { %1027 = vst [vmem:[#allocation3 + $0x70] sm:$0xff] %v1011_v42 }
 0x1f5   : > { %2388 = vxpose.xlu0.b32.cont [14/16] %v2387_v57, 128 }
 0x1f9   : > { %2390 = vxpose.xlu0.b32.cont [15/16] %v2389_v49, 128 }
 0x1fd   : > { %2392 = vxpose.xlu0.b32.end [16/16] %v2391_v21, 128 }
 0x241   : > { %v2393_v37 = vpop.trf.xlu0 }
 0x242   : > { %v2397_v38 = vunpack.i.h.bf16 %v2393_v37  ;;  %v2394_v43 = vunpack.i.l.bf16 %v2393_v37 }
 0x245   : > { %v2398_v46 = vpop.trf.xlu0 }
 0x246   : > { %v2402_v48 = vunpack.i.h.bf16 %v2398_v46  ;;  %v2399_v49 = vunpack.i.l.bf16 %v2398_v46 }
 0x248   : > { %v965_v20 = vpack.c.bf16 %v2399_v49, %v2394_v43  ;;  %v966_v50 = vpack.c.bf16 %v2402_v48, %v2397_v38 }
 0x249   : > { %v2403_v53 = vpop.trf.xlu0 }
 0x24a   : > { %981 = vst [vmem:[#allocation2] sm:$0xff] %v965_v20  ;;  %982 = vst [vmem:[#allocation2 + $0x8] sm:$0xff] %v966_v50  ;;  %v2407_v10 = vunpack.i.h.bf16 %v2403_v53  ;;  %v2404_v55 = vunpack.i.l.bf16 %v2403_v53 }
 0x24d   : > { %v2408_v56 = vpop.trf.xlu0 }
 0x24e   : > { %v2412_v57 = vunpack.i.h.bf16 %v2408_v56  ;;  %v2409_v47 = vunpack.i.l.bf16 %v2408_v56 }
 0x250   : > { %v967_v18 = vpack.c.bf16 %v2409_v47, %v2404_v55  ;;  %v968_v21 = vpack.c.bf16 %v2412_v57, %v2407_v10 }
 0x251   : > { %v2413_v58 = vpop.trf.xlu0 }
 0x252   : > { %983 = vst [vmem:[#allocation2 + $0x10] sm:$0xff] %v967_v18  ;;  %984 = vst [vmem:[#allocation2 + $0x18] sm:$0xff] %v968_v21  ;;  %v2417_v60 = vunpack.i.h.bf16 %v2413_v58  ;;  %v2414_v61 = vunpack.i.l.bf16 %v2413_v58 }
 0x255   : > { %v2418_v22 = vpop.trf.xlu0 }
 0x256   : > { %v2422_v23 = vunpack.i.h.bf16 %v2418_v22  ;;  %v2419_v62 = vunpack.i.l.bf16 %v2418_v22 }
 0x258   : > { %v969_v63 = vpack.c.bf16 %v2419_v62, %v2414_v61  ;;  %v970_v0 = vpack.c.bf16 %v2422_v23, %v2417_v60 }
 0x259   : > { %v2423_v44 = vpop.trf.xlu0 }
 0x25a   : > { %985 = vst [vmem:[#allocation2 + $0x20] sm:$0xff] %v969_v63  ;;  %986 = vst [vmem:[#allocation2 + $0x28] sm:$0xff] %v970_v0  ;;  %v2427_v45 = vunpack.i.h.bf16 %v2423_v44  ;;  %v2424_v54 = vunpack.i.l.bf16 %v2423_v44 }
 0x25d   : > { %v2428_v1 = vpop.trf.xlu0 }
 0x25e   : > { %v2432_v2 = vunpack.i.h.bf16 %v2428_v1  ;;  %v2429_v3 = vunpack.i.l.bf16 %v2428_v1 }
 0x260   : > { %v971_v4 = vpack.c.bf16 %v2429_v3, %v2424_v54  ;;  %v972_v7 = vpack.c.bf16 %v2432_v2, %v2427_v45 }
 0x261   : > { %v2433_v13 = vpop.trf.xlu0 }
 0x262   : > { %987 = vst [vmem:[#allocation2 + $0x30] sm:$0xff] %v971_v4  ;;  %988 = vst [vmem:[#allocation2 + $0x38] sm:$0xff] %v972_v7  ;;  %v2437_v51 = vunpack.i.h.bf16 %v2433_v13  ;;  %v2434_v52 = vunpack.i.l.bf16 %v2433_v13 }
 0x265   : > { %v2438_v59 = vpop.trf.xlu0 }
 0x266   : > { %v2442_v14 = vunpack.i.h.bf16 %v2438_v59  ;;  %v2439_v15 = vunpack.i.l.bf16 %v2438_v59 }
 0x268   : > { %v973_v16 = vpack.c.bf16 %v2439_v15, %v2434_v52  ;;  %v974_v17 = vpack.c.bf16 %v2442_v14, %v2437_v51 }
 0x269   : > { %v2443_v24 = vpop.trf.xlu0 }
 0x26a   : > { %989 = vst [vmem:[#allocation2 + $0x40] sm:$0xff] %v973_v16  ;;  %990 = vst [vmem:[#allocation2 + $0x48] sm:$0xff] %v974_v17  ;;  %v2447_v9 = vunpack.i.h.bf16 %v2443_v24  ;;  %v2444_v26 = vunpack.i.l.bf16 %v2443_v24 }
 0x26d   : > { %v2448_v27 = vpop.trf.xlu0 }
 0x26e   : > { %v2452_v5 = vunpack.i.h.bf16 %v2448_v27  ;;  %v2449_v6 = vunpack.i.l.bf16 %v2448_v27 }
 0x270   : > { %v975_v25 = vpack.c.bf16 %v2449_v6, %v2444_v26  ;;  %v976_v28 = vpack.c.bf16 %v2452_v5, %v2447_v9 }
 0x271   : > { %v2453_v29 = vpop.trf.xlu0 }
 0x272   : > { %991 = vst [vmem:[#allocation2 + $0x50] sm:$0xff] %v975_v25  ;;  %992 = vst [vmem:[#allocation2 + $0x58] sm:$0xff] %v976_v28  ;;  %v2457_v30 = vunpack.i.h.bf16 %v2453_v29  ;;  %v2454_v31 = vunpack.i.l.bf16 %v2453_v29 }
 0x275   : > { %v2458_v32 = vpop.trf.xlu0 }
 0x276   : > { %v2462_v33 = vunpack.i.h.bf16 %v2458_v32  ;;  %v2459_v19 = vunpack.i.l.bf16 %v2458_v32 }
 0x278   : > { %v977_v8 = vpack.c.bf16 %v2459_v19, %v2454_v31  ;;  %v978_v11 = vpack.c.bf16 %v2462_v33, %v2457_v30 }
 0x279   : > { %v2463_v34 = vpop.trf.xlu0 }
 0x27a   : > { %993 = vst [vmem:[#allocation2 + $0x60] sm:$0xff] %v977_v8  ;;  %994 = vst [vmem:[#allocation2 + $0x68] sm:$0xff] %v978_v11  ;;  %v2467_v35 = vunpack.i.h.bf16 %v2463_v34  ;;  %v2464_v12 = vunpack.i.l.bf16 %v2463_v34 }
 0x27d   : > { %v2468_v36 = vpop.trf.xlu0 }
 0x27e   : > { %v2472_v39 = vunpack.i.h.bf16 %v2468_v36  ;;  %v2469_v40 = vunpack.i.l.bf16 %v2468_v36 }
 0x280   : > { %v979_v41 = vpack.c.bf16 %v2469_v40, %v2464_v12  ;;  %v980_v42 = vpack.c.bf16 %v2472_v39, %v2467_v35 }
 0x282   : > { %995 = vst [vmem:[#allocation2 + $0x70] sm:$0xff] %v979_v41  ;;  %996 = vst [vmem:[#allocation2 + $0x78] sm:$0xff] %v980_v42 }
 0x283 PF: > { %v2489_v37 = vld [vmem:[#allocation8] sm:$0xff]   ;;  %v2490_v38 = vld [vmem:[#allocation8 + $0x8] sm:$0xff]   ;;  %s1932_s26 = sshll.u32 %s2827_s13, 7  ;;  %v2491_v43 = vld [vmem:[#allocation8 + $0x10] sm:$0xff]   ;;  %v2853_v29 = vmov 0   ;;  %s3714_s20 = sld [smem:[#allocation23_spill]] }
 0x284   : > { %2173 = vmatprep.subr.bf16.mxu0 %v2489_v37  ;;  %s3366_s10 = scalar_lea.vmem %s3160_s25, %s1932_s26 [#allocation5]  ;;  %v2492_v46 = vld [vmem:[#allocation8 + $0x18] sm:$0xff]   ;;  %v2493_v50 = vld [vmem:[#allocation8 + $0x20] sm:$0xff]   ;;  %v1232_v53 = vld [vmem:[#allocation2 + $0x8] sm:$0xff]  ;;  %1279 = vmatprep.mubr.bf16.mxu1 %v2853_v29  ;;  %s1713_s18 = sld [smem:[#allocation4]] }
 0x285   : > { %2174 = vmatpush3.bf16.msra.mxu0 %v2489_v37  ;;  %v3369_v48 = vld [vmem:[%s3366_s10] sm:$0xff]  ;;  %v3372_v49 = vld [vmem:[%s3366_s10 + $0x8] sm:$0xff]  ;;  %1247 = vmatprep.subr.bf16.mxu1 %v1232_v53  ;;  %v1234_v55 = vld [vmem:[#allocation2 + $0x18] sm:$0xff]  ;;  %s3715_s23 = sld [smem:[#allocation19_spill]]  ;;  %s1943_s25 = sshll.u32 %s2827_s13, 4 }
 0x286   : > { %2175 = vmatprep.subr.bf16.mxu0 %v2490_v38  ;;  %v1047_v20 = vpack.c.bf16 %v3372_v49, %v3369_v48  ;;  %v1231_v10 = vld [vmem:[#allocation2] sm:$0xff]  ;;  %v2494_v56 = vld [vmem:[#allocation8 + $0x28] sm:$0xff]   ;;  %v1233_v57 = vld [vmem:[#allocation2 + $0x10] sm:$0xff]  ;;  %s3716_s13 = sld [smem:[#allocation20_spill]]  ;;  %s1779_s4 = sshll.u32 %s3177_s2, 4  ;;  %s3600_s4 = int_to_ptr.vmem [resolvable:$true] %s1779_s4 }
 0x287   : > { %1248 = vmatpush1.bf16.msra.mxu1 %v1231_v10  ;;  %v1236_v47 = vld [vmem:[#allocation2 + $0x28] sm:$0xff]  ;;  %v2495_v18 = vld [vmem:[#allocation8 + $0x30] sm:$0xff]   ;;  %v1235_v21 = vld [vmem:[#allocation2 + $0x20] sm:$0xff]  ;;  %s3717_s17 = sld [smem:[#allocation27_spill]]  ;;  %s3607_s7 = scalar_lea.sflag [#allocation7], %s380_s3 }
 0x288   : > { %2189 = vmatprep.mubr.bf16.mxu0 %v1047_v20  ;;  %1249 = vmatprep.subr.bf16.mxu1 %v1234_v55  ;;  %v1238_v58 = vld [vmem:[#allocation2 + $0x38] sm:$0xff]  ;;  %v1237_v61 = vld [vmem:[#allocation2 + $0x30] sm:$0xff]  ;;  %v1240_v22 = vld [vmem:[#allocation2 + $0x48] sm:$0xff]  ;;  %s2713_s1 = scalar_lea.vmem %s3600_s4, 2048 }
 0x289   : > { %2176 = vmatpush3.bf16.msra.mxu0 %v2490_v38  ;;  %v2496_v60 = vld [vmem:[#allocation8 + $0x38] sm:$0xff]   ;;  %v3377_v23 = vld [vmem:[%s3366_s10 + $0x10] sm:$0xff]  ;;  %v3383_v63 = vld [vmem:[%s3366_s10 + $0x20] sm:$0xff]  ;;  %p2714_p2 = scmp.ne.s32.totalorder %s3600_s4, %s2713_s1 }
 0x28a   : > { %2177 = vmatprep.subr.bf16.mxu0 %v2491_v43  ;;  %v3380_v62 = vld [vmem:[%s3366_s10 + $0x18] sm:$0xff]  ;;  %v3386_v0 = vld [vmem:[%s3366_s10 + $0x28] sm:$0xff]  ;;  %v1239_v44 = vld [vmem:[#allocation2 + $0x40] sm:$0xff] }
 0x28b   : > { %1250 = vmatpush1.bf16.msra.mxu1 %v1233_v57  ;;  %v1242_v45 = vld [vmem:[#allocation2 + $0x58] sm:$0xff]  ;;  %v1048_v54 = vpack.c.bf16 %v3380_v62, %v3377_v23  ;;  %v1049_v1 = vpack.c.bf16 %v3386_v0, %v3383_v63  ;;  %v1241_v2 = vld [vmem:[#allocation2 + $0x50] sm:$0xff]  ;;  %v3399_v7 = vld [vmem:[%s3366_s10 + $0x40] sm:$0xff]  ;;  %s1944_s24 = sshll.u32 %s3715_s23, 5 }
 0x28c   : > { %1251 = vmatprep.subr.bf16.mxu1 %v1236_v47  ;;  %v3393_v3 = vld [vmem:[%s3366_s10 + $0x30] sm:$0xff]  ;;  %v3396_v4 = vld [vmem:[%s3366_s10 + $0x38] sm:$0xff]  ;;  %v3402_v13 = vld [vmem:[%s3366_s10 + $0x48] sm:$0xff]  ;;  %s1776_s19 = sadd.s32 %s1944_s24, %s1943_s25  ;;  %p3718_p9 = scmp.ne.s32.totalorder %s3716_s13, 0 }
 0x28d   : > { %2178 = vmatpush3.bf16.msra.mxu0 %v2491_v43  ;;  %v1050_v51 = vpack.c.bf16 %v3396_v4, %v3393_v3  ;;  %v1051_v52 = vpack.c.bf16 %v3402_v13, %v3399_v7  ;;  %v1041_v59 = vld [vmem:[%s3366_s10 + $0x50] sm:$0xff]  ;;  %v1042_v14 = vld [vmem:[%s3366_s10 + $0x58] sm:$0xff]  ;;  %v1043_v15 = vld [vmem:[%s3366_s10 + $0x60] sm:$0xff]  ;;  %s1945_s21 = sshll.u32 %s1776_s19, 7 }
 0x28e   : > { %2179 = vmatprep.subr.bf16.mxu0 %v2492_v46  ;;  %v1044_v16 = vld [vmem:[%s3366_s10 + $0x68] sm:$0xff]  ;;  %v1052_v17 = vpack.c.bf16 %v1042_v14, %v1041_v59  ;;  %v1045_v9 = vld [vmem:[%s3366_s10 + $0x70] sm:$0xff]  ;;  %v1046_v26 = vld [vmem:[%s3366_s10 + $0x78] sm:$0xff]  ;;  %s3598_s26 = scalar_lea.hbm %s3717_s17, %s1945_s21  ;;  %p2715_p5 = pnand %p2714_p2, %p3718_p9 }
 0x28f   : > { %1252 = vmatpush1.bf16.msra.mxu1 %v1235_v21  ;;  %v1053_v24 = vpack.c.bf16 %v1044_v16, %v1043_v15  ;;  %v1054_v27 = vpack.c.bf16 %v1046_v26, %v1045_v9  ;;  %v1244_v5 = vld [vmem:[#allocation2 + $0x68] sm:$0xff]  ;;  %v1243_v6 = vld [vmem:[#allocation2 + $0x60] sm:$0xff]  ;;  %v1246_v25 = vld [vmem:[#allocation2 + $0x78] sm:$0xff] }
 0x290   : > { %1253 = vmatprep.subr.bf16.mxu1 %v1238_v58  ;;  %v1245_v28 = vld [vmem:[#allocation2 + $0x70] sm:$0xff]  ;;  %v1933_v31 = vld [vmem:[%s3714_s20] ss:$0 sm:$0xff]  ;;  %v1577_v16 = vld [vmem:[#allocation3 + $0x48] sm:$0xff]  ;;  %p2716_p13 = pneg %p2715_p5  ;;  %s2854_s20 = smov [#allocation13]  }
 0x291   : > { %2180 = vmatpush3.bf16.msra.mxu0 %v2492_v46  ;;  %v1576_v14 = vld [vmem:[#allocation3 + $0x40] sm:$0xff]  ;;  %v1570_v9 = vld [vmem:[#allocation3 + $0x10] sm:$0xff] }
 0x292   : > { %2181 = vmatprep.subr.bf16.mxu0 %v2493_v50  ;;  %v1568_v15 = vld [vmem:[#allocation3] sm:$0xff] }
 0x293   : > { %1254 = vmatpush1.bf16.msra.mxu1 %v1237_v61 }
 0x294   : > { %1255 = vmatprep.subr.bf16.mxu1 %v1240_v22 }
 0x295   : > { %2182 = vmatpush3.bf16.msra.mxu0 %v2493_v50 }
 0x296   : > { %2183 = vmatprep.subr.bf16.mxu0 %v2494_v56 }
 0x297   : > { %1256 = vmatpush1.bf16.msra.mxu1 %v1239_v44 }
 0x298   : > { %1257 = vmatprep.subr.bf16.mxu1 %v1242_v45 }
 0x299   : > { %2184 = vmatpush3.bf16.msra.mxu0 %v2494_v56 }
 0x29a   : > { %2185 = vmatprep.subr.bf16.mxu0 %v2495_v18 }
 0x29b   : > { %1258 = vmatpush1.bf16.msra.mxu1 %v1241_v2 }
 0x29c   : > { %1259 = vmatprep.subr.bf16.mxu1 %v1244_v5 }
 0x29d   : > { %2186 = vmatpush3.bf16.msra.mxu0 %v2495_v18 }
 0x29e   : > { %2187 = vmatprep.subr.bf16.mxu0 %v2496_v60 }
 0x29f   : > { %1260 = vmatpush1.bf16.msra.mxu1 %v1243_v6 }
 0x2a0   : > { %1261 = vmatprep.subr.bf16.mxu1 %v1246_v25 }
 0x2a1   : > { %2188 = vmatpush3.bf16.msra.mxu0 %v2496_v60 }
 0x2a2   : > { %2013 = vmatprep.subr.bf16.mxu0 %v1576_v14 }
 0x2a3   : > { %1262 = vmatpush1.bf16.msra.mxu1 %v1245_v28 }
 0x2a4   : > { %2190 = vmatmul.mubr.bf16.vlgmr.msra.gmra.mrb[0].mxu0 %v1048_v54  ;;  %2205 = vmatprep.subr.bf16.mxu1 %v1576_v14 }
 0x2a5   : > { %2193 = vmatprep.mubr.bf16.mxu0 %v1049_v1  ;;  %2014 = vmatpush3.bf16.msra.mxu0 %v1568_v15 }
 0x2a6   : > { %2015 = vmatprep.subr.bf16.mxu0 %v1577_v16 }
 0x2ac   : > { %2194 = vmatmul.mubr.bf16.gmra.mrb[4].mxu0 %v1050_v51 }
 0x2ad   : > { %2197 = vmatprep.mubr.bf16.mxu0 %v1051_v52 }
 0x2b4   : > { %2198 = vmatmul.mubr.bf16.gmra.mrb[8].mxu0 %v1052_v17  ;;  %v1569_v17 = vld [vmem:[#allocation3 + $0x8] sm:$0xff] }
 0x2b5   : > { %2201 = vmatprep.mubr.bf16.mxu0 %v1053_v24  ;;  %v1578_v24 = vld [vmem:[#allocation3 + $0x50] sm:$0xff]  ;;  %2016 = vmatpush3.bf16.msra.mxu0 %v1569_v17 }
 0x2b6   : > { %2017 = vmatprep.subr.bf16.mxu0 %v1578_v24 }
 0x2b9   : > { %2018 = vmatpush3.bf16.msra.mxu0 %v1570_v9 }
 0x2bc   : > { %2202 = vmatmul.mubr.bf16.gmra.mrb[12].mxu0 %v1054_v27 }
 0x377   : > { %v2191_v30 = vpop.f32.mrb[0].mxu0 }
 0x378   : > { %v1160_v32 = vpop.f32.mrb[1].mxu0  ;;  %v1169_v19 = vadd.f32 %v2191_v30, %v1933_v31 }
 0x379   : > { %v2192_v33 = vpop.f32.mrb[2].mxu0  ;;  %v1161_v34 = vadd.f32 %v1933_v31, %v1160_v32 }
 0x37a   : > { %v1172_v8 = vadd.f32 %v2192_v33, %v1933_v31  ;;  %v1163_v11 = vpop.f32.mrb[3].mxu0 }
 0x37b   : > { %v1164_v35 = vadd.f32 %v1933_v31, %v1163_v11 }
 0x37c   : > { %v1224_v12 = vpack.c.bf16 %v1172_v8, %v1169_v19 }
 0x37d   : > { %v1223_v36 = vpack.c.bf16 %v1164_v35, %v1161_v34 }
 0x37f   : > { %1280 = vmatmul.mubr.bf16.vlgmr.msra.gmra.mrb[0].mxu1 %v1223_v36  ;;  %v2195_v39 = vpop.f32.mrb[4].mxu0 }
 0x380   : > { %v1185_v40 = vadd.f32 %v2195_v39, %v1933_v31  ;;  %v1176_v41 = vpop.f32.mrb[5].mxu0  ;;  %1289 = vmatprep.mubr.bf16.mxu1 %v2853_v29  ;;  %2213 = vmatpush3.bf16.msra.mxu1 %v1568_v15  ;;  %v1579_v39 = vld [vmem:[#allocation3 + $0x58] sm:$0xff] }
 0x381   : > { %v1177_v42 = vadd.f32 %v1933_v31, %v1176_v41  ;;  %v2196_v37 = vpop.f32.mrb[6].mxu0  ;;  %2206 = vmatprep.subr.bf16.mxu1 %v1577_v16  ;;  %2019 = vmatprep.subr.bf16.mxu0 %v1579_v39 }
 0x382   : > { %v1188_v38 = vadd.f32 %v2196_v37, %v1933_v31  ;;  %v1179_v43 = vpop.f32.mrb[7].mxu0 }
 0x383   : > { %v1180_v46 = vadd.f32 %v1933_v31, %v1179_v43 }
 0x384   : > { %v1226_v20 = vpack.c.bf16 %v1188_v38, %v1185_v40  ;;  %2214 = vmatpush3.bf16.msra.mxu1 %v1569_v17  ;;  %v1571_v40 = vld [vmem:[#allocation3 + $0x18] sm:$0xff]  ;;  %v1572_v38 = vld [vmem:[#allocation3 + $0x20] sm:$0xff] }
 0x385   : > { %v1225_v50 = vpack.c.bf16 %v1180_v46, %v1177_v42  ;;  %2207 = vmatprep.subr.bf16.mxu1 %v1578_v24  ;;  %2020 = vmatpush3.bf16.msra.mxu0 %v1571_v40  ;;  %v1580_v42 = vld [vmem:[#allocation3 + $0x60] sm:$0xff] }
 0x386   : > { %2021 = vmatprep.subr.bf16.mxu0 %v1580_v42 }
 0x387   : > { %1290 = vmatmul.mubr.bf16.gmra.mrb[4].mxu1 %v1224_v12  ;;  %v2199_v53 = vpop.f32.mrb[8].mxu0 }
 0x388   : > { %1299 = vmatprep.mubr.bf16.mxu1 %v2853_v29  ;;  %v1201_v10 = vadd.f32 %v2199_v53, %v1933_v31  ;;  %v1192_v55 = vpop.f32.mrb[9].mxu0  ;;  %2215 = vmatpush3.bf16.msra.mxu1 %v1570_v9  ;;  %v1581_v53 = vld [vmem:[#allocation3 + $0x68] sm:$0xff] }
 0x389   : > { %v1193_v56 = vadd.f32 %v1933_v31, %v1192_v55  ;;  %v2200_v57 = vpop.f32.mrb[10].mxu0  ;;  %2208 = vmatprep.subr.bf16.mxu1 %v1579_v39  ;;  %2022 = vmatpush3.bf16.msra.mxu0 %v1572_v38 }
 0x38a   : > { %v1204_v47 = vadd.f32 %v2200_v57, %v1933_v31  ;;  %v1195_v18 = vpop.f32.mrb[11].mxu0  ;;  %2023 = vmatprep.subr.bf16.mxu0 %v1581_v53 }
 0x38b   : > { %v1196_v21 = vadd.f32 %v1933_v31, %v1195_v18 }
 0x38c   : > { %v1228_v58 = vpack.c.bf16 %v1204_v47, %v1201_v10  ;;  %2216 = vmatpush3.bf16.msra.mxu1 %v1571_v40  ;;  %v1573_v10 = vld [vmem:[#allocation3 + $0x28] sm:$0xff]  ;;  %v1574_v47 = vld [vmem:[#allocation3 + $0x30] sm:$0xff] }
 0x38d   : > { %v1227_v60 = vpack.c.bf16 %v1196_v21, %v1193_v56  ;;  %2209 = vmatprep.subr.bf16.mxu1 %v1580_v42  ;;  %2024 = vmatpush3.bf16.msra.mxu0 %v1573_v10  ;;  %v1582_v56 = vld [vmem:[#allocation3 + $0x70] sm:$0xff] }
 0x38e   : > { %2025 = vmatprep.subr.bf16.mxu0 %v1582_v56 }
 0x38f   : > { %1300 = vmatmul.mubr.bf16.gmra.mrb[8].mxu1 %v1225_v50  ;;  %v2203_v61 = vpop.f32.mrb[12].mxu0 }
 0x390   : > { %1309 = vmatprep.mubr.bf16.mxu1 %v2853_v29  ;;  %v1217_v22 = vadd.f32 %v2203_v61, %v1933_v31  ;;  %v1208_v44 = vpop.f32.mrb[13].mxu0  ;;  %2217 = vmatpush3.bf16.msra.mxu1 %v1572_v38  ;;  %v1583_v61 = vld [vmem:[#allocation3 + $0x78] sm:$0xff] }
 0x391   : > { %v1209_v45 = vadd.f32 %v1933_v31, %v1208_v44  ;;  %v2204_v54 = vpop.f32.mrb[14].mxu0  ;;  %2210 = vmatprep.subr.bf16.mxu1 %v1581_v53  ;;  %2026 = vmatpush3.bf16.msra.mxu0 %v1574_v47 }
 0x392   : > { %v1220_v1 = vadd.f32 %v2204_v54, %v1933_v31  ;;  %v1211_v2 = vpop.f32.mrb[15].mxu0  ;;  %2027 = vmatprep.subr.bf16.mxu0 %v1583_v61 }
 0x393   : > { %v1212_v51 = vadd.f32 %v1933_v31, %v1211_v2 }
 0x394   : > { %v1230_v52 = vpack.c.bf16 %v1220_v1, %v1217_v22  ;;  %2218 = vmatpush3.bf16.msra.mxu1 %v1573_v10  ;;  %v1575_v22 = vld [vmem:[#allocation3 + $0x38] sm:$0xff] }
 0x395   : > { %v1229_v59 = vpack.c.bf16 %v1212_v51, %v1209_v45  ;;  %2211 = vmatprep.subr.bf16.mxu1 %v1582_v56  ;;  %2028 = vmatpush3.bf16.msra.mxu0 %v1575_v22 }
 0x397   : > { %1310 = vmatmul.mubr.bf16.gmra.mrb[12].mxu1 %v1226_v20 }
 0x398   : > { %1319 = vmatprep.mubr.bf16.mxu1 %v2853_v29  ;;  %2219 = vmatpush3.bf16.msra.mxu1 %v1574_v47 }
 0x399   : > { %2212 = vmatprep.subr.bf16.mxu1 %v1583_v61 }
 0x39c   : > { %2220 = vmatpush3.bf16.msra.mxu1 %v1575_v22 }
 0x39f   : > { %1320 = vmatmul.mubr.bf16.gmra.mrb[16].mxu1 %v1227_v60 }
 0x3a0   : > { %1329 = vmatprep.mubr.bf16.mxu1 %v2853_v29 }
 0x3a7   : > { %1330 = vmatmul.mubr.bf16.gmra.mrb[20].mxu1 %v1228_v58 }
 0x3a8   : > { %1339 = vmatprep.mubr.bf16.mxu1 %v2853_v29 }
 0x3af   : > { %1340 = vmatmul.mubr.bf16.gmra.mrb[24].mxu1 %v1229_v59 }
 0x3b0   : > { %1349 = vmatprep.mubr.bf16.mxu1 %v2853_v29 }
 0x3b7   : > { %1350 = vmatmul.mubr.bf16.gmra.mrb[28].mxu1 %v1230_v52 }
 0x452   : > { %v3417_v26 = vpop.f32.mrb[0].mxu1 }
 0x453   : > { %v3419_v27 = vpop.f32.mrb[1].mxu1 }
 0x454   : > { %v3421_v5 = vpop.f32.mrb[2].mxu1  ;;  %v1360_v6 = vmax.f32 %v3417_v26, %v3419_v27 }
 0x455   : > { %v3425_v25 = vpop.f32.mrb[3].mxu1 }
 0x456   : > { %1361 = vmax.xlane.f32.xlu0 %v1360_v6  ;;  %v1363_v28 = vmax.f32 %v3421_v5, %v3425_v25 }
 0x45a   : > { %1364 = vmax.xlane.f32.xlu0 %v1363_v28  ;;  %v3429_v29 = vpop.f32.mrb[4].mxu1 }
 0x45b   : > { %v3431_v30 = vpop.f32.mrb[5].mxu1 }
 0x45c   : > { %v3433_v31 = vpop.f32.mrb[6].mxu1  ;;  %v1366_v32 = vmax.f32 %v3429_v29, %v3431_v30 }
 0x45d   : > { %v3437_v33 = vpop.f32.mrb[7].mxu1 }
 0x45e   : > { %1367 = vmax.xlane.f32.xlu1 %v1366_v32  ;;  %v1369_v19 = vmax.f32 %v3433_v31, %v3437_v33 }
 0x462   : > { %1370 = vmax.xlane.f32.xlu1 %v1369_v19  ;;  %v3441_v8 = vpop.f32.mrb[8].mxu1 }
 0x463   : > { %v3443_v11 = vpop.f32.mrb[9].mxu1 }
 0x464   : > { %v3445_v34 = vpop.f32.mrb[10].mxu1  ;;  %v1372_v35 = vmax.f32 %v3441_v8, %v3443_v11 }
 0x465   : > { %v3449_v12 = vpop.f32.mrb[11].mxu1 }
 0x466   : > { %1373 = vmax.xlane.f32.xlu0 %v1372_v35  ;;  %v1375_v36 = vmax.f32 %v3445_v34, %v3449_v12 }
 0x468   : > { %1376 = vmax.xlane.f32.xlu1 %v1375_v36 }
 0x46a   : > { %v3453_v41 = vpop.f32.mrb[12].mxu1 }
 0x46b   : > { %v3455_v37 = vpop.f32.mrb[13].mxu1 }
 0x46c   : > { %v3457_v43 = vpop.f32.mrb[14].mxu1  ;;  %v1378_v46 = vmax.f32 %v3453_v41, %v3455_v37 }
 0x46d   : > { %v3461_v20 = vpop.f32.mrb[15].mxu1 }
 0x46e   : > { %1379 = vmax.xlane.f32.xlu0 %v1378_v46  ;;  %v1381_v50 = vmax.f32 %v3457_v43, %v3461_v20 }
 0x470   : > { %1382 = vmax.xlane.f32.xlu1 %v1381_v50 }
 0x472   : > { %v3465_v55 = vpop.f32.mrb[16].mxu1 }
 0x473   : > { %v3467_v57 = vpop.f32.mrb[17].mxu1 }
 0x474   : > { %v3469_v18 = vpop.f32.mrb[18].mxu1  ;;  %v1384_v21 = vmax.f32 %v3465_v55, %v3467_v57 }
 0x475   : > { %v3473_v58 = vpop.f32.mrb[19].mxu1 }
 0x476   : > { %1385 = vmax.xlane.f32.xlu0 %v1384_v21  ;;  %v1387_v60 = vmax.f32 %v3469_v18, %v3473_v58 }
 0x478   : > { %1388 = vmax.xlane.f32.xlu1 %v1387_v60 }
 0x47a   : > { %v3477_v44 = vpop.f32.mrb[20].mxu1 }
 0x47b   : > { %v3479_v45 = vpop.f32.mrb[21].mxu1 }
 0x47c   : > { %v3481_v54 = vpop.f32.mrb[22].mxu1  ;;  %v1390_v1 = vmax.f32 %v3477_v44, %v3479_v45 }
 0x47d   : > { %v3485_v2 = vpop.f32.mrb[23].mxu1 }
 0x47e   : > { %v1393_v51 = vmax.f32 %v3481_v54, %v3485_v2 }
 0x482   : > { %v3489_v52 = vpop.f32.mrb[24].mxu1 }
 0x483   : > { %v3491_v59 = vpop.f32.mrb[25].mxu1 }
 0x484   : > { %v3493_v14 = vpop.f32.mrb[26].mxu1  ;;  %v1396_v15 = vmax.f32 %v3489_v52, %v3491_v59 }
 0x485   : > { %v3497_v16 = vpop.f32.mrb[27].mxu1 }
 0x486   : > { %1397 = vmax.xlane.f32.xlu0 %v1396_v15  ;;  %v1399_v17 = vmax.f32 %v3493_v14, %v3497_v16 }
 0x488   : > { %1400 = vmax.xlane.f32.xlu1 %v1399_v17 }
 0x48a   : > { %1391 = vmax.xlane.f32.xlu0 %v1390_v1  ;;  %v3501_v24 = vpop.f32.mrb[28].mxu1 }
 0x48b   : > { %v3503_v9 = vpop.f32.mrb[29].mxu1 }
 0x48c   : > { %1394 = vmax.xlane.f32.xlu1 %v1393_v51  ;;  %v3505_v6 = vpop.f32.mrb[30].mxu1  ;;  %v1402_v28 = vmax.f32 %v3501_v24, %v3503_v9 }
 0x48d   : > { %v3509_v32 = vpop.f32.mrb[31].mxu1 }
 0x48e   : > { %1403 = vmax.xlane.f32.xlu0 %v1402_v28  ;;  %v1405_v19 = vmax.f32 %v3505_v6, %v3509_v32 }
 0x490   : > { %1406 = vmax.xlane.f32.xlu1 %v1405_v19 }
 0x4e3   : > { %v1362_v35 = vpop.xlane.xlu0 %1361 }
 0x4e4   : > { %v1408_v36 = vsub.f32 %v3417_v26, %v1362_v35  ;;  %v1409_v39 = vsub.f32 %v3419_v27, %v1362_v35 }
 0x4e6   : > { %v1440_v40 = vmul.f32 1.442695, %v1408_v36  ;;  %v1442_v42 = vmul.f32 1.442695, %v1409_v39 }
 0x4e7   : > { %v1365_v38 = vpop.xlane.xlu0 %1364 }
 0x4e8   : > { %2497 = vpow2.f32 %v1440_v40  ;;  %v1410_v46 = vsub.f32 %v3421_v5, %v1365_v38  ;;  %v1411_v50 = vsub.f32 %v3425_v25, %v1365_v38 }
 0x4e9   : > { %2499 = vpow2.f32 %v1442_v42 }
 0x4ea   : > { %v1444_v53 = vmul.f32 1.442695, %v1410_v46  ;;  %v1446_v10 = vmul.f32 1.442695, %v1411_v50 }
 0x4eb   : > { %v1368_v56 = vpop.xlane.xlu1 %1367 }
 0x4ec   : > { %2501 = vpow2.f32 %v1444_v53  ;;  %v1412_v47 = vsub.f32 %v3429_v29, %v1368_v56  ;;  %v1413_v21 = vsub.f32 %v3431_v30, %v1368_v56 }
 0x4ed   : > { %2503 = vpow2.f32 %v1446_v10 }
 0x4ee   : > { %v1448_v26 = vmul.f32 1.442695, %v1412_v47  ;;  %v1450_v27 = vmul.f32 1.442695, %v1413_v21 }
 0x4ef   : > { %v1371_v60 = vpop.xlane.xlu1 %1370 }
 0x4f0   : > { %2505 = vpow2.f32 %v1448_v26  ;;  %v1414_v61 = vsub.f32 %v3433_v31, %v1371_v60  ;;  %v1415_v5 = vsub.f32 %v3437_v33, %v1371_v60 }
 0x4f1   : > { %2507 = vpow2.f32 %v1450_v27 }
 0x4f2   : > { %v2498_v25 = vpop.eup %2497  ;;  %v1452_v22 = vmul.f32 1.442695, %v1414_v61  ;;  %v1454_v1 = vmul.f32 1.442695, %v1415_v5 }
 0x4f3   : > { %v2500_v51 = vpop.eup %2499  ;;  %v1374_v15 = vpop.xlane.xlu0 %1373 }
 0x4f4   : > { %2509 = vpow2.f32 %v1452_v22  ;;  %v1416_v29 = vsub.f32 %v3441_v8, %v1374_v15  ;;  %v1417_v30 = vsub.f32 %v3443_v11, %v1374_v15  ;;  %v1504_v17 = vadd.f32 %v2500_v51, %v2498_v25 }
 0x4f5   : > { %2511 = vpow2.f32 %v1454_v1  ;;  %v1377_v28 = vpop.xlane.xlu1 %1376 }
 0x4f6   : > { %v2502_v19 = vpop.eup %2501  ;;  %v1456_v35 = vmul.f32 1.442695, %v1416_v29  ;;  %v1458_v36 = vmul.f32 1.442695, %v1417_v30  ;;  %v1418_v31 = vsub.f32 %v3445_v34, %v1377_v28  ;;  %v1419_v33 = vsub.f32 %v3449_v12, %v1377_v28  ;;  %1505 = vadd.xlane.f32.xlu0 %v1504_v17 }
 0x4f7   : > { %v2504_v39 = vpop.eup %2503  ;;  %v1552_v40 = vpack.c.bf16 %v2502_v19, %v2498_v25 }
 0x4f8   : > { %2513 = vpow2.f32 %v1456_v35  ;;  %v1460_v42 = vmul.f32 1.442695, %v1418_v31  ;;  %v1462_v38 = vmul.f32 1.442695, %v1419_v33  ;;  %v1553_v46 = vpack.c.bf16 %v2504_v39, %v2500_v51 }
 0x4f9   : > { %2515 = vpow2.f32 %v1458_v36  ;;  %v1507_v8 = vadd.f32 %v2504_v39, %v2502_v19 }
 0x4fa   : > { %v2506_v11 = vpop.eup %2505  ;;  %2517 = vpow2.f32 %v1460_v42  ;;  %1616 = vmatprep.mubr.bf16.mxu0 %v1553_v46 }
 0x4fb   : > { %v2508_v50 = vpop.eup %2507  ;;  %2519 = vpow2.f32 %v1462_v38  ;;  %1508 = vadd.xlane.f32.xlu1 %v1507_v8  ;;  %1617 = vmatmul.mubr.bf16.vlgmr.msra.gmra.mrb[16].mxu0 %v1552_v40  ;;  %v1380_v53 = vpop.xlane.xlu0 %1379 }
 0x4fc   : > { %v1420_v34 = vsub.f32 %v3453_v41, %v1380_v53  ;;  %v1421_v12 = vsub.f32 %v3455_v37, %v1380_v53  ;;  %v1510_v10 = vadd.f32 %v2508_v50, %v2506_v11 }
 0x4fd   : > { %v1383_v56 = vpop.xlane.xlu1 %1382 }
 0x4fe   : > { %v2510_v47 = vpop.eup %2509  ;;  %v1464_v21 = vmul.f32 1.442695, %v1420_v34  ;;  %v1466_v26 = vmul.f32 1.442695, %v1421_v12  ;;  %v1422_v27 = vsub.f32 %v3457_v43, %v1383_v56  ;;  %v1423_v60 = vsub.f32 %v3461_v20, %v1383_v56  ;;  %1511 = vadd.xlane.f32.xlu0 %v1510_v10 }
 0x4ff   : > { %v2512_v61 = vpop.eup %2511  ;;  %v1554_v5 = vpack.c.bf16 %v2510_v47, %v2506_v11 }
 0x500   : > { %2521 = vpow2.f32 %v1464_v21  ;;  %v1468_v25 = vmul.f32 1.442695, %v1422_v27  ;;  %v1470_v22 = vmul.f32 1.442695, %v1423_v60  ;;  %v1555_v1 = vpack.c.bf16 %v2512_v61, %v2508_v50 }
 0x501   : > { %2523 = vpow2.f32 %v1466_v26  ;;  %v1513_v41 = vadd.f32 %v2512_v61, %v2510_v47 }
 0x502   : > { %v2514_v51 = vpop.eup %2513  ;;  %2525 = vpow2.f32 %v1468_v25  ;;  %1624 = vmatprep.mubr.bf16.mxu0 %v1555_v1 }
 0x503   : > { %v2516_v37 = vpop.eup %2515  ;;  %2527 = vpow2.f32 %v1470_v22  ;;  %1514 = vadd.xlane.f32.xlu1 %v1513_v41  ;;  %1625 = vmatmul.mubr.bf16.gmra.mrb[20].mxu0 %v1554_v5  ;;  %v1386_v15 = vpop.xlane.xlu0 %1385 }
 0x504   : > { %v2518_v43 = vpop.eup %2517  ;;  %v1424_v20 = vsub.f32 %v3465_v55, %v1386_v15  ;;  %v1425_v29 = vsub.f32 %v3467_v57, %v1386_v15  ;;  %v1516_v30 = vadd.f32 %v2516_v37, %v2514_v51 }
 0x505   : > { %v2520_v17 = vpop.eup %2519  ;;  %v1389_v28 = vpop.xlane.xlu1 %1388  ;;  %v1556_v19 = vpack.c.bf16 %v2518_v43, %v2514_v51 }
 0x506   : > { %v1472_v35 = vmul.f32 1.442695, %v1424_v20  ;;  %v1474_v36 = vmul.f32 1.442695, %v1425_v29  ;;  %v1426_v31 = vsub.f32 %v3469_v18, %v1389_v28  ;;  %v1427_v33 = vsub.f32 %v3473_v58, %v1389_v28  ;;  %1517 = vadd.xlane.f32.xlu0 %v1516_v30 }
 0x507   : > { %v1557_v39 = vpack.c.bf16 %v2520_v17, %v2516_v37  ;;  %v1519_v40 = vadd.f32 %v2520_v17, %v2518_v43 }
 0x508   : > { %2529 = vpow2.f32 %v1472_v35  ;;  %v1476_v42 = vmul.f32 1.442695, %v1426_v31  ;;  %v1478_v38 = vmul.f32 1.442695, %v1427_v33 }
 0x509   : > { %2531 = vpow2.f32 %v1474_v36  ;;  %1632 = vmatprep.mubr.bf16.mxu0 %v1557_v39  ;;  %1520 = vadd.xlane.f32.xlu1 %v1519_v40 }
 0x50a   : > { %v2522_v55 = vpop.eup %2521  ;;  %2533 = vpow2.f32 %v1476_v42 }
 0x50b   : > { %v2524_v57 = vpop.eup %2523  ;;  %2535 = vpow2.f32 %v1478_v38  ;;  %1633 = vmatmul.mubr.bf16.gmra.mrb[24].mxu0 %v1556_v19 }
 0x50c   : > { %v2526_v46 = vpop.eup %2525  ;;  %v1522_v8 = vadd.f32 %v2524_v57, %v2522_v55 }
 0x50d   : > { %v2528_v11 = vpop.eup %2527  ;;  %v1558_v18 = vpack.c.bf16 %v2526_v46, %v2522_v55 }
 0x50e   : > { %1523 = vadd.xlane.f32.xlu0 %v1522_v8  ;;  %v1559_v58 = vpack.c.bf16 %v2528_v11, %v2524_v57  ;;  %v1525_v50 = vadd.f32 %v2528_v11, %v2526_v46 }
 0x510   : > { %1640 = vmatprep.mubr.bf16.mxu0 %v1559_v58  ;;  %1526 = vadd.xlane.f32.xlu1 %v1525_v50 }
 0x512   : > { %v2530_v53 = vpop.eup %2529 }
 0x513   : > { %v2532_v34 = vpop.eup %2531  ;;  %1641 = vmatmul.mubr.bf16.gmra.mrb[28].mxu0 %v1558_v18  ;;  %v1398_v12 = vpop.xlane.xlu0 %1397 }
 0x514   : > { %v2534_v10 = vpop.eup %2533  ;;  %v1432_v56 = vsub.f32 %v3489_v52, %v1398_v12  ;;  %v1433_v47 = vsub.f32 %v3491_v59, %v1398_v12  ;;  %v1528_v21 = vadd.f32 %v2532_v34, %v2530_v53 }
 0x515   : > { %v2536_v26 = vpop.eup %2535  ;;  %v1401_v27 = vpop.xlane.xlu1 %1400  ;;  %v1560_v60 = vpack.c.bf16 %v2534_v10, %v2530_v53 }
 0x516   : > { %v1488_v61 = vmul.f32 1.442695, %v1432_v56  ;;  %v1490_v5 = vmul.f32 1.442695, %v1433_v47  ;;  %v1434_v25 = vsub.f32 %v3493_v14, %v1401_v27  ;;  %v1435_v22 = vsub.f32 %v3497_v16, %v1401_v27  ;;  %1529 = vadd.xlane.f32.xlu0 %v1528_v21 }
 0x517   : > { %v1561_v1 = vpack.c.bf16 %v2536_v26, %v2532_v34  ;;  %v1392_v41 = vpop.xlane.xlu0 %1391  ;;  %v1531_v51 = vadd.f32 %v2536_v26, %v2534_v10 }
 0x518   : > { %2537 = vpow2.f32 %v1488_v61  ;;  %v1492_v37 = vmul.f32 1.442695, %v1434_v25  ;;  %v1494_v15 = vmul.f32 1.442695, %v1435_v22  ;;  %v1428_v52 = vsub.f32 %v3477_v44, %v1392_v41 }
 0x519   : > { %2539 = vpow2.f32 %v1490_v5  ;;  %1648 = vmatprep.mubr.bf16.mxu0 %v1561_v1  ;;  %v1429_v59 = vsub.f32 %v3479_v45, %v1392_v41  ;;  %1532 = vadd.xlane.f32.xlu1 %v1531_v51  ;;  %v1395_v43 = vpop.xlane.xlu1 %1394 }
 0x51a   : > { %2541 = vpow2.f32 %v1492_v37  ;;  %v1480_v20 = vmul.f32 1.442695, %v1428_v52  ;;  %v1430_v14 = vsub.f32 %v3481_v54, %v1395_v43  ;;  %v1431_v16 = vsub.f32 %v3485_v2, %v1395_v43 }
 0x51b   : > { %2543 = vpow2.f32 %v1494_v15  ;;  %v1482_v29 = vmul.f32 1.442695, %v1429_v59  ;;  %1649 = vmatmul.mubr.bf16.gmra.mrb[32].mxu0 %v1560_v60  ;;  %v1404_v30 = vpop.xlane.xlu0 %1403  ;;  %v3545_v37 = vstv %s1713_s18  ;;  %s2717_s18 = sshll.u32 %s2854_s20, 4  ;;  %s2718_s18 = int_to_ptr.vmem [resolvable:$false] %s2717_s18 }
 0x51c   : > { %2545 = vpow2.f32 %v1480_v20  ;;  %v1484_v17 = vmul.f32 1.442695, %v1430_v14  ;;  %v1486_v28 = vmul.f32 1.442695, %v1431_v16  ;;  %v1436_v44 = vsub.f32 %v3501_v24, %v1404_v30  ;;  %s2719_s23 = scalar_lea.vmem %s2718_s18, 4096  ;;  %p2720_p6 = scmp.lt.s32.totalorder %s3600_s4, %s2718_s18 }
 0x51d   : > { %2547 = vpow2.f32 %v1482_v29  ;;  %v1437_v45 = vsub.f32 %v3503_v9, %v1404_v30  ;;  %v1407_v19 = vpop.xlane.xlu1 %1406  ;;  %p2721_p8 = scmp.lt.s32.totalorder %s2719_s23, %s2713_s1 }
 0x51e   : > { %2549 = vpow2.f32 %v1484_v17  ;;  %v1496_v35 = vmul.f32 1.442695, %v1436_v44  ;;  %v1438_v36 = vsub.f32 %v3505_v6, %v1407_v19  ;;  %v1439_v54 = vsub.f32 %v3509_v32, %v1407_v19 }
 0x51f   : > { %2551 = vpow2.f32 %v1486_v28  ;;  %v1498_v2 = vmul.f32 1.442695, %v1437_v45  ;;  %p2722_p12 = por %p2721_p8, %p2720_p6 }
 0x520   : > { %2553 = vpow2.f32 %v1496_v35  ;;  %v1500_v31 = vmul.f32 1.442695, %v1438_v36  ;;  %v1502_v33 = vmul.f32 1.442695, %v1439_v54 }
 0x521   : > { %2555 = vpow2.f32 %v1498_v2  ;;  %p2723_p4 = pnand %p2722_p12, %p2716_p13 }
 0x522   : > { %v2538_v39 = vpop.eup %2537  ;;  %2557 = vpow2.f32 %v1500_v31 }
 0x523   : > { %v2540_v40 = vpop.eup %2539  ;;  %2559 = vpow2.f32 %v1502_v33 }
 0x524   : > { %v2542_v24 = vpop.eup %2541  ;;  %v1540_v42 = vadd.f32 %v2540_v40, %v2538_v39 }
 0x525   : > { %v2544_v9 = vpop.eup %2543  ;;  %v1564_v38 = vpack.c.bf16 %v2542_v24, %v2538_v39 }
 0x526   : > { %v2546_v55 = vpop.eup %2545  ;;  %v1565_v57 = vpack.c.bf16 %v2544_v9, %v2540_v40  ;;  %v1543_v46 = vadd.f32 %v2544_v9, %v2542_v24 }
 0x527   : > { %v2548_v6 = vpop.eup %2547 }
 0x528   : > { %v2550_v8 = vpop.eup %2549  ;;  %1664 = vmatprep.mubr.bf16.mxu1 %v1565_v57  ;;  %v1534_v32 = vadd.f32 %v2548_v6, %v2546_v55 }
 0x529   : > { %v2552_v11 = vpop.eup %2551  ;;  %1665 = vmatmul.mubr.bf16.vlgmr.msra.gmra.mrb[32].mxu1 %v1564_v38  ;;  %v1562_v18 = vpack.c.bf16 %v2550_v8, %v2546_v55 }
 0x52a   : > { %v2554_v58 = vpop.eup %2553  ;;  %1535 = vadd.xlane.f32.xlu0 %v1534_v32  ;;  %v1563_v50 = vpack.c.bf16 %v2552_v11, %v2548_v6  ;;  %v1537_v53 = vadd.f32 %v2552_v11, %v2550_v8 }
 0x52b   : > { %v2556_v34 = vpop.eup %2555 }
 0x52c   : > { %v2558_v12 = vpop.eup %2557  ;;  %1656 = vmatprep.mubr.bf16.mxu0 %v1563_v50  ;;  %1538 = vadd.xlane.f32.xlu1 %v1537_v53  ;;  %v1546_v10 = vadd.f32 %v2556_v34, %v2554_v58 }
 0x52d   : > { %v2560_v56 = vpop.eup %2559  ;;  %1657 = vmatmul.mubr.bf16.gmra.mrb[36].mxu0 %v1562_v18  ;;  %v1566_v47 = vpack.c.bf16 %v2558_v12, %v2554_v58 }
 0x52e   : > { %1541 = vadd.xlane.f32.xlu0 %v1540_v42  ;;  %v1567_v21 = vpack.c.bf16 %v2560_v56, %v2556_v34  ;;  %v1549_v26 = vadd.f32 %v2560_v56, %v2558_v12 }
 0x530   : > { %1544 = vadd.xlane.f32.xlu1 %v1543_v46  ;;  %1672 = vmatprep.mubr.bf16.mxu1 %v1567_v21 }
 0x531   : > { %1673 = vmatmul.mubr.bf16.gmra.mrb[36].mxu1 %v1566_v47 }
 0x532   : > { %1547 = vadd.xlane.f32.xlu0 %v1546_v10 }
 0x534   : > { %1550 = vadd.xlane.f32.xlu1 %v1549_v26 }
 0x583   : > { %v1506_v27 = vpop.xlane.xlu0 %1505 }
 0x584   : > { %2561 = vrcp.f32 %v1506_v27 }
 0x588   : > { %v1509_v60 = vpop.xlane.xlu1 %1508 }
 0x589   : > { %2563 = vrcp.f32 %v1509_v60 }
 0x58b   : > { %v1512_v61 = vpop.xlane.xlu0 %1511 }
 0x58c   : > { %2565 = vrcp.f32 %v1512_v61 }
 0x58e   : > { %v2562_v51 = vpop.eup %2561 }
 0x590   : > { %v1515_v5 = vpop.xlane.xlu1 %1514 }
 0x591   : > { %2567 = vrcp.f32 %v1515_v5 }
 0x593   : > { %v2564_v43 = vpop.eup %2563  ;;  %v1518_v20 = vpop.xlane.xlu0 %1517 }
 0x594   : > { %2569 = vrcp.f32 %v1518_v20 }
 0x596   : > { %v1521_v29 = vpop.xlane.xlu1 %1520  ;;  %v2566_v36 = vpop.eup %2565 }
 0x597   : > { %2571 = vrcp.f32 %v1521_v29 }
 0x59b   : > { %v2568_v33 = vpop.eup %2567  ;;  %v1524_v39 = vpop.xlane.xlu0 %1523 }
 0x59c   : > { %2573 = vrcp.f32 %v1524_v39 }
 0x59d   : > { %v1527_v24 = vpop.xlane.xlu1 %1526 }
 0x59e   : > { %v2570_v6 = vpop.eup %2569  ;;  %2575 = vrcp.f32 %v1527_v24 }
 0x5a1   : > { %v2572_v18 = vpop.eup %2571 }
 0x5a3   : > { %v1530_v58 = vpop.xlane.xlu0 %1529 }
 0x5a4   : > { %2577 = vrcp.f32 %v1530_v58 }
 0x5a6   : > { %v1533_v53 = vpop.xlane.xlu1 %1532  ;;  %v2574_v26 = vpop.eup %2573 }
 0x5a7   : > { %2579 = vrcp.f32 %v1533_v53  ;;  %v2594_v53 = vld [vmem:[%s3366_s10 + $0x68] sm:$0xff] }
 0x5a8   : > { %v2576_v5 = vpop.eup %2575 }
 0x5ae   : > { %v2578_v20 = vpop.eup %2577 }
 0x5ce   : > { %v2029_v25 = vpop.f32.mrb[16].mxu0 }
 0x5cf   : > { %v2030_v22 = vpop.f32.mrb[17].mxu0 }
 0x5d0   : > { %v2031_v1 = vadd.f32 %v2030_v22, %v2029_v25  ;;  %v2032_v41 = vpop.f32.mrb[18].mxu0 }
 0x5d1   : > { %v2033_v15 = vpop.f32.mrb[19].mxu0 }
 0x5d2   : > { %v1697_v52 = vmul.f32 %v2562_v51, %v2031_v1  ;;  %v2034_v59 = vadd.f32 %v2033_v15, %v2032_v41  ;;  %v1539_v1 = vpop.xlane.xlu1 %1538 }
 0x5d4   : > { %v1715_v14 = vmul.f32 %v3545_v37, %v1697_v52  ;;  %v1698_v16 = vmul.f32 %v2564_v43, %v2034_v59 }
 0x5d6   : > { %v1731_v30 = vadd.f32 %v1715_v14, %v3369_v48  ;;  %v1716_v17 = vmul.f32 %v3545_v37, %v1698_v16  ;;  %v2035_v28 = vpop.f32.mrb[20].mxu0 }
 0x5d7   : > { %v2036_v44 = vpop.f32.mrb[21].mxu0 }
 0x5d8   : > { %1747 = vst [vmem:[%s3177_s2] sm:$0xff] %v1731_v30  ;;  %v1732_v45 = vadd.f32 %v1716_v17, %v3372_v49  ;;  %v2037_v19 = vadd.f32 %v2036_v44, %v2035_v28  ;;  %v2038_v35 = vpop.f32.mrb[22].mxu0  ;;  %v2580_v17 = vpop.eup %2579 }
 0x5d9   : > { %v2039_v54 = vpop.f32.mrb[23].mxu0  ;;  %v1545_v28 = vpop.xlane.xlu1 %1544 }
 0x5da   : > { %1748 = vst [vmem:[%s3177_s2 + $0x8] sm:$0xff] %v1732_v45  ;;  %v1699_v2 = vmul.f32 %v2566_v36, %v2037_v19  ;;  %v2040_v31 = vadd.f32 %v2039_v54, %v2038_v35 }
 0x5dc   : > { %v1717_v48 = vmul.f32 %v3545_v37, %v1699_v2  ;;  %v1700_v40 = vmul.f32 %v2568_v33, %v2040_v31 }
 0x5dd   : > { %v1551_v36 = vpop.xlane.xlu1 %1550 }
 0x5de   : > { %v1733_v42 = vadd.f32 %v1717_v48, %v3377_v23  ;;  %v1718_v49 = vmul.f32 %v3545_v37, %v1700_v40  ;;  %v2041_v9 = vpop.f32.mrb[24].mxu0 }
 0x5df   : > { %v2042_v38 = vpop.f32.mrb[25].mxu0 }
 0x5e0   : > { %1749 = vst [vmem:[%s3177_s2 + $0x10] sm:$0xff] %v1733_v42  ;;  %v1734_v55 = vadd.f32 %v1718_v49, %v3380_v62  ;;  %v2043_v57 = vadd.f32 %v2042_v38, %v2041_v9  ;;  %v2044_v46 = vpop.f32.mrb[26].mxu0 }
 0x5e1   : > { %v2045_v8 = vpop.f32.mrb[27].mxu0 }
 0x5e2   : > { %1750 = vst [vmem:[%s3177_s2 + $0x18] sm:$0xff] %v1734_v55  ;;  %v1701_v32 = vmul.f32 %v2570_v6, %v2043_v57  ;;  %v2046_v11 = vadd.f32 %v2045_v8, %v2044_v46  ;;  %v2593_v6 = vld [vmem:[%s3366_s10 + $0x60] sm:$0xff] }
 0x5e4   : > { %v1719_v23 = vmul.f32 %v3545_v37, %v1701_v32  ;;  %v1702_v50 = vmul.f32 %v2572_v18, %v2046_v11 }
 0x5e6   : > { %v1735_v34 = vadd.f32 %v1719_v23, %v3383_v63  ;;  %v1720_v62 = vmul.f32 %v3545_v37, %v1702_v50  ;;  %v2047_v12 = vpop.f32.mrb[28].mxu0  ;;  %v1536_v63 = vpop.xlane.xlu0 %1535 }
 0x5e7   : > { %v2048_v10 = vpop.f32.mrb[29].mxu0 }
 0x5e8   : > { %1751 = vst [vmem:[%s3177_s2 + $0x20] sm:$0xff] %v1735_v34  ;;  %v1736_v56 = vadd.f32 %v1720_v62, %v3386_v0  ;;  %v2049_v47 = vadd.f32 %v2048_v10, %v2047_v12  ;;  %v2050_v21 = vpop.f32.mrb[30].mxu0 }
 0x5e9   : > { %v2051_v27 = vpop.f32.mrb[31].mxu0 }
 0x5ea   : > { %1752 = vst [vmem:[%s3177_s2 + $0x28] sm:$0xff] %v1736_v56  ;;  %v1703_v60 = vmul.f32 %v2574_v26, %v2049_v47  ;;  %v2052_v61 = vadd.f32 %v2051_v27, %v2050_v21  ;;  %v1542_v16 = vpop.xlane.xlu0 %1541  ;;  %v2595_v26 = vld [vmem:[%s3366_s10 + $0x50] sm:$0xff] }
 0x5eb   : > { %2581 = vrcp.f32 %v1542_v16 }
 0x5ec   : > { %v1721_v25 = vmul.f32 %v3545_v37, %v1703_v60  ;;  %v1704_v22 = vmul.f32 %v2576_v5, %v2052_v61  ;;  %2583 = vrcp.f32 %v1545_v28 }
 0x5ed   : > { %2585 = vrcp.f32 %v1536_v63 }
 0x5ee   : > { %v1737_v41 = vadd.f32 %v1721_v25, %v3393_v3  ;;  %v1722_v0 = vmul.f32 %v3545_v37, %v1704_v22  ;;  %v2053_v51 = vpop.f32.mrb[32].mxu0  ;;  %v1548_v35 = vpop.xlane.xlu0 %1547  ;;  %2587 = vrcp.f32 %v1539_v1  ;;  %v2596_v25 = vld [vmem:[%s3366_s10 + $0x58] sm:$0xff] }
 0x5ef   : > { %v2054_v15 = vpop.f32.mrb[33].mxu0  ;;  %2589 = vrcp.f32 %v1548_v35 }
 0x5f0   : > { %1753 = vst [vmem:[%s3177_s2 + $0x30] sm:$0xff] %v1737_v41  ;;  %v1738_v52 = vadd.f32 %v1722_v0, %v3396_v4  ;;  %v2055_v59 = vadd.f32 %v2054_v15, %v2053_v51  ;;  %v2056_v43 = vpop.f32.mrb[34].mxu0  ;;  %2591 = vrcp.f32 %v1551_v36  ;;  %v2597_v0 = vld [vmem:[%s3366_s10 + $0x70] sm:$0xff] }
 0x5f1   : > { %v2057_v14 = vpop.f32.mrb[35].mxu0 }
 0x5f2   : > { %1754 = vst [vmem:[%s3177_s2 + $0x38] sm:$0xff] %v1738_v52  ;;  %v1705_v29 = vmul.f32 %v2578_v20, %v2055_v59  ;;  %v2058_v30 = vadd.f32 %v2057_v14, %v2056_v43  ;;  %v2598_v52 = vld [vmem:[%s3366_s10 + $0x78] sm:$0xff] }
 0x5f4   : > { %v1723_v3 = vmul.f32 %v3545_v37, %v1705_v29  ;;  %v1706_v44 = vmul.f32 %v2580_v17, %v2058_v30 }
 0x5f5   : > { %v2582_v39 = vpop.eup %2581 }
 0x5f6   : > { %v1739_v45 = vadd.f32 %v1723_v3, %v3399_v7  ;;  %v1724_v4 = vmul.f32 %v3545_v37, %v1706_v44 }
 0x5f8   : > { %1755 = vst [vmem:[%s3177_s2 + $0x40] sm:$0xff] %v1739_v45  ;;  %v1740_v19 = vadd.f32 %v1724_v4, %v3402_v13  ;;  %v2584_v13 = vpop.eup %2583 }
 0x5f9   : > { %v2586_v57 = vpop.eup %2585 }
 0x5fa   : > { %1756 = vst [vmem:[%s3177_s2 + $0x48] sm:$0xff] %v1740_v19  ;;  %v2588_v23 = vpop.eup %2587 }
 0x5fb   : > { %v2590_v47 = vpop.eup %2589 }
 0x5fc   : > { %v2065_v54 = vpop.f32.mrb[32].mxu1  ;;  %v2592_v63 = vpop.eup %2591 }
 0x5fd   : > { %v2066_v2 = vpop.f32.mrb[33].mxu1 }
 0x5fe   : > { %v2067_v31 = vadd.f32 %v2066_v2, %v2065_v54  ;;  %v2068_v33 = vpop.f32.mrb[34].mxu1 }
 0x5ff   : > { %v2069_v7 = vpop.f32.mrb[35].mxu1 }
 0x600   : > { %v1709_v48 = vmul.f32 %v2582_v39, %v2067_v31  ;;  %v2070_v40 = vadd.f32 %v2069_v7, %v2068_v33  ;;  %v2059_v24 = vpop.f32.mrb[36].mxu0 }
 0x601   : > { %v2060_v42 = vpop.f32.mrb[37].mxu0 }
 0x602   : > { %v1727_v49 = vmul.f32 %v3545_v37, %v1709_v48  ;;  %v1710_v9 = vmul.f32 %v2584_v13, %v2070_v40  ;;  %v2061_v38 = vadd.f32 %v2060_v42, %v2059_v24  ;;  %v2062_v55 = vpop.f32.mrb[38].mxu0 }
 0x603   : > { %v2063_v46 = vpop.f32.mrb[39].mxu0 }
 0x604   : > { %v1743_v8 = vadd.f32 %v2593_v6, %v1727_v49  ;;  %v1728_v32 = vmul.f32 %v3545_v37, %v1710_v9  ;;  %v1707_v11 = vmul.f32 %v2586_v57, %v2061_v38  ;;  %v2064_v18 = vadd.f32 %v2063_v46, %v2062_v55  ;;  %v2071_v58 = vpop.f32.mrb[36].mxu1 }
 0x605   : > { %v2072_v50 = vpop.f32.mrb[37].mxu1 }
 0x606   : > { %1759 = vst [vmem:[%s3177_s2 + $0x60] sm:$0xff] %v1743_v8  ;;  %v1744_v34 = vadd.f32 %v2594_v53, %v1728_v32  ;;  %v1725_v62 = vmul.f32 %v3545_v37, %v1707_v11  ;;  %v1708_v12 = vmul.f32 %v2588_v23, %v2064_v18  ;;  %v2073_v10 = vadd.f32 %v2072_v50, %v2071_v58  ;;  %v2074_v56 = vpop.f32.mrb[38].mxu1 }
 0x607   : > { %v2075_v21 = vpop.f32.mrb[39].mxu1 }
 0x608   : > { %1760 = vst [vmem:[%s3177_s2 + $0x68] sm:$0xff] %v1744_v34  ;;  %v1741_v27 = vadd.f32 %v2595_v26, %v1725_v62  ;;  %v1726_v60 = vmul.f32 %v3545_v37, %v1708_v12  ;;  %v1711_v61 = vmul.f32 %v2590_v47, %v2073_v10  ;;  %v2076_v5 = vadd.f32 %v2075_v21, %v2074_v56 }
 0x60a   : > { %1757 = vst [vmem:[%s3177_s2 + $0x50] sm:$0xff] %v1741_v27  ;;  %v1742_v22 = vadd.f32 %v2596_v25, %v1726_v60  ;;  %v1729_v1 = vmul.f32 %v3545_v37, %v1711_v61  ;;  %v1712_v41 = vmul.f32 %v2592_v63, %v2076_v5 }
 0x60c   : > { %1758 = vst [vmem:[%s3177_s2 + $0x58] sm:$0xff] %v1742_v22  ;;  %v1745_v51 = vadd.f32 %v2597_v0, %v1729_v1  ;;  %v1730_v15 = vmul.f32 %v3545_v37, %v1712_v41 }
 0x60e   : > { %1761 = vst [vmem:[%s3177_s2 + $0x70] sm:$0xff] %v1745_v51  ;;  %v1746_v59 = vadd.f32 %v2598_v52, %v1730_v15 }
 0x610   : > { %1762 = vst [vmem:[%s3177_s2 + $0x78] sm:$0xff] %v1746_v59 }
 0x611   : > { %2726 = shalt.err (!%p2723_p4)
}
 0x612   : > { %s2727_s3 = scalar_lea.hbm %s3598_s26, 2048  ;;  %s2731_s25 = scalar_lea.hbm %s3717_s17, 8192 }
 0x613   : > { %p2728_p7 = scmp.ne.s32.totalorder %s3598_s26, %s2727_s3  ;;  %p2732_p1 = scmp.lt.u32.totalorder %s3598_s26, %s3717_s17 }
 0x614   : > { %p2733_p11 = scmp.lt.u32.totalorder %s2731_s25, %s2727_s3  ;;  %p2735_p2 = scmp.lt.u32.totalorder %s2727_s3, %s3598_s26 }
 0x615   : > { %p2729_p3 = pnand %p2728_p7, %p3718_p9 }
 0x616   : > { %p2734_p10 = por %p2733_p11, %p2732_p1 }
 0x617   : > { %p2730_p0 = pneg %p2729_p3 }
 0x618   : > { %p2736_p5 = por %p2735_p2, %p2734_p10 }
 0x61a   : > { %p2737_p13 = pnand %p2736_p5, %p2730_p0 }
 0x61c   : > { %2740 = shalt.err (!%p2737_p13)
}
 0x61d   : > { %s2855_s21 = smov 128   ;;  %s2856_s6 = smov 8  }
 0x61e   : > { %2235 = dma.vmem_to_hbm [thread:$0]  (%p3718_p9), %s3600_s4, 2048, %s3598_s26, %s3607_s7, %s2855_s21, %s2855_s21, %s2856_s6  }
 0x61f PF: > { %s3719_s29 = sld [smem:[#allocation18_spill]]  ;;  %s3720_s1 = sld [smem:[#allocation21_spill]] }
 0x620   : > { %p2262_p6 = scmp.ge.s32.totalorder %s2843_s16, 2 }
 0x625   : > { %s1794_s20 = sand.u32 1, %s3719_s29   ;;  %p3721_p8 = scmp.ne.s32.totalorder %s3720_s1, 0 }
 0x626   : > { %s1795_s18 = scalar_lea.sflag [#allocation7], %s1794_s20 }
 0x627   : > { %p2252_p12 = pnand %p2262_p6, %p3721_p8 }
 0x629   : > { %2798 = dma.done.wait (!%p2252_p12), %s1795_s18, 2048  }
 0x62a   : > { %2800 = vsyncadd (!%p2252_p12), %s1795_s18, 4294965248  ;;  %s27_s16 = sadd.s32 1, %s2843_s16   ;;  %s3722_s29 = smov %s2807_s30 }
 0x62b   : > { %p24_p4 = scmp.ge.s32.totalorder %s27_s16, 6   ;;  %s3723_s30 = smov %s2811_s9 }
 0x62c   : > { %s3724_s9 = smov %s3112_s8  ;;  %s3725_s10 = smov %s2819_s11 }
 0x62d   : > { %s3726_s11 = smov %s2823_s12  ;;  %s3727_s12 = smov %s3107_s28 }
 0x62e   : > { %s3728_s13 = smov %s2835_s14  ;;  %s3729_s7 = smov %s2839_s15 }
 0x62f   : > { %s3730_s14 = smov %s3733_s22  ;;  %s3731_s15 = smov %s3737_s27 }
 0x630   :  { %26 = sbr.rel (!%p24_p4) target bundleno = 19 (0x13), region = 114 }
 0x637   :  { %1800 = vsyncpa [#allocation6], 1 }
 0x638   :  { %1802 = vsyncpa [#allocation6 + $0x1], 1 }
 0x639   :  { %1803 = vsyncpa [#allocation9], 1 }
 0x63a   :  { %1804 = vsyncpa [#allocation12], 1 }
 0x63b   :  { %1805 = vsyncpa [#allocation7], 1 }
 0x63c   :  { %1807 = vsyncpa [#allocation7 + $0x1], 1 }

</bundles_post_ra>
